<compile_context>
chip_gen: v5e
topology: v5e:2x2
jax: 0.10.0
libtpu: 0.0.40
codegen_flags: <defaults>
</compile_context>

<pallas_src>
import jax
import jax.numpy as jnp
from jax.experimental import pallas as pl
from jax.experimental.pallas import tpu as pltpu

EPS = 1e-05
N, CIN, H, W = 1, 1200, 7, 7
COUT = 344
HW = H * W

N_BLOCKS = 2                      # 2 output-channel blocks (one per TC on v7x)
COUT_PAD = 352                    # 344 padded up so each block (176) is a multiple of 8
COUT_BLK = COUT_PAD // N_BLOCKS   # 176


def _fused_kernel(x_ref, scale_ref, w_ref, gamma_ref, beta_ref, o_ref):
    # x_ref:     (CIN, HW)       f32
    # scale_ref: (CIN, 1)        f32
    # w_ref:     (COUT_BLK, CIN) bf16
    # gamma/beta:(COUT_BLK, 1)   f32
    # o_ref:     (COUT_BLK, HW)  f32
    xs = (x_ref[...] * scale_ref[...]).astype(jnp.bfloat16)            # VPU gate + cast
    y = jnp.dot(w_ref[...], xs, preferred_element_type=jnp.float32)    # MXU, (Cb, HW)

    # BatchNorm (training-mode batch statistics), single pass over the lane axis.
    inv_m = 1.0 / y.shape[-1]
    s1 = jnp.sum(y, axis=-1, keepdims=True)
    s2 = jnp.sum(y * y, axis=-1, keepdims=True)
    mean = s1 * inv_m
    var = s2 * inv_m - mean * mean                                     # biased variance
    inv = jax.lax.rsqrt(var + EPS)                                     # EUP
    o_ref[...] = (y - mean) * (inv * gamma_ref[...]) + beta_ref[...]


def prepare_params(w_oihw, gamma, beta):
    """One-time parameter preparation (model-load time, not per forward call):
    reshape the weight to (Cout, Cin) -- no transpose needed in this orientation --
    cast it to bf16 to halve its HBM DMA, and zero-pad Cout 344 -> 352 so the
    output-channel axis splits into two sublane-aligned blocks."""
    cout, cin = w_oihw.shape[0], w_oihw.shape[1]
    w2d = w_oihw.reshape(cout, cin).astype(jnp.bfloat16)
    w_pad = jnp.zeros((COUT_PAD, cin), jnp.bfloat16).at[:cout].set(w2d)
    g_pad = jnp.ones((COUT_PAD, 1), jnp.float32).at[:cout, 0].set(gamma)
    b_pad = jnp.zeros((COUT_PAD, 1), jnp.float32).at[:cout, 0].set(beta)
    return w_pad, g_pad, b_pad


def fused_mul_conv1x1_bn(x_nchw, scale_nc11, w_pad, gamma_pad, beta_pad):
    n, cin, h, w = x_nchw.shape
    assert n == 1, "kernel assumes N == 1 (module spec)"  # TODO(synk): N > 1 support
    hw = h * w

    # NCHW-native views: pure reshapes (contiguous), no transposes, no extra HBM traffic.
    x2d = x_nchw.reshape(cin, hw)
    s2d = scale_nc11.reshape(cin, 1)

    cost = pl.CostEstimate(
        flops=2 * COUT_PAD * cin * hw,
        transcendentals=COUT_PAD,
        bytes_accessed=(x2d.size * 4 + s2d.size * 4 + w_pad.size * 2
                        + gamma_pad.size * 4 + beta_pad.size * 4
                        + COUT_PAD * hw * 4),
    )

    out_pad = pl.pallas_call(
        _fused_kernel,
        out_shape=jax.ShapeDtypeStruct((COUT_PAD, hw), jnp.float32),
        grid=(N_BLOCKS,),
        in_specs=[
            pl.BlockSpec((cin, hw), lambda j: (0, 0)),        # x (shared by both blocks)
            pl.BlockSpec((cin, 1), lambda j: (0, 0)),         # scale (shared)
            pl.BlockSpec((COUT_BLK, cin), lambda j: (j, 0)),  # weight block
            pl.BlockSpec((COUT_BLK, 1), lambda j: (j, 0)),    # gamma block
            pl.BlockSpec((COUT_BLK, 1), lambda j: (j, 0)),    # beta block
        ],
        out_specs=pl.BlockSpec((COUT_BLK, hw), lambda j: (j, 0)),
        compiler_params=pltpu.CompilerParams(
            dimension_semantics=("parallel",),   # 2 TCs on v7x; cheap 2-step loop elsewhere
        ),
        cost_estimate=cost,
    )(x2d, s2d, w_pad, gamma_pad, beta_pad)

    # Drop the padded output channels; reshape straight back to NCHW (no transpose).
    return out_pad[:COUT].reshape(1, COUT, h, w)


def reference(x_nchw, scale_nc11, w_oihw, gamma, beta, matmul_dtype=jnp.float32):
    """Plain-JAX reference matching the PyTorch train-mode forward (N == 1)."""
    x = x_nchw * scale_nc11
    n, cin, h, w = x.shape
    cout = w_oihw.shape[0]
    w2d = w_oihw.reshape(cout, cin).astype(matmul_dtype)
    x2d = x.reshape(cin, h * w).astype(matmul_dtype)
    y = jnp.dot(w2d, x2d, preferred_element_type=jnp.float32).reshape(1, cout, h, w)
    mean = jnp.mean(y, axis=(0, 2, 3), keepdims=True)
    var = jnp.mean((y - mean) ** 2, axis=(0, 2, 3), keepdims=True)
    return ((y - mean) / jnp.sqrt(var + EPS) * gamma.reshape(1, -1, 1, 1)
            + beta.reshape(1, -1, 1, 1))


if __name__ == "__main__":
    key = jax.random.PRNGKey(0)
    k1, k2, k3, k4, k5 = jax.random.split(key, 5)

    x463 = jax.random.normal(k1, (N, CIN, H, W), dtype=jnp.float32)
    x468 = jax.random.normal(k2, (N, CIN, 1, 1), dtype=jnp.float32)
    conv_w = jax.random.normal(k3, (COUT, CIN, 1, 1), dtype=jnp.float32) * 0.02
    gamma = 1.0 + 0.1 * jax.random.normal(k4, (COUT,), dtype=jnp.float32)
    beta = 0.1 * jax.random.normal(k5, (COUT,), dtype=jnp.float32)

    # Parameter prep done once (load time), outside the per-call path.
    w_pad, g_pad, b_pad = prepare_params(conv_w, gamma, beta)

    fused = jax.jit(fused_mul_conv1x1_bn)
    out = jax.block_until_ready(fused(x463, x468, w_pad, g_pad, b_pad))
    assert out.shape == (N, COUT, H, W)

    # Check 1 (tight): reference whose matmul operands are bf16-rounded exactly like
    # the kernel's -> validates the kernel's fused conv+BN logic.
    ref_bf16 = jax.block_until_ready(
        reference(x463, x468, conv_w, gamma, beta, matmul_dtype=jnp.bfloat16))
    err_bf16 = float(jnp.max(jnp.abs(out - ref_bf16)))
    assert jnp.allclose(out, ref_bf16, atol=2e-3, rtol=2e-3), err_bf16

    # Check 2 (looser): full-f32 reference; tolerance accounts for the intentional
    # bf16 operand quantization of the MXU matmul (f32 accumulation).
    ref_f32 = jax.block_until_ready(reference(x463, x468, conv_w, gamma, beta))
    err_f32 = float(jnp.max(jnp.abs(out - ref_f32)))
    assert jnp.allclose(out, ref_f32, atol=3e-2, rtol=3e-2), err_f32

    print("KERNEL_OK")
</pallas_src>

<mosaic_0001>
module attributes {stable_mosaic.version = 11 : i64} {
  func.func @_fused_kernel(%arg0: i32, %arg1: memref<1200x49xf32, #tpu.memory_space<vmem>>, %arg2: memref<1200x1xf32, #tpu.memory_space<vmem>>, %arg3: memref<176x1200xbf16, #tpu.memory_space<vmem>>, %arg4: memref<176x1xf32, #tpu.memory_space<vmem>>, %arg5: memref<176x1xf32, #tpu.memory_space<vmem>>, %arg6: memref<176x49xf32, #tpu.memory_space<vmem>>) attributes {dimension_semantics = [#tpu.dimension_semantics<parallel>], iteration_bounds = array<i64: 2>, scalar_prefetch = 0 : i64, scratch_operands = 0 : i64, tpu.core_type = #tpu.core_type<tc>, window_params = [{pipeline_mode = #tpu.pipeline_mode<synchronous>, transform_indices = @transform_0, window_bounds = array<i64: 1200, 49>}, {pipeline_mode = #tpu.pipeline_mode<synchronous>, transform_indices = @transform_1, window_bounds = array<i64: 1200, 1>}, {transform_indices = @transform_2, window_bounds = array<i64: 176, 1200>}, {transform_indices = @transform_3, window_bounds = array<i64: 176, 1>}, {transform_indices = @transform_4, window_bounds = array<i64: 176, 1>}, {transform_indices = @transform_5, window_bounds = array<i64: 176, 49>}]} {
    %c0 = arith.constant 0 : index
    %c0_0 = arith.constant 0 : index
    %0 = vector.load %arg1[%c0, %c0_0] : memref<1200x49xf32, #tpu.memory_space<vmem>>, vector<1200x49xf32>
    %c0_1 = arith.constant 0 : index
    %c0_2 = arith.constant 0 : index
    %1 = vector.load %arg2[%c0_1, %c0_2] : memref<1200x1xf32, #tpu.memory_space<vmem>>, vector<1200x1xf32>
    %2 = vector.broadcast %1 : vector<1200x1xf32> to vector<1200x49xf32>
    %3 = arith.mulf %0, %2 : vector<1200x49xf32>
    %4 = arith.truncf %3 : vector<1200x49xf32> to vector<1200x49xbf16>
    %c0_3 = arith.constant 0 : index
    %c0_4 = arith.constant 0 : index
    %5 = vector.load %arg3[%c0_3, %c0_4] : memref<176x1200xbf16, #tpu.memory_space<vmem>>, vector<176x1200xbf16>
    %cst = arith.constant dense<0.000000e+00> : vector<176x49xf32>
    %6 = tpu.matmul %5, %4, %cst {dimension_numbers = #tpu.dot_dimension_numbers<[1], [0], [0], [1], [0, 0, 1, 1], [], []>} : vector<176x1200xbf16>, vector<1200x49xbf16>, vector<176x49xf32> -> vector<176x49xf32>
    %cst_5 = arith.constant dense<0.000000e+00> : vector<176xf32>
    %7 = vector.multi_reduction <add>, %6, %cst_5 [1] : vector<176x49xf32> to vector<176xf32>
    %8 = vector.shape_cast %7 : vector<176xf32> to vector<176x1xf32>
    %9 = arith.mulf %6, %6 : vector<176x49xf32>
    %cst_6 = arith.constant dense<0.000000e+00> : vector<176xf32>
    %10 = vector.multi_reduction <add>, %9, %cst_6 [1] : vector<176x49xf32> to vector<176xf32>
    %11 = vector.shape_cast %10 : vector<176xf32> to vector<176x1xf32>
    %cst_7 = arith.constant 0.0204081628 : f32
    %12 = vector.broadcast %cst_7 : f32 to vector<176x1xf32>
    %13 = arith.mulf %8, %12 : vector<176x1xf32>
    %cst_8 = arith.constant 0.0204081628 : f32
    %14 = vector.broadcast %cst_8 : f32 to vector<176x1xf32>
    %15 = arith.mulf %11, %14 : vector<176x1xf32>
    %16 = arith.mulf %13, %13 : vector<176x1xf32>
    %17 = arith.subf %15, %16 : vector<176x1xf32>
    %cst_9 = arith.constant 9.99999974E-6 : f32
    %18 = vector.broadcast %cst_9 : f32 to vector<176x1xf32>
    %19 = arith.addf %17, %18 : vector<176x1xf32>
    %20 = math.rsqrt %19 : vector<176x1xf32>
    %21 = vector.broadcast %13 : vector<176x1xf32> to vector<176x49xf32>
    %22 = arith.subf %6, %21 : vector<176x49xf32>
    %c0_10 = arith.constant 0 : index
    %c0_11 = arith.constant 0 : index
    %23 = vector.load %arg4[%c0_10, %c0_11] : memref<176x1xf32, #tpu.memory_space<vmem>>, vector<176x1xf32>
    %24 = arith.mulf %20, %23 : vector<176x1xf32>
    %25 = vector.broadcast %24 : vector<176x1xf32> to vector<176x49xf32>
    %26 = arith.mulf %22, %25 : vector<176x49xf32>
    %c0_12 = arith.constant 0 : index
    %c0_13 = arith.constant 0 : index
    %27 = vector.load %arg5[%c0_12, %c0_13] : memref<176x1xf32, #tpu.memory_space<vmem>>, vector<176x1xf32>
    %28 = vector.broadcast %27 : vector<176x1xf32> to vector<176x49xf32>
    %29 = arith.addf %26, %28 : vector<176x49xf32>
    %c0_14 = arith.constant 0 : index
    %c0_15 = arith.constant 0 : index
    %30 = vector.load %arg6[%c0_14, %c0_15] : memref<176x49xf32, #tpu.memory_space<vmem>>, vector<176x49xf32>
    tpu.vector_store %arg6[%c0_14, %c0_15], %29 {strides = array<i32>} : memref<176x49xf32, #tpu.memory_space<vmem>>, vector<176x49xf32>,
    return
  }
  func.func @transform_0(%arg0: i32) -> (i32, i32) {
    %c0_i32 = arith.constant 0 : i32
    %c0_i32_0 = arith.constant 0 : i32
    %c0_i32_1 = arith.constant 0 : i32
    return %c0_i32, %c0_i32_0 : i32, i32
  }
  func.func @transform_1(%arg0: i32) -> (i32, i32) {
    %c0_i32 = arith.constant 0 : i32
    %c0_i32_0 = arith.constant 0 : i32
    %c0_i32_1 = arith.constant 0 : i32
    return %c0_i32, %c0_i32_0 : i32, i32
  }
  func.func @transform_2(%arg0: i32) -> (i32, i32) {
    %c0_i32 = arith.constant 0 : i32
    %c0_i32_0 = arith.constant 0 : i32
    return %arg0, %c0_i32 : i32, i32
  }
  func.func @transform_3(%arg0: i32) -> (i32, i32) {
    %c0_i32 = arith.constant 0 : i32
    %c0_i32_0 = arith.constant 0 : i32
    return %arg0, %c0_i32 : i32, i32
  }
  func.func @transform_4(%arg0: i32) -> (i32, i32) {
    %c0_i32 = arith.constant 0 : i32
    %c0_i32_0 = arith.constant 0 : i32
    return %arg0, %c0_i32 : i32, i32
  }
  func.func @transform_5(%arg0: i32) -> (i32, i32) {
    %c0_i32 = arith.constant 0 : i32
    %c0_i32_0 = arith.constant 0 : i32
    return %arg0, %c0_i32 : i32, i32
  }
}

</mosaic_0001>

<bundles_post_ra>
// kernel: fused_mul_conv1x1_bn.1
= control target key start
LH: loop header
LB: loop body
LE: loop exit
PB: predicated region body
PF: predicated region fallthrough
CT: control target
= control target key end

     0   :  { %s4497_s18 = smov 0   ;;  %s7004_s0 = inlined_call_operand.vmem [shape: f32[1200,49], index: 0, kind: input, shape index: {}]   ;;  %s7005_s1 = inlined_call_operand.vmem [shape: f32[1200,1], index: 1, kind: input, shape index: {}]   ;;  %s7006_s2 = inlined_call_operand.vmem [shape: bf16[352,1200], index: 2, kind: input, shape index: {}]   ;;  %s7007_s3 = inlined_call_operand.vmem [shape: f32[352,1], index: 3, kind: input, shape index: {}]   ;;  %s7008_s4 = inlined_call_operand.vmem [shape: f32[352,1], index: 4, kind: input, shape index: {}]   ;;  %s7009_s5 = inlined_call_operand.vmem [shape: f32[352,49], index: 5, kind: output, shape index: {}]  }
   0x1 LB: > { %s3813_s19 = sadd.s32 4294967295, %s4464_s18   ;;  %p3817_p0 = scmp.ge.s32.totalorder %s4464_s18, 1  ;;  %s4464_s18 = sphi %s4497_s18, %s15_s18  }
   0x2   : > { %p211_p1 = scmp.lt.s32.totalorder %s4464_s18, 3 }
   0x4   : > { %p212_p2 = pnand %p3817_p0, %p211_p1 }
   0x6   : > { %215 = sbr.rel (%p212_p2) target bundleno = 1206 (0x4b6), region = 40 }
   0xb   : > { %v430_v0 = vld [vmem:[%s7005_s1 + $0x20] sm:$0xff]  ;;  %v428_v1 = vld [vmem:[%s7005_s1 + $0x10] sm:$0xff]  ;;  %v4466_v3 = vmov 0   ;;  %v431_v4 = vld [vmem:[%s7005_s1 + $0x28] sm:$0xff]  ;;  %s250_s24 = smul.u32 22, %s3813_s19  ;;  %vm2200_vm0 = vcmask 392192  }
   0xc   : > { %v426_v2 = vld [vmem:[%s7005_s1] sm:$0xff]  ;;  %4413 = vset.pattern.permute.xlu2 %v4466_v3  ;;  %4412 = vset.pattern.permute.xlu1 %v4466_v3  ;;  %v429_v5 = vld [vmem:[%s7005_s1 + $0x18] sm:$0xff]  ;;  %v427_v6 = vld [vmem:[%s7005_s1 + $0x8] sm:$0xff]  ;;  %vm2874_vm1 = vcmask 400384  }
   0xd   : > { %4411 = vset.pattern.permute.xlu0 %v4466_v3  ;;  %598 = vperm.xlu2 %4413, %v430_v0   ;;  %v434_v7 = vld [vmem:[%s7005_s1 + $0x40] sm:$0xff]  ;;  %v433_v8 = vld [vmem:[%s7005_s1 + $0x38] sm:$0xff]  ;;  %v432_v9 = vld [vmem:[%s7005_s1 + $0x30] sm:$0xff]  ;;  %p251_p3 = scmp.lt.s32.totalorder %s250_s24, 43 }
   0xe   : > { %588 = vperm.xlu1 %4412, %v428_v1   ;;  %578 = vperm.xlu0 %4411, %v426_v2   ;;  %v437_v10 = vld [vmem:[%s7005_s1 + $0x58] sm:$0xff]  ;;  %v436_v11 = vld [vmem:[%s7005_s1 + $0x50] sm:$0xff]  ;;  %v435_v12 = vld [vmem:[%s7005_s1 + $0x48] sm:$0xff] }
   0xf   : > { %v440_v13 = vld [vmem:[%s7005_s1 + $0x70] sm:$0xff]  ;;  %v439_v14 = vld [vmem:[%s7005_s1 + $0x68] sm:$0xff]  ;;  %v438_v15 = vld [vmem:[%s7005_s1 + $0x60] sm:$0xff]  ;;  %s7120_s24 = smov (!%p251_p3, %s250_s24), 43 }
  0x10   : > { %v443_v16 = vld [vmem:[%s7005_s1 + $0x88] sm:$0xff]  ;;  %v442_v17 = vld [vmem:[%s7005_s1 + $0x80] sm:$0xff]  ;;  %v441_v18 = vld [vmem:[%s7005_s1 + $0x78] sm:$0xff]  ;;  %s4401_s26 = smul.u32 40, %s7120_s24  ;;  %s5608_s29 = sshll.u32 %s7120_s24, 3 }
  0x11   : > { %v446_v19 = vld [vmem:[%s7005_s1 + $0xa0] sm:$0xff]  ;;  %v445_v20 = vld [vmem:[%s7005_s1 + $0x98] sm:$0xff]  ;;  %v444_v21 = vld [vmem:[%s7005_s1 + $0x90] sm:$0xff]  ;;  %s5624_s6 = scalar_lea.vmem %s7008_s4, %s5608_s29  ;;  %s6512_s7 = scalar_lea.vmem %s7007_s3, %s5608_s29 }
  0x12   : > { %v449_v22 = vld [vmem:[%s7005_s1 + $0xb8] sm:$0xff]  ;;  %v448_v23 = vld [vmem:[%s7005_s1 + $0xb0] sm:$0xff]  ;;  %v447_v24 = vld [vmem:[%s7005_s1 + $0xa8] sm:$0xff]  ;;  %s4824_s8 = scalar_lea.vmem %s7006_s2, %s4401_s26  ;;  %s6874_s10 = scalar_lea.vmem %s7009_s5, %s5608_s29 }
  0x13   : > { %v452_v25 = vld [vmem:[%s7005_s1 + $0xd0] sm:$0xff]  ;;  %v451_v26 = vld [vmem:[%s7005_s1 + $0xc8] sm:$0xff]  ;;  %v450_v27 = vld [vmem:[%s7005_s1 + $0xc0] sm:$0xff] }
  0x14   : > { %v455_v28 = vld [vmem:[%s7005_s1 + $0xe8] sm:$0xff]  ;;  %v454_v29 = vld [vmem:[%s7005_s1 + $0xe0] sm:$0xff]  ;;  %v453_v30 = vld [vmem:[%s7005_s1 + $0xd8] sm:$0xff] }
  0x15   : > { %603 = vperm.xlu2 %4413, %v431_v4   ;;  %v458_v31 = vld [vmem:[%s7005_s1 + $0x100] sm:$0xff]  ;;  %v457_v32 = vld [vmem:[%s7005_s1 + $0xf8] sm:$0xff]  ;;  %v456_v33 = vld [vmem:[%s7005_s1 + $0xf0] sm:$0xff] }
  0x16   : > { %593 = vperm.xlu1 %4412, %v429_v5   ;;  %583 = vperm.xlu0 %4411, %v427_v6   ;;  %v461_v34 = vld [vmem:[%s7005_s1 + $0x118] sm:$0xff]  ;;  %v460_v35 = vld [vmem:[%s7005_s1 + $0x110] sm:$0xff]  ;;  %v459_v36 = vld [vmem:[%s7005_s1 + $0x108] sm:$0xff] }
  0x17   : > { %v464_v38 = vld [vmem:[%s7005_s1 + $0x130] sm:$0xff]  ;;  %v463_v39 = vld [vmem:[%s7005_s1 + $0x128] sm:$0xff]  ;;  %v462_v40 = vld [vmem:[%s7005_s1 + $0x120] sm:$0xff] }
  0x18   : > { %v467_v42 = vld [vmem:[%s7005_s1 + $0x148] sm:$0xff]  ;;  %v466_v43 = vld [vmem:[%s7005_s1 + $0x140] sm:$0xff]  ;;  %v465_v44 = vld [vmem:[%s7005_s1 + $0x138] sm:$0xff] }
  0x19   : > { %v470_v46 = vld [vmem:[%s7005_s1 + $0x160] sm:$0xff]  ;;  %v469_v47 = vld [vmem:[%s7005_s1 + $0x158] sm:$0xff]  ;;  %v468_v48 = vld [vmem:[%s7005_s1 + $0x150] sm:$0xff] }
  0x1a   : > { %v473_v52 = vld [vmem:[%s7005_s1 + $0x178] sm:$0xff]  ;;  %v472_v53 = vld [vmem:[%s7005_s1 + $0x170] sm:$0xff]  ;;  %v471_v54 = vld [vmem:[%s7005_s1 + $0x168] sm:$0xff] }
  0x1b   : > { %v476_v58 = vld [vmem:[%s7005_s1 + $0x190] sm:$0xff]  ;;  %v475_v59 = vld [vmem:[%s7005_s1 + $0x188] sm:$0xff]  ;;  %v474_v60 = vld [vmem:[%s7005_s1 + $0x180] sm:$0xff] }
  0x1c   : > { %v479_v0 = vld [vmem:[%s7005_s1 + $0x1a8] sm:$0xff]  ;;  %v478_v1 = vld [vmem:[%s7005_s1 + $0x1a0] sm:$0xff]  ;;  %v477_v2 = vld [vmem:[%s7005_s1 + $0x198] sm:$0xff] }
  0x1d   : > { %618 = vperm.xlu2 %4413, %v434_v7   ;;  %v482_v6 = vld [vmem:[%s7005_s1 + $0x1c0] sm:$0xff]  ;;  %v481_v7 = vld [vmem:[%s7005_s1 + $0x1b8] sm:$0xff] }
  0x1e   : > { %613 = vperm.xlu1 %4412, %v433_v8   ;;  %608 = vperm.xlu0 %4411, %v432_v9   ;;  %v480_v8 = vld [vmem:[%s7005_s1 + $0x1b0] sm:$0xff] }
  0x25   : > { %633 = vperm.xlu2 %4413, %v437_v10  }
  0x26   : > { %628 = vperm.xlu1 %4412, %v436_v11   ;;  %623 = vperm.xlu0 %4411, %v435_v12   ;;  %v485_v12 = vld [vmem:[%s7005_s1 + $0x1d8] sm:$0xff] }
  0x2d   : > { %648 = vperm.xlu2 %4413, %v440_v13   ;;  %v484_v13 = vld [vmem:[%s7005_s1 + $0x1d0] sm:$0xff] }
  0x2e   : > { %643 = vperm.xlu1 %4412, %v439_v14   ;;  %638 = vperm.xlu0 %4411, %v438_v15   ;;  %v483_v14 = vld [vmem:[%s7005_s1 + $0x1c8] sm:$0xff]  ;;  %v290_v15 = vld [vmem:[%s7004_s0 + $0x70] sm:$0xff] }
  0x35   : > { %663 = vperm.xlu2 %4413, %v443_v16   ;;  %v291_v16 = vld [vmem:[%s7004_s0 + $0x78] sm:$0xff] }
  0x36   : > { %658 = vperm.xlu1 %4412, %v442_v17   ;;  %653 = vperm.xlu0 %4411, %v441_v18   ;;  %v289_v18 = vld [vmem:[%s7004_s0 + $0x68] sm:$0xff] }
  0x3d   : > { %678 = vperm.xlu2 %4413, %v446_v19   ;;  %v288_v19 = vld [vmem:[%s7004_s0 + $0x60] sm:$0xff] }
  0x3e   : > { %673 = vperm.xlu1 %4412, %v445_v20   ;;  %668 = vperm.xlu0 %4411, %v444_v21  }
  0x45   : > { %693 = vperm.xlu2 %4413, %v449_v22  }
  0x46   : > { %688 = vperm.xlu1 %4412, %v448_v23   ;;  %683 = vperm.xlu0 %4411, %v447_v24  }
  0x4d   : > { %708 = vperm.xlu2 %4413, %v452_v25  }
  0x4e   : > { %703 = vperm.xlu1 %4412, %v451_v26   ;;  %698 = vperm.xlu0 %4411, %v450_v27   ;;  %v488_v27 = vld [vmem:[%s7005_s1 + $0x1f0] sm:$0xff] }
  0x55   : > { %723 = vperm.xlu2 %4413, %v455_v28   ;;  %v487_v28 = vld [vmem:[%s7005_s1 + $0x1e8] sm:$0xff] }
  0x56   : > { %718 = vperm.xlu1 %4412, %v454_v29   ;;  %713 = vperm.xlu0 %4411, %v453_v30   ;;  %v286_v29 = vld [vmem:[%s7004_s0 + $0x50] sm:$0xff]  ;;  %v486_v30 = vld [vmem:[%s7005_s1 + $0x1e0] sm:$0xff] }
  0x5d   : > { %738 = vperm.xlu2 %4413, %v458_v31   ;;  %v287_v31 = vld [vmem:[%s7004_s0 + $0x58] sm:$0xff] }
  0x5e   : > { %733 = vperm.xlu1 %4412, %v457_v32   ;;  %728 = vperm.xlu0 %4411, %v456_v33  }
  0x65   : > { %753 = vperm.xlu2 %4413, %v461_v34  }
  0x66   : > { %748 = vperm.xlu1 %4412, %v460_v35   ;;  %743 = vperm.xlu0 %4411, %v459_v36   ;;  %v285_v35 = vld [vmem:[%s7004_s0 + $0x48] sm:$0xff] }
  0x67   : > { %v4613_v37 = vpop.permute.xlu2 %598 }
  0x6d   : > { %768 = vperm.xlu2 %4413, %v464_v38  }
  0x6e   : > { %763 = vperm.xlu1 %4412, %v463_v39   ;;  %758 = vperm.xlu0 %4411, %v462_v40   ;;  %v284_v40 = vld [vmem:[%s7004_s0 + $0x40] sm:$0xff] }
  0x6f   : > { %v4624_v41 = vpop.permute.xlu2 %603 }
  0x75   : > { %783 = vperm.xlu2 %4413, %v467_v42  }
  0x76   : > { %778 = vperm.xlu1 %4412, %v466_v43   ;;  %773 = vperm.xlu0 %4411, %v465_v44   ;;  %v491_v44 = vld [vmem:[%s7005_s1 + $0x208] sm:$0xff] }
  0x77   : > { %v4635_v45 = vpop.permute.xlu2 %618 }
  0x7d   : > { %798 = vperm.xlu2 %4413, %v470_v46   ;;  %v490_v46 = vld [vmem:[%s7005_s1 + $0x200] sm:$0xff] }
  0x7e   : > { %793 = vperm.xlu1 %4412, %v469_v47   ;;  %788 = vperm.xlu0 %4411, %v468_v48   ;;  %v283_v47 = vld [vmem:[%s7004_s0 + $0x38] sm:$0xff]  ;;  %v282_v48 = vld [vmem:[%s7004_s0 + $0x30] sm:$0xff] }
  0x7f   : > { %v4646_v49 = vpop.permute.xlu2 %633 }
  0x80   : > { %v4648_v50 = vpop.permute.xlu1 %588  ;;  %v4650_v51 = vpop.permute.xlu0 %578  ;;  %v1337_v39 = vmul.f32 %v4646_v49, %v287_v31  ;;  %v489_v49 = vld [vmem:[%s7005_s1 + $0x1f8] sm:$0xff] }
  0x85   : > { %813 = vperm.xlu2 %4413, %v473_v52   ;;  %v1334_v52 = vmul.f32 %v4635_v45, %v284_v40  ;;  %v281_v45 = vld [vmem:[%s7004_s0 + $0x28] sm:$0xff] }
  0x86   : > { %808 = vperm.xlu1 %4412, %v472_v53   ;;  %803 = vperm.xlu0 %4411, %v471_v54  }
  0x87   : > { %v649_v55 = vpop.permute.xlu2 %648 }
  0x88   : > { %v4661_v56 = vpop.permute.xlu1 %593  ;;  %v4663_v57 = vpop.permute.xlu0 %583  ;;  %v1340_v22 = vmul.f32 %v649_v55, %v290_v15 }
  0x8d   : > { %828 = vperm.xlu2 %4413, %v476_v58  }
  0x8e   : > { %823 = vperm.xlu1 %4412, %v475_v59   ;;  %818 = vperm.xlu0 %4411, %v474_v60   ;;  %v280_v59 = vld [vmem:[%s7004_s0 + $0x20] sm:$0xff] }
  0x8f   : > { %v4674_v61 = vpop.permute.xlu2 %663 }
  0x90   : > { %v4676_v62 = vpop.permute.xlu1 %613  ;;  %v4678_v63 = vpop.permute.xlu0 %608 }
  0x91   : > { %v1333_v53 = vmul.f32 %v4676_v62, %v283_v47  ;;  %v1332_v54 = vmul.f32 %v4678_v63, %v282_v48  ;;  %v1330_v62 = vmul.f32 %v4613_v37, %v280_v59  ;;  %v1331_v63 = vmul.f32 %v4624_v41, %v281_v45  ;;  %v278_v37 = vld [vmem:[%s7004_s0 + $0x10] sm:$0xff]  ;;  %v502_v47 = vld [vmem:[%s7005_s1 + $0x260] sm:$0xff]  ;;  %v303_v48 = vld [vmem:[%s7004_s0 + $0xd8] sm:$0xff] }
  0x95   : > { %843 = vperm.xlu2 %4413, %v479_v0  }
  0x96   : > { %838 = vperm.xlu1 %4412, %v478_v1   ;;  %833 = vperm.xlu0 %4411, %v477_v2   ;;  %v1479_v1 = vpack.c.bf16 %v1333_v53, %v1332_v54  ;;  %v494_v2 = vld [vmem:[%s7005_s1 + $0x220] sm:$0xff]  ;;  %v4104_v53 = vld [vmem:[%s4824_s8 + $0x230] sm:$0xf]  ;;  %v4350_v54 = vld [vmem:[%s4824_s8 + $0x254] sm:$0xf0] }
  0x97   : > { %v4689_v3 = vpop.permute.xlu2 %678 }
  0x98   : > { %v629_v4 = vpop.permute.xlu1 %628  ;;  %v624_v5 = vpop.permute.xlu0 %623 }
  0x99   : > { %v1336_v32 = vmul.f32 %v629_v4, %v286_v29  ;;  %v1335_v42 = vmul.f32 %v624_v5, %v285_v35  ;;  %v493_v4 = vld [vmem:[%s7005_s1 + $0x218] sm:$0xff] }
  0x9a   : > { %v279_v5 = vld [vmem:[%s7004_s0 + $0x18] sm:$0xff] }
  0x9b   : > { %v1481_v43 = vpack.c.bf16 %v1337_v39, %v1336_v32  ;;  %v1480_v58 = vpack.c.bf16 %v1335_v42, %v1334_v52  ;;  %v1329_v41 = vmul.f32 %v4661_v56, %v279_v5  ;;  %v276_v56 = vld [vmem:[%s7004_s0] sm:$0xff]  ;;  %v307_v29 = vld [vmem:[%s7004_s0 + $0xf8] sm:$0xff]  ;;  %v305_v42 = vld [vmem:[%s7004_s0 + $0xe8] sm:$0xff] }
  0x9c   : > { %v304_v32 = vld [vmem:[%s7004_s0 + $0xe0] sm:$0xff] }
  0x9d   : > { %858 = vperm.xlu2 %4413, %v482_v6   ;;  %v492_v6 = vld [vmem:[%s7005_s1 + $0x210] sm:$0xff] }
  0x9e   : > { %853 = vperm.xlu1 %4412, %v481_v7   ;;  %848 = vperm.xlu0 %4411, %v480_v8   ;;  %v1478_v8 = vpack.c.bf16 %v1331_v63, %v1330_v62  ;;  %v301_v63 = vld [vmem:[%s7004_s0 + $0xc8] sm:$0xff] }
  0x9f   : > { %v4700_v9 = vpop.permute.xlu2 %693 }
  0xa0   : > { %v644_v10 = vpop.permute.xlu1 %643  ;;  %v639_v11 = vpop.permute.xlu0 %638 }
  0xa1   : > { %v1339_v24 = vmul.f32 %v644_v10, %v289_v18  ;;  %v1338_v25 = vmul.f32 %v639_v11, %v288_v19  ;;  %v277_v10 = vld [vmem:[%s7004_s0 + $0x8] sm:$0xff]  ;;  %v1326_v19 = vmul.f32 %v4650_v51, %v276_v56 }
  0xa2   : > { %v495_v18 = vld [vmem:[%s7005_s1 + $0x228] sm:$0xff] }
  0xa3   : > { %v1482_v34 = vpack.c.bf16 %v1339_v24, %v1338_v25  ;;  %v499_v51 = vld [vmem:[%s7005_s1 + $0x248] sm:$0xff] }
  0xa5   : > { %873 = vperm.xlu2 %4413, %v485_v12  }
  0xa6   : > { %868 = vperm.xlu1 %4412, %v484_v13   ;;  %863 = vperm.xlu0 %4411, %v483_v14   ;;  %v1328_v13 = vmul.f32 %v4648_v50, %v278_v37  ;;  %v1327_v14 = vmul.f32 %v4663_v57, %v277_v10  ;;  %v497_v50 = vld [vmem:[%s7005_s1 + $0x238] sm:$0xff] }
  0xa7   : > { %v4717_v17 = vpop.permute.xlu2 %708  ;;  %v505_v10 = vld [vmem:[%s7005_s1 + $0x278] sm:$0xff] }
  0xa8   : > { %v4725_v20 = vpop.permute.xlu1 %658  ;;  %v654_v21 = vpop.permute.xlu0 %653  ;;  %v1477_v15 = vpack.c.bf16 %v1329_v41, %v1328_v13  ;;  %v298_v13 = vld [vmem:[%s7004_s0 + $0xb0] sm:$0xff] }
  0xa9   : > { %v1341_v23 = vmul.f32 %v654_v21, %v291_v16  ;;  %v496_v16 = vld [vmem:[%s7005_s1 + $0x230] sm:$0xff]  ;;  %v4064_v21 = vld [vmem:[%s4824_s8 + $0x1e0] sm:$0xf] }
  0xab   : > { %v1483_v26 = vpack.c.bf16 %v1341_v23, %v1340_v22  ;;  %v4340_v22 = vld [vmem:[%s4824_s8 + $0x204] sm:$0xf0]  ;;  %v1476_v23 = vpack.c.bf16 %v1327_v14, %v1326_v19 }
  0xad   : > { %2234 = vmatpush.bf16.msra.mxu0 %v1483_v26  ;;  %4385 = vmatpush.bf16.msra.mxu2 %v1483_v26  ;;  %v4065_v26 = vor.u32 %v4340_v22, %v4064_v21  ;;  %v509_v22 = vld [vmem:[%s7005_s1 + $0x298] sm:$0xff] }
  0xae   : > { %888 = vperm.xlu2 %4413, %v488_v27   ;;  %883 = vperm.xlu1 %4412, %v487_v28   ;;  %v500_v27 = vld [vmem:[%s7005_s1 + $0x250] sm:$0xff]  ;;  %v498_v28 = vld [vmem:[%s7005_s1 + $0x240] sm:$0xff] }
  0xaf   : > { %878 = vperm.xlu0 %4411, %v486_v30   ;;  %v4742_v33 = vpop.permute.xlu2 %723  ;;  %v306_v30 = vld [vmem:[%s7004_s0 + $0xf0] sm:$0xff] }
  0xb0   : > { %v4747_v36 = vpop.permute.xlu1 %673  ;;  %v4749_v38 = vpop.permute.xlu0 %668  ;;  %v1355_v52 = vmul.f32 %v4742_v33, %v305_v42  ;;  %v300_v33 = vld [vmem:[%s7004_s0 + $0xc0] sm:$0xff]  ;;  %v511_v42 = vld [vmem:[%s7005_s1 + $0x2a8] sm:$0xff] }
  0xb1   : > { %2235 = vmatpush.bf16.msra.mxu0 %v1482_v34  ;;  %4386 = vmatpush.bf16.msra.mxu2 %v1482_v34 }
  0xb5   : > { %2236 = vmatpush.bf16.msra.mxu0 %v1481_v43  ;;  %4387 = vmatpush.bf16.msra.mxu2 %v1481_v43 }
  0xb6   : > { %903 = vperm.xlu2 %4413, %v491_v44   ;;  %898 = vperm.xlu1 %4412, %v490_v46   ;;  %v503_v46 = vld [vmem:[%s7005_s1 + $0x268] sm:$0xff] }
  0xb7   : > { %893 = vperm.xlu0 %4411, %v489_v49   ;;  %v4775_v55 = vpop.permute.xlu2 %738  ;;  %v501_v49 = vld [vmem:[%s7005_s1 + $0x258] sm:$0xff] }
  0xb8   : > { %v4783_v60 = vpop.permute.xlu1 %688  ;;  %v4785_v0 = vpop.permute.xlu0 %683 }
  0xb9   : > { %2237 = vmatpush.bf16.msra.mxu0 %v1480_v58  ;;  %4388 = vmatpush.bf16.msra.mxu2 %v1480_v58  ;;  %v302_v58 = vld [vmem:[%s7004_s0 + $0xd0] sm:$0xff] }
  0xba   : > { %v1352_v5 = vmul.f32 %v4717_v17, %v302_v58  ;;  %v504_v17 = vld [vmem:[%s7005_s1 + $0x270] sm:$0xff]  ;;  %v515_v58 = vld [vmem:[%s7005_s1 + $0x2c8] sm:$0xff] }
  0xbd   : > { %2238 = vmatpush.bf16.msra.mxu0 %v1479_v1  ;;  %4389 = vmatpush.bf16.msra.mxu2 %v1479_v1 }
  0xbe   : > { %918 = vperm.xlu2 %4413, %v494_v2   ;;  %913 = vperm.xlu1 %4412, %v493_v4   ;;  %v4105_v4 = vor.u32 %v4350_v54, %v4104_v53  ;;  %v3824_v54 = vld [vmem:[%s4824_s8] sm:$0xf] }
  0xbf   : > { %908 = vperm.xlu0 %4411, %v492_v6   ;;  %v4808_v7 = vpop.permute.xlu2 %753 }
  0xc0   : > { %v4813_v11 = vpop.permute.xlu1 %703  ;;  %v4815_v12 = vpop.permute.xlu0 %698 }
  0xc1   : > { %2239 = vmatpush.bf16.msra.mxu0 %v1478_v8  ;;  %4390 = vmatpush.bf16.msra.mxu2 %v1478_v8  ;;  %v1351_v6 = vmul.f32 %v4813_v11, %v301_v63  ;;  %v1350_v37 = vmul.f32 %v4815_v12, %v300_v33  ;;  %v506_v8 = vld [vmem:[%s7005_s1 + $0x280] sm:$0xff]  ;;  %v299_v11 = vld [vmem:[%s7004_s0 + $0xb8] sm:$0xff]  ;;  %v1348_v12 = vmul.f32 %v4783_v60, %v298_v13  ;;  %v4184_v33 = vld [vmem:[%s4824_s8 + $0x2d0] sm:$0xf] }
  0xc2   : > { %v296_v60 = vld [vmem:[%s7004_s0 + $0xa0] sm:$0xff]  ;;  %v513_v63 = vld [vmem:[%s7005_s1 + $0x2b8] sm:$0xff] }
  0xc3   : > { %v1488_v14 = vpack.c.bf16 %v1351_v6, %v1350_v37  ;;  %v322_v6 = vld [vmem:[%s7004_s0 + $0x170] sm:$0xff] }
  0xc5   : > { %2240 = vmatpush.bf16.msra.mxu0 %v1477_v15  ;;  %4391 = vmatpush.bf16.msra.mxu2 %v1477_v15  ;;  %v297_v15 = vld [vmem:[%s7004_s0 + $0xa8] sm:$0xff] }
  0xc6   : > { %933 = vperm.xlu2 %4413, %v497_v50   ;;  %928 = vperm.xlu1 %4412, %v496_v16   ;;  %v1347_v19 = vmul.f32 %v4785_v0, %v297_v15  ;;  %v507_v0 = vld [vmem:[%s7005_s1 + $0x288] sm:$0xff] }
  0xc7   : > { %923 = vperm.xlu0 %4411, %v495_v18   ;;  %v4839_v57 = vpop.permute.xlu2 %768  ;;  %v1349_v18 = vmul.f32 %v4700_v9, %v299_v11  ;;  %v295_v9 = vld [vmem:[%s7004_s0 + $0x98] sm:$0xff] }
  0xc8   : > { %v719_v24 = vpop.permute.xlu1 %718  ;;  %v714_v25 = vpop.permute.xlu0 %713 }
  0xc9   : > { %2241 = vmatpush.bf16.msra.mxu0 %v1476_v23  ;;  %4392 = vmatpush.bf16.msra.mxu2 %v1476_v23  ;;  %v1354_v43 = vmul.f32 %v719_v24, %v304_v32  ;;  %v1353_v59 = vmul.f32 %v714_v25, %v303_v48  ;;  %v1487_v21 = vpack.c.bf16 %v1349_v18, %v1348_v12  ;;  %v508_v23 = vld [vmem:[%s7005_s1 + $0x290] sm:$0xff]  ;;  %v292_v32 = vld [vmem:[%s7004_s0 + $0x80] sm:$0xff] }
  0xca   : > { %v294_v24 = vld [vmem:[%s7004_s0 + $0x90] sm:$0xff]  ;;  %v1346_v25 = vmul.f32 %v4689_v3, %v296_v60  ;;  %v320_v12 = vld [vmem:[%s7004_s0 + $0x160] sm:$0xff]  ;;  %v517_v60 = vld [vmem:[%s7005_s1 + $0x2d8] sm:$0xff] }
  0xcb   : > { %v1490_v62 = vpack.c.bf16 %v1355_v52, %v1354_v43  ;;  %v1489_v41 = vpack.c.bf16 %v1353_v59, %v1352_v5  ;;  %v510_v43 = vld [vmem:[%s7005_s1 + $0x2a0] sm:$0xff]  ;;  %v323_v5 = vld [vmem:[%s7004_s0 + $0x178] sm:$0xff] }
  0xcc   : > { %2272 = vmatmul.bf16.vlgmr.msra.gmra.mxu2 %v4065_v26  ;;  %v4144_v26 = vld [vmem:[%s4824_s8 + $0x280] sm:$0xf] }
  0xcd   : > { %v514_v59 = vld [vmem:[%s7005_s1 + $0x2c0] sm:$0xff] }
  0xce   : > { %948 = vperm.xlu2 %4413, %v500_v27   ;;  %943 = vperm.xlu1 %4412, %v499_v51   ;;  %v4360_v27 = vld [vmem:[%s4824_s8 + $0x2a4] sm:$0xf0]  ;;  %v1345_v51 = vmul.f32 %v4747_v36, %v295_v9  ;;  %v518_v18 = vld [vmem:[%s7005_s1 + $0x2e0] sm:$0xff]  ;;  %v4106_v9 = vld [vmem:[%s4824_s8 + $0x258] sm:$0xf0] }
  0xcf   : > { %938 = vperm.xlu0 %4411, %v498_v28   ;;  %v4856_v31 = vpop.permute.xlu2 %783  ;;  %v1344_v28 = vmul.f32 %v4749_v38, %v294_v24  ;;  %v293_v36 = vld [vmem:[%s7004_s0 + $0x88] sm:$0xff]  ;;  %v1342_v38 = vmul.f32 %v4725_v20, %v292_v32  ;;  %v4335_v20 = vld [vmem:[%s4824_s8 + $0x1e4] sm:$0xf]  ;;  %v3864_v32 = vld [vmem:[%s4824_s8 + $0x50] sm:$0xf] }
  0xd0   : > { %v734_v34 = vpop.permute.xlu1 %733  ;;  %v729_v35 = vpop.permute.xlu0 %728 }
  0xd1   : > { %v1357_v39 = vmul.f32 %v734_v34, %v307_v29  ;;  %v1356_v40 = vmul.f32 %v729_v35, %v306_v30  ;;  %v1486_v30 = vpack.c.bf16 %v1347_v19, %v1346_v25  ;;  %v4145_v35 = vor.u32 %v4360_v27, %v4144_v26  ;;  %v319_v19 = vld [vmem:[%s7004_s0 + $0x158] sm:$0xff]  ;;  %v316_v27 = vld [vmem:[%s7004_s0 + $0x140] sm:$0xff] }
  0xd3   : > { %v1491_v44 = vpack.c.bf16 %v1357_v39, %v1356_v40  ;;  %v1485_v39 = vpack.c.bf16 %v1345_v51, %v1344_v28  ;;  %v512_v40 = vld [vmem:[%s7005_s1 + $0x2b0] sm:$0xff] }
  0xd5   : > { %2298 = vmatpush.bf16.msra.mxu1 %v1491_v44  ;;  %4393 = vmatpush.bf16.msra.mxu3 %v1491_v44  ;;  %v1343_v44 = vmul.f32 %v4674_v61, %v293_v36  ;;  %v4280_v61 = vld [vmem:[%s4824_s8 + $0x24] sm:$0xf0] }
  0xd6   : > { %963 = vperm.xlu2 %4413, %v503_v46   ;;  %958 = vperm.xlu1 %4412, %v502_v47   ;;  %v4066_v46 = vld [vmem:[%s4824_s8 + $0x208] sm:$0xf0] }
  0xd7   : > { %953 = vperm.xlu0 %4411, %v501_v49   ;;  %v4882_v45 = vpop.permute.xlu2 %798  ;;  %v1484_v48 = vpack.c.bf16 %v1343_v44, %v1342_v38  ;;  %v4069_v53 = vor.u32 %v4335_v20, %v4066_v46  ;;  %v519_v44 = vld [vmem:[%s7005_s1 + $0x2e8] sm:$0xff]  ;;  %v4224_v20 = vld [vmem:[%s4824_s8 + $0x320] sm:$0xf] }
  0xd8   : > { %v4890_v1 = vpop.permute.xlu1 %748  ;;  %v4892_v2 = vpop.permute.xlu0 %743  ;;  %v4380_v46 = vld [vmem:[%s4824_s8 + $0x344] sm:$0xf0] }
  0xd9   : > { %2299 = vmatpush.bf16.msra.mxu1 %v1490_v62  ;;  %4394 = vmatpush.bf16.msra.mxu3 %v1490_v62  ;;  %v3825_v62 = vor.u32 %v4280_v61, %v3824_v54 }
  0xdb   : > { %2242 = vmatmul.bf16.vlgmr.msra.gmra.mxu0 %v3825_v62 }
  0xdc   : > { %2277 = vmatmul.bf16.gmra.mxu2 %v4105_v4  ;;  %v4370_v4 = vld [vmem:[%s4824_s8 + $0x2f4] sm:$0xf0] }
  0xdd   : > { %2300 = vmatpush.bf16.msra.mxu1 %v1489_v41  ;;  %4395 = vmatpush.bf16.msra.mxu3 %v1489_v41  ;;  %v4185_v13 = vor.u32 %v4370_v4, %v4184_v33  ;;  %v524_v4 = vld [vmem:[%s7005_s1 + $0x310] sm:$0xff] }
  0xde   : > { %978 = vperm.xlu2 %4413, %v506_v8   ;;  %973 = vperm.xlu1 %4412, %v505_v10   ;;  %v321_v10 = vld [vmem:[%s7004_s0 + $0x168] sm:$0xff] }
  0xdf   : > { %968 = vperm.xlu0 %4411, %v504_v17   ;;  %v4913_v56 = vpop.permute.xlu2 %813 }
  0xe0   : > { %v4918_v50 = vpop.permute.xlu1 %763  ;;  %v4920_v16 = vpop.permute.xlu0 %758  ;;  %v1373_v17 = vmul.f32 %v4913_v56, %v323_v5  ;;  %v318_v56 = vld [vmem:[%s7004_s0 + $0x150] sm:$0xff]  ;;  %v523_v5 = vld [vmem:[%s7005_s1 + $0x308] sm:$0xff] }
  0xe1   : > { %2301 = vmatpush.bf16.msra.mxu1 %v1488_v14  ;;  %4396 = vmatpush.bf16.msra.mxu3 %v1488_v14 }
  0xe5   : > { %2302 = vmatpush.bf16.msra.mxu1 %v1487_v21  ;;  %4397 = vmatpush.bf16.msra.mxu3 %v1487_v21  ;;  %v516_v21 = vld [vmem:[%s7005_s1 + $0x2d0] sm:$0xff] }
  0xe6   : > { %993 = vperm.xlu2 %4413, %v509_v22   ;;  %988 = vperm.xlu1 %4412, %v508_v23   ;;  %v1370_v22 = vmul.f32 %v4882_v45, %v320_v12  ;;  %v4345_v23 = vld [vmem:[%s4824_s8 + $0x234] sm:$0xf] }
  0xe7   : > { %983 = vperm.xlu0 %4411, %v507_v0   ;;  %v4947_v29 = vpop.permute.xlu2 %828  ;;  %v4109_v28 = vor.u32 %v4345_v23, %v4106_v9  ;;  %v527_v9 = vld [vmem:[%s7005_s1 + $0x328] sm:$0xff] }
  0xe8   : > { %v4952_v3 = vpop.permute.xlu1 %778  ;;  %v4954_v34 = vpop.permute.xlu0 %773 }
  0xe9   : > { %2303 = vmatpush.bf16.msra.mxu1 %v1486_v30  ;;  %4398 = vmatpush.bf16.msra.mxu3 %v1486_v30  ;;  %v317_v30 = vld [vmem:[%s7004_s0 + $0x148] sm:$0xff]  ;;  %v1366_v36 = vmul.f32 %v4952_v3, %v316_v27  ;;  %v4281_v27 = vld [vmem:[%s4824_s8 + $0x2c] sm:$0xf0] }
  0xea   : > { %v1367_v3 = vmul.f32 %v4856_v31, %v317_v30  ;;  %v312_v31 = vld [vmem:[%s7004_s0 + $0x120] sm:$0xff] }
  0xec   : > { %2282 = vmatmul.bf16.gmra.mxu2 %v4145_v35  ;;  %v4290_v35 = vld [vmem:[%s4824_s8 + $0x74] sm:$0xf0] }
  0xed   : > { %2304 = vmatpush.bf16.msra.mxu1 %v1485_v39  ;;  %4399 = vmatpush.bf16.msra.mxu3 %v1485_v39  ;;  %v521_v39 = vld [vmem:[%s7005_s1 + $0x2f8] sm:$0xff] }
  0xee   : > { %1008 = vperm.xlu2 %4413, %v512_v40   ;;  %1003 = vperm.xlu1 %4412, %v511_v42   ;;  %v520_v40 = vld [vmem:[%s7005_s1 + $0x2f0] sm:$0xff]  ;;  %v3865_v42 = vor.u32 %v4290_v35, %v3864_v32 }
  0xef   : > { %998 = vperm.xlu0 %4411, %v510_v43   ;;  %v4972_v47 = vpop.permute.xlu2 %843  ;;  %v315_v43 = vld [vmem:[%s7004_s0 + $0x138] sm:$0xff] }
  0xf0   : > { %v794_v49 = vpop.permute.xlu1 %793  ;;  %v789_v52 = vpop.permute.xlu0 %788  ;;  %2247 = vmatmul.bf16.gmra.mxu0 %v3865_v42  ;;  %v4186_v42 = vld [vmem:[%s4824_s8 + $0x2f8] sm:$0xf0] }
  0xf1   : > { %2305 = vmatpush.bf16.msra.mxu1 %v1484_v48  ;;  %4400 = vmatpush.bf16.msra.mxu3 %v1484_v48  ;;  %v1369_v24 = vmul.f32 %v794_v49, %v319_v19  ;;  %v1368_v0 = vmul.f32 %v789_v52, %v318_v56  ;;  %v314_v48 = vld [vmem:[%s7004_s0 + $0x130] sm:$0xff]  ;;  %v1365_v49 = vmul.f32 %v4954_v34, %v315_v43  ;;  %v308_v19 = vld [vmem:[%s7004_s0 + $0x100] sm:$0xff] }
  0xf2   : > { %v1496_v52 = vpack.c.bf16 %v1367_v3, %v1366_v36  ;;  %v3904_v56 = vld [vmem:[%s4824_s8 + $0xa0] sm:$0xf] }
  0xf3   : > { %v1497_v38 = vpack.c.bf16 %v1369_v24, %v1368_v0  ;;  %v525_v0 = vld [vmem:[%s7005_s1 + $0x318] sm:$0xff] }
  0xf4   : > { %2336 = vmatmul.bf16.vlgmr.msra.gmra.mxu3 %v4069_v53  ;;  %v313_v53 = vld [vmem:[%s7004_s0 + $0x128] sm:$0xff] }
  0xf5   : > { %v1363_v62 = vmul.f32 %v4918_v50, %v313_v53  ;;  %v522_v50 = vld [vmem:[%s7005_s1 + $0x300] sm:$0xff]  ;;  %v4310_v53 = vld [vmem:[%s4824_s8 + $0x114] sm:$0xf0] }
  0xf6   : > { %1023 = vperm.xlu2 %4413, %v515_v58   ;;  %1018 = vperm.xlu1 %4412, %v514_v59   ;;  %v4225_v58 = vor.u32 %v4380_v46, %v4224_v20  ;;  %v1364_v59 = vmul.f32 %v4839_v57, %v314_v48  ;;  %v310_v57 = vld [vmem:[%s7004_s0 + $0x110] sm:$0xff]  ;;  %v3866_v46 = vld [vmem:[%s4824_s8 + $0x78] sm:$0xf0] }
  0xf7   : > { %1013 = vperm.xlu0 %4411, %v513_v63   ;;  %v4993_v37 = vpop.permute.xlu2 %858  ;;  %v1362_v63 = vmul.f32 %v4920_v16, %v312_v31  ;;  %v4355_v16 = vld [vmem:[%s4824_s8 + $0x284] sm:$0xf]  ;;  %v4285_v20 = vld [vmem:[%s4824_s8 + $0x54] sm:$0xf]  ;;  %v533_v31 = vld [vmem:[%s7005_s1 + $0x358] sm:$0xff] }
  0xf8   : > { %v809_v41 = vpop.permute.xlu1 %808  ;;  %v804_v8 = vpop.permute.xlu0 %803  ;;  %v1495_v33 = vpack.c.bf16 %v1365_v49, %v1364_v59  ;;  %v3869_v49 = vor.u32 %v4285_v20, %v3866_v46  ;;  %v538_v20 = vld [vmem:[%s7005_s1 + $0x380] sm:$0xff]  ;;  %v537_v46 = vld [vmem:[%s7005_s1 + $0x378] sm:$0xff] }
  0xf9   : > { %v1372_v11 = vmul.f32 %v809_v41, %v322_v6  ;;  %v1371_v14 = vmul.f32 %v804_v8, %v321_v10  ;;  %v4146_v6 = vld [vmem:[%s4824_s8 + $0x2a8] sm:$0xf0]  ;;  %v311_v41 = vld [vmem:[%s7004_s0 + $0x118] sm:$0xff]  ;;  %v1360_v8 = vmul.f32 %v4890_v1, %v310_v57  ;;  %v1494_v10 = vpack.c.bf16 %v1363_v62, %v1362_v63 }
  0xfa   : > { %v4149_v12 = vor.u32 %v4355_v16, %v4146_v6  ;;  %v531_v62 = vld [vmem:[%s7005_s1 + $0x348] sm:$0xff]  ;;  %v3872_v63 = vld [vmem:[%s4824_s8 + $0x58] sm:$0xf] }
  0xfb   : > { %v1499_v15 = vpack.c.bf16 %v1373_v17, %v1372_v11  ;;  %v1498_v26 = vpack.c.bf16 %v1371_v14, %v1370_v22  ;;  %v4275_v14 = vld [vmem:[%s4824_s8 + $0x4] sm:$0xf]  ;;  %v337_v6 = vld [vmem:[%s7004_s0 + $0x1e8] sm:$0xff] }
  0xfc   : > { %2287 = vmatmul.bf16.gmra.mxu2 %v4185_v13  ;;  %v309_v13 = vld [vmem:[%s7004_s0 + $0x108] sm:$0xff] }
  0xfd   : > { %2362 = vmatpush.bf16.msrb.mxu2 %v1499_v15  ;;  %v3826_v15 = vld [vmem:[%s4824_s8 + $0x28] sm:$0xf0]  ;;  %v1359_v22 = vmul.f32 %v4892_v2, %v309_v13  ;;  %v3832_v2 = vld [vmem:[%s4824_s8 + $0x8] sm:$0xf] }
  0xfe   : > { %1038 = vperm.xlu2 %4413, %v518_v18   ;;  %1033 = vperm.xlu1 %4412, %v517_v60   ;;  %v1361_v18 = vmul.f32 %v4808_v7, %v311_v41  ;;  %v3829_v1 = vor.u32 %v4275_v14, %v3826_v15  ;;  %v526_v7 = vld [vmem:[%s7005_s1 + $0x320] sm:$0xff]  ;;  %v3833_v35 = vor.u32 %v4281_v27, %v3832_v2  ;;  %v3906_v2 = vld [vmem:[%s4824_s8 + $0xc8] sm:$0xf0] }
  0xff   : > { %1028 = vperm.xlu0 %4411, %v516_v21   ;;  %v5020_v25 = vpop.permute.xlu2 %873  ;;  %v4300_v21 = vld [vmem:[%s4824_s8 + $0xc4] sm:$0xf0]  ;;  %v336_v41 = vld [vmem:[%s7004_s0 + $0x1e0] sm:$0xff] }
 0x100   : > { %v5025_v51 = vpop.permute.xlu1 %823  ;;  %v5027_v45 = vpop.permute.xlu0 %818  ;;  %v1493_v23 = vpack.c.bf16 %v1361_v18, %v1360_v8  ;;  %v3905_v24 = vor.u32 %v4300_v21, %v3904_v56  ;;  %2306 = vmatmul.bf16.vlgmr.msra.gmra.mxu1 %v3829_v1  ;;  %v535_v1 = vld [vmem:[%s7005_s1 + $0x368] sm:$0xff]  ;;  %v4375_v56 = vld [vmem:[%s4824_s8 + $0x324] sm:$0xf] }
 0x101   : > { %2363 = vmatpush.bf16.msrb.mxu2 %v1498_v26  ;;  %v1358_v26 = vmul.f32 %v4775_v55, %v308_v19  ;;  %v530_v55 = vld [vmem:[%s7005_s1 + $0x340] sm:$0xff]  ;;  %v4226_v21 = vld [vmem:[%s4824_s8 + $0x348] sm:$0xf0] }
 0x102   : > { %2252 = vmatmul.bf16.gmra.mxu0 %v3905_v24  ;;  %v534_v19 = vld [vmem:[%s7005_s1 + $0x360] sm:$0xff]  ;;  %v333_v27 = vld [vmem:[%s7004_s0 + $0x1c8] sm:$0xff] }
 0x104   : > { %2341 = vmatmul.bf16.gmra.mxu3 %v4109_v28  ;;  %v1492_v28 = vpack.c.bf16 %v1359_v22, %v1358_v26  ;;  %v335_v22 = vld [vmem:[%s7004_s0 + $0x1d8] sm:$0xff]  ;;  %v4295_v26 = vld [vmem:[%s4824_s8 + $0xa4] sm:$0xf] }
 0x105   : > { %2364 = vmatpush.bf16.msrb.mxu2 %v1497_v38  ;;  %v529_v38 = vld [vmem:[%s7005_s1 + $0x338] sm:$0xff] }
 0x106   : > { %1053 = vperm.xlu2 %4413, %v521_v39   ;;  %1048 = vperm.xlu1 %4412, %v520_v40   ;;  %v528_v39 = vld [vmem:[%s7005_s1 + $0x330] sm:$0xff] }
 0x107   : > { %1043 = vperm.xlu0 %4411, %v519_v44   ;;  %v4365_v40 = vld [vmem:[%s4824_s8 + $0x2d4] sm:$0xf] }
 0x108   : > { %v5060_v54 = vpop.permute.xlu2 %888  ;;  %v5062_v61 = vpop.permute.xlu1 %838  ;;  %v4189_v3 = vor.u32 %v4365_v40, %v4186_v42  ;;  %v539_v40 = vld [vmem:[%s7005_s1 + $0x388] sm:$0xff] }
 0x109   : > { %v5065_v34 = vpop.permute.xlu0 %833  ;;  %2365 = vmatpush.bf16.msrb.mxu2 %v1496_v52  ;;  %v3944_v52 = vld [vmem:[%s4824_s8 + $0xf0] sm:$0xf] }
 0x10a   : > { %v3945_v59 = vor.u32 %v4310_v53, %v3944_v52  ;;  %v4301_v52 = vld [vmem:[%s4824_s8 + $0xcc] sm:$0xf0] }
 0x10c   : > { %2292 = vmatmul.bf16.gmra.mxu2 %v4225_v58  ;;  %v532_v58 = vld [vmem:[%s7005_s1 + $0x350] sm:$0xff] }
 0x10d   : > { %2366 = vmatpush.bf16.msrb.mxu2 %v1495_v33  ;;  %v4291_v33 = vld [vmem:[%s4824_s8 + $0x7c] sm:$0xf0] }
 0x10e   : > { %1068 = vperm.xlu2 %4413, %v524_v4   ;;  %1063 = vperm.xlu1 %4412, %v523_v5   ;;  %v338_v4 = vld [vmem:[%s7004_s0 + $0x1f0] sm:$0xff]  ;;  %v339_v5 = vld [vmem:[%s7004_s0 + $0x1f8] sm:$0xff]  ;;  %v3873_v16 = vor.u32 %v4291_v33, %v3872_v63  ;;  %v328_v33 = vld [vmem:[%s7004_s0 + $0x1a0] sm:$0xff] }
 0x10f   : > { %1058 = vperm.xlu0 %4411, %v522_v50  }
 0x110   : > { %v5090_v17 = vpop.permute.xlu2 %903  ;;  %v5092_v11 = vpop.permute.xlu1 %853  ;;  %2311 = vmatmul.bf16.gmra.mxu1 %v3869_v49  ;;  %v3912_v49 = vld [vmem:[%s4824_s8 + $0xa8] sm:$0xf] }
 0x111   : > { %v5097_v60 = vpop.permute.xlu0 %848  ;;  %2367 = vmatpush.bf16.msrb.mxu2 %v1494_v10  ;;  %v1388_v10 = vmul.f32 %v5060_v54, %v338_v4  ;;  %v334_v54 = vld [vmem:[%s7004_s0 + $0x1d0] sm:$0xff]  ;;  %v3913_v63 = vor.u32 %v4301_v52, %v3912_v49 }
 0x112   : > { %2257 = vmatmul.bf16.gmra.mxu0 %v3945_v59 }
 0x114   : > { %2346 = vmatmul.bf16.gmra.mxu3 %v4149_v12  ;;  %v536_v12 = vld [vmem:[%s7005_s1 + $0x370] sm:$0xff] }
 0x115   : > { %2368 = vmatpush.bf16.msrb.mxu2 %v1493_v23 }
 0x116   : > { %1083 = vperm.xlu2 %4413, %v527_v9   ;;  %1078 = vperm.xlu1 %4412, %v526_v7  }
 0x117   : > { %1073 = vperm.xlu0 %4411, %v525_v0   ;;  %v4229_v0 = vor.u32 %v4375_v56, %v4226_v21  ;;  %v4024_v56 = vld [vmem:[%s4824_s8 + $0x190] sm:$0xf]  ;;  %v4330_v21 = vld [vmem:[%s4824_s8 + $0x1b4] sm:$0xf0] }
 0x118   : > { %v5117_v30 = vpop.permute.xlu2 %918  ;;  %v869_v32 = vpop.permute.xlu1 %868 }
 0x119   : > { %v5119_v36 = vpop.permute.xlu0 %863  ;;  %2369 = vmatpush.bf16.msrb.mxu2 %v1492_v28  ;;  %v1384_v23 = vmul.f32 %v869_v32, %v334_v54  ;;  %v3984_v32 = vld [vmem:[%s4824_s8 + $0x140] sm:$0xf] }
 0x11c   : > { %2370 = vmatmul.bf16.vlgmr.msrb.gmra.mxu2 %v3833_v35  ;;  %v3909_v35 = vor.u32 %v4295_v26, %v3906_v2  ;;  %v543_v2 = vld [vmem:[%s7005_s1 + $0x3a8] sm:$0xff] }
 0x11e   : > { %1098 = vperm.xlu2 %4413, %v530_v55   ;;  %1093 = vperm.xlu1 %4412, %v529_v38   ;;  %v1385_v55 = vmul.f32 %v5020_v25, %v335_v22  ;;  %v4320_v38 = vld [vmem:[%s4824_s8 + $0x164] sm:$0xf0]  ;;  %v1383_v25 = vmul.f32 %v5119_v36, %v333_v27  ;;  %v545_v22 = vld [vmem:[%s7005_s1 + $0x3b8] sm:$0xff] }
 0x11f   : > { %1088 = vperm.xlu0 %4411, %v528_v39   ;;  %v332_v39 = vld [vmem:[%s7004_s0 + $0x1c0] sm:$0xff]  ;;  %v3985_v42 = vor.u32 %v4320_v38, %v3984_v32  ;;  %v3952_v27 = vld [vmem:[%s4824_s8 + $0xf8] sm:$0xf]  ;;  %v3834_v32 = vld [vmem:[%s4824_s8 + $0x30] sm:$0xf0] }
 0x120   : > { %v5132_v43 = vpop.permute.xlu2 %933  ;;  %v884_v44 = vpop.permute.xlu1 %883  ;;  %2316 = vmatmul.bf16.gmra.mxu1 %v3909_v35  ;;  %v1382_v53 = vmul.f32 %v4993_v37, %v332_v39  ;;  %v329_v37 = vld [vmem:[%s7004_s0 + $0x1a8] sm:$0xff]  ;;  %v4311_v35 = vld [vmem:[%s4824_s8 + $0x11c] sm:$0xf0] }
 0x121   : > { %v879_v48 = vpop.permute.xlu0 %878  ;;  %v1387_v14 = vmul.f32 %v884_v44, %v337_v6  ;;  %v331_v44 = vld [vmem:[%s7004_s0 + $0x1b8] sm:$0xff]  ;;  %v540_v6 = vld [vmem:[%s7005_s1 + $0x390] sm:$0xff]  ;;  %v3953_v39 = vor.u32 %v4311_v35, %v3952_v27 }
 0x122   : > { %v1386_v15 = vmul.f32 %v879_v48, %v336_v41  ;;  %v330_v48 = vld [vmem:[%s7004_s0 + $0x1b0] sm:$0xff]  ;;  %2262 = vmatmul.bf16.gmra.mxu0 %v3985_v42  ;;  %v1381_v36 = vmul.f32 %v5092_v11, %v331_v44  ;;  %v542_v11 = vld [vmem:[%s7005_s1 + $0x3a0] sm:$0xff]  ;;  %v327_v41 = vld [vmem:[%s7004_s0 + $0x198] sm:$0xff] }
 0x123   : > { %v548_v44 = vld [vmem:[%s7005_s1 + $0x3d0] sm:$0xff] }
 0x124   : > { %2351 = vmatmul.bf16.gmra.mxu3 %v4189_v3  ;;  %v1506_v24 = vpack.c.bf16 %v1387_v14, %v1386_v15  ;;  %v1505_v3 = vpack.c.bf16 %v1385_v55, %v1384_v23  ;;  %v4305_v15 = vld [vmem:[%s4824_s8 + $0xf4] sm:$0xf]  ;;  %v4025_v23 = vor.u32 %v4330_v21, %v4024_v56  ;;  %v4276_v55 = vld [vmem:[%s4824_s8 + $0xc] sm:$0xf] }
 0x125   : > { %v3837_v42 = vor.u32 %v4276_v55, %v3834_v32  ;;  %v553_v55 = vld [vmem:[%s7005_s1 + $0x3f8] sm:$0xff]  ;;  %v346_v32 = vld [vmem:[%s7004_s0 + $0x230] sm:$0xff] }
 0x126   : > { %1113 = vperm.xlu2 %4413, %v533_v31   ;;  %1108 = vperm.xlu1 %4412, %v532_v58   ;;  %v1380_v31 = vmul.f32 %v5097_v60, %v330_v48  ;;  %v1378_v60 = vmul.f32 %v5062_v61, %v328_v33  ;;  %v326_v61 = vld [vmem:[%s7004_s0 + $0x190] sm:$0xff] }
 0x127   : > { %1103 = vperm.xlu0 %4411, %v531_v62   ;;  %v1504_v62 = vpack.c.bf16 %v1383_v25, %v1382_v53  ;;  %v1376_v54 = vmul.f32 %v4947_v29, %v326_v61  ;;  %v544_v29 = vld [vmem:[%s7005_s1 + $0x3b0] sm:$0xff]  ;;  %v547_v25 = vld [vmem:[%s7005_s1 + $0x3c8] sm:$0xff]  ;;  %v4315_v53 = vld [vmem:[%s4824_s8 + $0x144] sm:$0xf] }
 0x128   : > { %v5155_v57 = vpop.permute.xlu2 %948  ;;  %v5157_v50 = vpop.permute.xlu1 %898  ;;  %v354_v48 = vld [vmem:[%s7004_s0 + $0x270] sm:$0xff]  ;;  %v3992_v61 = vld [vmem:[%s4824_s8 + $0x148] sm:$0xf] }
 0x129   : > { %v894_v8 = vpop.permute.xlu0 %893 }
 0x12a   : > { %v1389_v13 = vmul.f32 %v894_v8, %v339_v5  ;;  %v1503_v5 = vpack.c.bf16 %v1381_v36, %v1380_v31  ;;  %v1379_v8 = vmul.f32 %v4972_v47, %v329_v37  ;;  %v325_v47 = vld [vmem:[%s7004_s0 + $0x188] sm:$0xff]  ;;  %v352_v31 = vld [vmem:[%s7004_s0 + $0x260] sm:$0xff] }
 0x12b   : > { %v3986_v36 = vld [vmem:[%s4824_s8 + $0x168] sm:$0xf0] }
 0x12c   : > { %2375 = vmatmul.bf16.gmra.mxu2 %v3873_v16  ;;  %v1507_v18 = vpack.c.bf16 %v1389_v13, %v1388_v10  ;;  %v541_v16 = vld [vmem:[%s7005_s1 + $0x398] sm:$0xff]  ;;  %v1377_v10 = vmul.f32 %v5065_v34, %v327_v41  ;;  %v1502_v14 = vpack.c.bf16 %v1379_v8, %v1378_v60  ;;  %v3989_v33 = vor.u32 %v4315_v53, %v3986_v36  ;;  %v551_v60 = vld [vmem:[%s7005_s1 + $0x3e8] sm:$0xff] }
 0x12d   : > { %v549_v41 = vld [vmem:[%s7005_s1 + $0x3d8] sm:$0xff] }
 0x12e   : > { %2426 = vmatpush.bf16.msrb.mxu3 %v1507_v18  ;;  %1128 = vperm.xlu2 %4413, %v536_v12   ;;  %v3946_v18 = vld [vmem:[%s4824_s8 + $0x118] sm:$0xf0]  ;;  %v1501_v26 = vpack.c.bf16 %v1377_v10, %v1376_v54  ;;  %v4321_v10 = vld [vmem:[%s4824_s8 + $0x16c] sm:$0xf0] }
 0x12f   : > { %1123 = vperm.xlu1 %4412, %v535_v1   ;;  %1118 = vperm.xlu0 %4411, %v534_v19   ;;  %v324_v1 = vld [vmem:[%s7004_s0 + $0x180] sm:$0xff]  ;;  %v3949_v34 = vor.u32 %v4305_v15, %v3946_v18  ;;  %v351_v8 = vld [vmem:[%s7004_s0 + $0x258] sm:$0xff] }
 0x130   : > { %v5183_v9 = vpop.permute.xlu2 %963  ;;  %v5185_v7 = vpop.permute.xlu1 %913  ;;  %v4286_v15 = vld [vmem:[%s4824_s8 + $0x5c] sm:$0xf]  ;;  %v3874_v18 = vld [vmem:[%s4824_s8 + $0x80] sm:$0xf0] }
 0x131   : > { %v5192_v28 = vpop.permute.xlu0 %908  ;;  %2321 = vmatmul.bf16.gmra.mxu1 %v3949_v34  ;;  %v343_v53 = vld [vmem:[%s7004_s0 + $0x218] sm:$0xff] }
 0x132   : > { %2427 = vmatpush.bf16.msrb.mxu3 %v1506_v24  ;;  %v1375_v24 = vmul.f32 %v5025_v51, %v325_v47  ;;  %2267 = vmatmul.bf16.gmra.mxu0 %v4025_v23  ;;  %v350_v47 = vld [vmem:[%s7004_s0 + $0x250] sm:$0xff]  ;;  %v348_v23 = vld [vmem:[%s7004_s0 + $0x240] sm:$0xff] }
 0x134   : > { %2356 = vmatmul.bf16.gmra.mxu3 %v4229_v0  ;;  %v1374_v0 = vmul.f32 %v5027_v45, %v324_v1 }
 0x136   : > { %2428 = vmatpush.bf16.msrb.mxu3 %v1505_v3  ;;  %1143 = vperm.xlu2 %4413, %v539_v40   ;;  %v1500_v38 = vpack.c.bf16 %v1375_v24, %v1374_v0  ;;  %v546_v3 = vld [vmem:[%s7005_s1 + $0x3c0] sm:$0xff]  ;;  %v3877_v0 = vor.u32 %v4286_v15, %v3874_v18 }
 0x137   : > { %1138 = vperm.xlu1 %4412, %v538_v20   ;;  %1133 = vperm.xlu0 %4411, %v537_v46   ;;  %v355_v20 = vld [vmem:[%s7004_s0 + $0x278] sm:$0xff] }
 0x138   : > { %v5221_v58 = vpop.permute.xlu2 %978  ;;  %v5223_v59 = vpop.permute.xlu1 %928 }
 0x139   : > { %v5228_v4 = vpop.permute.xlu0 %923 }
 0x13a   : > { %2429 = vmatpush.bf16.msrb.mxu3 %v1504_v62 }
 0x13c   : > { %2380 = vmatmul.bf16.gmra.mxu2 %v3913_v63 }
 0x13e   : > { %2430 = vmatpush.bf16.msrb.mxu3 %v1503_v5  ;;  %1158 = vperm.xlu2 %4413, %v542_v11   ;;  %v353_v11 = vld [vmem:[%s7004_s0 + $0x268] sm:$0xff] }
 0x13f   : > { %1153 = vperm.xlu1 %4412, %v541_v16   ;;  %1148 = vperm.xlu0 %4411, %v540_v6   ;;  %v550_v6 = vld [vmem:[%s7005_s1 + $0x3e0] sm:$0xff] }
 0x140   : > { %v5251_v13 = vpop.permute.xlu2 %993  ;;  %v5253_v12 = vpop.permute.xlu1 %943 }
 0x141   : > { %v5263_v19 = vpop.permute.xlu0 %938  ;;  %2326 = vmatmul.bf16.gmra.mxu1 %v3989_v33  ;;  %v4032_v33 = vld [vmem:[%s4824_s8 + $0x198] sm:$0xf] }
 0x142   : > { %2431 = vmatpush.bf16.msrb.mxu3 %v1502_v14  ;;  %v1403_v14 = vmul.f32 %v5183_v9, %v353_v11  ;;  %v349_v9 = vld [vmem:[%s7004_s0 + $0x248] sm:$0xff]  ;;  %v1398_v27 = vmul.f32 %v5263_v19, %v348_v23  ;;  %v4282_v23 = vld [vmem:[%s4824_s8 + $0x34] sm:$0xf0] }
 0x146   : > { %2432 = vmatpush.bf16.msrb.mxu3 %v1501_v26  ;;  %1173 = vperm.xlu2 %4413, %v545_v22   ;;  %v3993_v22 = vor.u32 %v4321_v10, %v3992_v61  ;;  %v1400_v26 = vmul.f32 %v5155_v57, %v350_v47  ;;  %v552_v57 = vld [vmem:[%s7005_s1 + $0x3f0] sm:$0xff] }
 0x147   : > { %1168 = vperm.xlu1 %4412, %v544_v29   ;;  %1163 = vperm.xlu0 %4411, %v543_v2   ;;  %v554_v29 = vld [vmem:[%s7005_s1 + $0x400] sm:$0xff]  ;;  %v1399_v2 = vmul.f32 %v5253_v12, %v349_v9  ;;  %v347_v12 = vld [vmem:[%s7004_s0 + $0x238] sm:$0xff]  ;;  %v3840_v9 = vld [vmem:[%s4824_s8 + $0x10] sm:$0xf] }
 0x148   : > { %v5283_v51 = vpop.permute.xlu2 %1008  ;;  %v959_v45 = vpop.permute.xlu1 %958 }
 0x149   : > { %v954_v40 = vpop.permute.xlu0 %953  ;;  %v1402_v5 = vmul.f32 %v959_v45, %v352_v31  ;;  %v1396_v45 = vmul.f32 %v5223_v59, %v346_v32  ;;  %v344_v59 = vld [vmem:[%s7004_s0 + $0x220] sm:$0xff]  ;;  %v4072_v32 = vld [vmem:[%s4824_s8 + $0x1e8] sm:$0xf] }
 0x14a   : > { %2433 = vmatpush.bf16.msrb.mxu3 %v1500_v38  ;;  %v1401_v34 = vmul.f32 %v954_v40, %v351_v8  ;;  %v1512_v40 = vpack.c.bf16 %v1399_v2, %v1398_v27  ;;  %v1394_v11 = vmul.f32 %v5117_v30, %v344_v59  ;;  %v340_v30 = vld [vmem:[%s7004_s0 + $0x200] sm:$0xff]  ;;  %v3841_v27 = vor.u32 %v4282_v23, %v3840_v9  ;;  %v369_v59 = vld [vmem:[%s7004_s0 + $0x2e8] sm:$0xff] }
 0x14b   : > { %v1514_v21 = vpack.c.bf16 %v1403_v14, %v1402_v5  ;;  %v1390_v18 = vmul.f32 %v5157_v50, %v340_v30  ;;  %v4292_v30 = vld [vmem:[%s4824_s8 + $0x84] sm:$0xf0] }
 0x14c   : > { %2385 = vmatmul.bf16.gmra.mxu2 %v3953_v39  ;;  %v1513_v35 = vpack.c.bf16 %v1401_v34, %v1400_v26  ;;  %v559_v34 = vld [vmem:[%s7005_s1 + $0x428] sm:$0xff] }
 0x14d   : > { %2434 = vmatmul.bf16.vlgmr.msrb.gmra.mxu3 %v3837_v42  ;;  %v4325_v42 = vld [vmem:[%s4824_s8 + $0x194] sm:$0xf] }
 0x14e   : > { %1188 = vperm.xlu2 %4413, %v548_v44   ;;  %v4026_v44 = vld [vmem:[%s4824_s8 + $0x1b8] sm:$0xf0] }
 0x14f   : > { %1183 = vperm.xlu1 %4412, %v547_v25   ;;  %1178 = vperm.xlu0 %4411, %v546_v3   ;;  %v5297_v46 = vpop.f32.mrf.mxu2  ;;  %v345_v25 = vld [vmem:[%s7004_s0 + $0x228] sm:$0xff] }
 0x150   : > { %v5302_v49 = vpop.permute.xlu2 %1023  ;;  %v974_v52 = vpop.permute.xlu1 %973  ;;  %v1395_v36 = vmul.f32 %v5228_v4, %v345_v25  ;;  %v4296_v4 = vld [vmem:[%s4824_s8 + $0xac] sm:$0xf] }
 0x151   : > { %v1405_v62 = vmul.f32 %v974_v52, %v355_v20  ;;  %v969_v63 = vpop.permute.xlu0 %968  ;;  %v4029_v20 = vor.u32 %v4325_v42, %v4026_v44  ;;  %v557_v52 = vld [vmem:[%s7005_s1 + $0x418] sm:$0xff]  ;;  %v3954_v42 = vld [vmem:[%s4824_s8 + $0x120] sm:$0xf0] }
 0x152   : > { %v1404_v37 = vmul.f32 %v969_v63, %v354_v48  ;;  %v1397_v48 = vmul.f32 %v5132_v43, %v347_v12  ;;  %v556_v43 = vld [vmem:[%s7005_s1 + $0x410] sm:$0xff]  ;;  %v1510_v61 = vpack.c.bf16 %v1395_v36, %v1394_v11 }
 0x153   : > { %2331 = vmatmul.bf16.gmra.mxu1 %v4029_v20  ;;  %v342_v63 = vld [vmem:[%s7004_s0 + $0x210] sm:$0xff] }
 0x154   : > { %v1515_v16 = vpack.c.bf16 %v1405_v62, %v1404_v37  ;;  %v1511_v31 = vpack.c.bf16 %v1397_v48, %v1396_v45  ;;  %v555_v62 = vld [vmem:[%s7005_s1 + $0x408] sm:$0xff]  ;;  %v4331_v37 = vld [vmem:[%s4824_s8 + $0x1bc] sm:$0xf0]  ;;  %v4341_v12 = vld [vmem:[%s4824_s8 + $0x20c] sm:$0xf0] }
 0x155   : > { %v4033_v10 = vor.u32 %v4331_v37, %v4032_v33  ;;  %v370_v45 = vld [vmem:[%s7004_s0 + $0x2f0] sm:$0xff]  ;;  %v367_v37 = vld [vmem:[%s7004_s0 + $0x2d8] sm:$0xff] }
 0x156   : > { %2490 = vmatpush.bf16.msrb.mxu0 %v1515_v16  ;;  %1203 = vperm.xlu2 %4413, %v551_v60   ;;  %v3914_v60 = vld [vmem:[%s4824_s8 + $0xd0] sm:$0xf0]  ;;  %v1393_v16 = vmul.f32 %v5185_v7, %v343_v53  ;;  %v341_v7 = vld [vmem:[%s7004_s0 + $0x208] sm:$0xff] }
 0x157   : > { %1198 = vperm.xlu1 %4412, %v550_v6   ;;  %1193 = vperm.xlu0 %4411, %v549_v41   ;;  %v5332_v1 = vpop.f32.mrf.mxu2  ;;  %v1392_v6 = vmul.f32 %v5192_v28, %v342_v63  ;;  %v3917_v15 = vor.u32 %v4296_v4, %v3914_v60  ;;  %v560_v28 = vld [vmem:[%s7005_s1 + $0x430] sm:$0xff]  ;;  %v368_v63 = vld [vmem:[%s7004_s0 + $0x2e0] sm:$0xff] }
 0x158   : > { %v5334_v54 = vpop.permute.xlu2 %1038  ;;  %v5336_v56 = vpop.permute.xlu1 %988  ;;  %v366_v4 = vld [vmem:[%s7004_s0 + $0x2d0] sm:$0xff] }
 0x159   : > { %v5344_v24 = vpop.permute.xlu0 %983  ;;  %v1509_v47 = vpack.c.bf16 %v1393_v16, %v1392_v6  ;;  %v5469_v33 = vpop.f32.mrf.mxu0  ;;  %v568_v60 = vld [vmem:[%s7005_s1 + $0x470] sm:$0xff]  ;;  %v1418_v6 = vmul.f32 %v5334_v54, %v368_v63 }
 0x15a   : > { %2491 = vmatpush.bf16.msrb.mxu0 %v1514_v21  ;;  %v558_v21 = vld [vmem:[%s7005_s1 + $0x420] sm:$0xff]  ;;  %v564_v16 = vld [vmem:[%s7005_s1 + $0x450] sm:$0xff] }
 0x15c   : > { %2390 = vmatmul.bf16.gmra.mxu2 %v3993_v22  ;;  %v1391_v22 = vmul.f32 %v5090_v17, %v341_v7  ;;  %v563_v17 = vld [vmem:[%s7005_s1 + $0x448] sm:$0xff] }
 0x15d   : > { %2439 = vmatmul.bf16.gmra.mxu3 %v3877_v0 }
 0x15e   : > { %2492 = vmatpush.bf16.msrb.mxu0 %v1513_v35  ;;  %1218 = vperm.xlu2 %4413, %v554_v29   ;;  %v1508_v29 = vpack.c.bf16 %v1391_v22, %v1390_v18  ;;  %v562_v35 = vld [vmem:[%s7005_s1 + $0x440] sm:$0xff] }
 0x15f   : > { %1213 = vperm.xlu1 %4412, %v553_v55   ;;  %1208 = vperm.xlu0 %4411, %v552_v57   ;;  %v5364_v19 = vpop.f32.mrf.mxu2  ;;  %v561_v55 = vld [vmem:[%s7005_s1 + $0x438] sm:$0xff]  ;;  %v372_v18 = vld [vmem:[%s7004_s0 + $0x300] sm:$0xff] }
 0x160   : > { %v5367_v38 = vpop.permute.xlu2 %1053  ;;  %v5369_v39 = vpop.permute.xlu1 %1003  ;;  %v371_v57 = vld [vmem:[%s7004_s0 + $0x2f8] sm:$0xff] }
 0x161   : > { %v5376_v3 = vpop.permute.xlu0 %998  ;;  %v1421_v36 = vmul.f32 %v5367_v38, %v371_v57  ;;  %v569_v38 = vld [vmem:[%s7005_s1 + $0x478] sm:$0xff] }
 0x162   : > { %2493 = vmatpush.bf16.msrb.mxu0 %v1512_v40  ;;  %v4306_v40 = vld [vmem:[%s4824_s8 + $0xfc] sm:$0xf] }
 0x166   : > { %2494 = vmatpush.bf16.msrb.mxu0 %v1511_v31  ;;  %1233 = vperm.xlu2 %4413, %v557_v52   ;;  %v4073_v52 = vor.u32 %v4341_v12, %v4072_v32  ;;  %v567_v32 = vld [vmem:[%s7005_s1 + $0x468] sm:$0xff]  ;;  %v5527_v12 = vpop.f32.mrf.mxu0 }
 0x167   : > { %1228 = vperm.xlu1 %4412, %v556_v43   ;;  %1223 = vperm.xlu0 %4411, %v555_v62   ;;  %v5403_v5 = vpop.f32.mrf.mxu2  ;;  %v3957_v62 = vor.u32 %v4306_v40, %v3954_v42  ;;  %v4112_v40 = vld [vmem:[%s4824_s8 + $0x238] sm:$0xf]  ;;  %v4351_v42 = vld [vmem:[%s4824_s8 + $0x25c] sm:$0xf0] }
 0x168   : > { %v5407_v41 = vpop.permute.xlu2 %1068  ;;  %v5409_v8 = vpop.permute.xlu1 %1018 }
 0x169   : > { %v5414_v14 = vpop.permute.xlu0 %1013 }
 0x16a   : > { %2495 = vmatpush.bf16.msrb.mxu0 %v1510_v61  ;;  %v373_v61 = vld [vmem:[%s7004_s0 + $0x308] sm:$0xff] }
 0x16c   : > { %2395 = vmatmul.bf16.gmra.mxu2 %v4033_v10  ;;  %v3880_v10 = vld [vmem:[%s4824_s8 + $0x60] sm:$0xf] }
 0x16d   : > { %2444 = vmatmul.bf16.gmra.mxu3 %v3917_v15 }
 0x16e   : > { %2496 = vmatpush.bf16.msrb.mxu0 %v1509_v47  ;;  %1248 = vperm.xlu2 %4413, %v560_v28  }
 0x16f   : > { %1243 = vperm.xlu1 %4412, %v559_v34   ;;  %1238 = vperm.xlu0 %4411, %v558_v21   ;;  %v5432_v50 = vpop.f32.mrf.mxu2  ;;  %v364_v34 = vld [vmem:[%s7004_s0 + $0x2c0] sm:$0xff] }
 0x170   : > { %v5434_v0 = vpop.permute.xlu2 %1083  ;;  %v1034_v26 = vpop.permute.xlu1 %1033 }
 0x171   : > { %v1029_v2 = vpop.permute.xlu0 %1028  ;;  %v1417_v15 = vmul.f32 %v1034_v26, %v367_v37 }
 0x172   : > { %2497 = vmatpush.bf16.msrb.mxu0 %v1508_v29  ;;  %v1416_v7 = vmul.f32 %v1029_v2, %v366_v4  ;;  %v3881_v29 = vor.u32 %v4292_v30, %v3880_v10  ;;  %v365_v2 = vld [vmem:[%s7004_s0 + $0x2c8] sm:$0xff]  ;;  %v3920_v10 = vld [vmem:[%s4824_s8 + $0xb0] sm:$0xf]  ;;  %v4302_v30 = vld [vmem:[%s4824_s8 + $0xd4] sm:$0xf0] }
 0x175   : > { %2498 = vmatmul.bf16.vlgmr.msrb.gmra.mxu0 %v3841_v27 }
 0x176   : > { %1263 = vperm.xlu2 %4413, %v563_v17   ;;  %v1414_v17 = vmul.f32 %v5409_v8, %v364_v34  ;;  %v566_v8 = vld [vmem:[%s7005_s1 + $0x460] sm:$0xff]  ;;  %v357_v34 = vld [vmem:[%s7004_s0 + $0x288] sm:$0xff] }
 0x177   : > { %1258 = vperm.xlu1 %4412, %v562_v35   ;;  %1253 = vperm.xlu0 %4411, %v561_v55   ;;  %v5455_v44 = vpop.f32.mrf.mxu2  ;;  %v2337_v25 = vpop.f32.mrf.mxu3  ;;  %v1521_v35 = vpack.c.bf16 %v1417_v15, %v1416_v7  ;;  %v363_v55 = vld [vmem:[%s7004_s0 + $0x2b8] sm:$0xff] }
 0x178   : > { %v5457_v20 = vpop.permute.xlu2 %1098  ;;  %v1049_v48 = vpop.permute.xlu1 %1048  ;;  %v5463_v53 = vadd.f32 %v2337_v25, %v5297_v46  ;;  %v362_v25 = vld [vmem:[%s7004_s0 + $0x2b0] sm:$0xff] }
 0x179   : > { %v1420_v31 = vmul.f32 %v1049_v48, %v370_v45  ;;  %v1044_v43 = vpop.permute.xlu0 %1043  ;;  %v1415_v45 = vmul.f32 %v5302_v49, %v365_v2  ;;  %v4316_v48 = vld [vmem:[%s4824_s8 + $0x14c] sm:$0xf]  ;;  %v5575_v15 = vpop.f32.mrf.mxu0  ;;  %v3921_v2 = vor.u32 %v4302_v30, %v3920_v10 }
 0x17a   : > { %v1419_v11 = vmul.f32 %v1044_v43, %v369_v59  ;;  %v3994_v59 = vld [vmem:[%s4824_s8 + $0x170] sm:$0xf0]  ;;  %v361_v49 = vld [vmem:[%s7004_s0 + $0x2a8] sm:$0xff] }
 0x17b   : > { %v1523_v46 = vpack.c.bf16 %v1421_v36, %v1420_v31  ;;  %v1520_v31 = vpack.c.bf16 %v1415_v45, %v1414_v17  ;;  %v3997_v4 = vor.u32 %v4316_v48, %v3994_v59  ;;  %v4152_v45 = vld [vmem:[%s4824_s8 + $0x288] sm:$0xf]  ;;  %v4326_v48 = vld [vmem:[%s4824_s8 + $0x19c] sm:$0xf]  ;;  %v4034_v59 = vld [vmem:[%s4824_s8 + $0x1c0] sm:$0xf0] }
 0x17c   : > { %2400 = vmatmul.bf16.gmra.mxu2 %v4073_v52  ;;  %v1522_v54 = vpack.c.bf16 %v1419_v11, %v1418_v6  ;;  %v1413_v52 = vmul.f32 %v5414_v14, %v363_v55  ;;  %v4113_v11 = vor.u32 %v4351_v42, %v4112_v40  ;;  %v4277_v42 = vld [vmem:[%s4824_s8 + $0x14] sm:$0xf] }
 0x17d   : > { %2449 = vmatmul.bf16.gmra.mxu3 %v3957_v62  ;;  %2554 = vmatpush.bf16.msrb.mxu1 %v1523_v46  ;;  %v360_v62 = vld [vmem:[%s7004_s0 + $0x2a0] sm:$0xff]  ;;  %v1412_v46 = vmul.f32 %v5283_v51, %v362_v25  ;;  %v575_v51 = vld [vmem:[%s7005_s1 + $0x4a8] sm:$0xff]  ;;  %v2307_v17 = vpop.f32.mrf.mxu1  ;;  %v3842_v25 = vld [vmem:[%s4824_s8 + $0x38] sm:$0xf0] }
 0x17e   : > { %1293 = vperm.xlu2 %4413, %v569_v38  }
 0x17f   : > { %1288 = vperm.xlu1 %4412, %v568_v60   ;;  %1268 = vperm.xlu0 %4411, %v564_v16   ;;  %v5492_v28 = vpop.f32.mrf.mxu2  ;;  %v2339_v47 = vpop.f32.mrf.mxu3  ;;  %v1411_v60 = vmul.f32 %v5369_v39, %v361_v49  ;;  %v1410_v16 = vmul.f32 %v5376_v3, %v360_v62  ;;  %v1519_v6 = vpack.c.bf16 %v1413_v52, %v1412_v46  ;;  %v574_v39 = vld [vmem:[%s7005_s1 + $0x4a0] sm:$0xff]  ;;  %v359_v3 = vld [vmem:[%s7004_s0 + $0x298] sm:$0xff] }
 0x180   : > { %v5500_v21 = vpop.permute.xlu2 %1113  ;;  %v1064_v22 = vpop.permute.xlu1 %1063  ;;  %v5503_v9 = vadd.f32 %v2339_v47, %v5332_v1  ;;  %v565_v1 = vld [vmem:[%s7005_s1 + $0x458] sm:$0xff] }
 0x181   : > { %v5505_v23 = vmul.f32 %v1064_v22, %v373_v61  ;;  %v1059_v26 = vpop.permute.xlu0 %1058  ;;  %2555 = vmatpush.bf16.msrb.mxu1 %v1522_v54  ;;  %v572_v61 = vld [vmem:[%s7005_s1 + $0x490] sm:$0xff]  ;;  %v1518_v54 = vpack.c.bf16 %v1411_v60, %v1410_v16  ;;  %v5629_v46 = vpop.f32.mrf.mxu0  ;;  %v4037_v60 = vor.u32 %v4326_v48, %v4034_v59  ;;  %v2308_v16 = vadd.f32 %v2307_v17, %v5469_v33  ;;  %v3561_v17 = vld [vmem:[%s5624_s6 + $0x20] sm:$0xff]  ;;  %v387_v59 = vld [vmem:[%s7004_s0 + $0x378] sm:$0xff] }
 0x182   : > { %v5510_v27 = vmul.f32 %v1059_v26, %v372_v18  ;;  %v388_v48 = vld [vmem:[%s7004_s0 + $0x380] sm:$0xff] }
 0x184   : > { %v1524_v57 = vpack.c.bf16 %v5505_v23, %v5510_v27  ;;  %v402_v23 = vld [vmem:[%s7004_s0 + $0x3f0] sm:$0xff] }
 0x185   : > { %2503 = vmatmul.bf16.gmra.mxu0 %v3881_v29  ;;  %2556 = vmatpush.bf16.msrb.mxu1 %v1521_v35  ;;  %v1409_v29 = vmul.f32 %v5251_v13, %v359_v3  ;;  %v356_v35 = vld [vmem:[%s7004_s0 + $0x280] sm:$0xff]  ;;  %v571_v13 = vld [vmem:[%s7005_s1 + $0x488] sm:$0xff] }
 0x186   : > { %1273 = vperm.xlu2 %4413, %v565_v1   ;;  %v1406_v40 = vmul.f32 %v5221_v58, %v356_v35  ;;  %v4312_v3 = vld [vmem:[%s4824_s8 + $0x124] sm:$0xf0] }
 0x187   : > { %1283 = vperm.xlu1 %4412, %v567_v32   ;;  %1278 = vperm.xlu0 %4411, %v566_v8   ;;  %v5538_v36 = vpop.f32.mrf.mxu2  ;;  %v2342_v43 = vpop.f32.mrf.mxu3  ;;  %v570_v32 = vld [vmem:[%s7005_s1 + $0x480] sm:$0xff]  ;;  %v573_v8 = vld [vmem:[%s7005_s1 + $0x498] sm:$0xff]  ;;  %v3562_v35 = vld [vmem:[%s5624_s6 + $0x28] sm:$0xff] }
 0x188   : > { %v5546_v63 = vpop.permute.xlu2 %1128  ;;  %v5548_v37 = vpop.permute.xlu1 %1078  ;;  %v5551_v14 = vadd.f32 %v2342_v43, %v5364_v19  ;;  %v358_v19 = vld [vmem:[%s7004_s0 + $0x290] sm:$0xff] }
 0x189   : > { %v5554_v38 = vpop.permute.xlu0 %1073  ;;  %2557 = vmatpush.bf16.msrb.mxu1 %v1520_v31  ;;  %v1408_v7 = vmul.f32 %v5336_v56, %v358_v19 }
 0x18b   : > { %v1517_v55 = vpack.c.bf16 %v1409_v29, %v1408_v7  ;;  %v5648_v29 = vpop.f32.mrf.mxu0 }
 0x18c   : > { %2405 = vmatmul.bf16.gmra.mxu2 %v4113_v11  ;;  %v3845_v11 = vor.u32 %v4277_v42, %v3842_v25  ;;  %v389_v42 = vld [vmem:[%s7004_s0 + $0x388] sm:$0xff] }
 0x18d   : > { %2454 = vmatmul.bf16.gmra.mxu3 %v3997_v4  ;;  %2558 = vmatpush.bf16.msrb.mxu1 %v1519_v6  ;;  %v5634_v6 = vpop.f32.mrf.mxu1 }
 0x18e   : > { %1308 = vperm.xlu2 %4413, %v572_v61   ;;  %v3558_v61 = vld [vmem:[%s5624_s6 + $0x8] sm:$0xff] }
 0x18f   : > { %1323 = vperm.xlu1 %4412, %v575_v51   ;;  %1318 = vperm.xlu0 %4411, %v574_v39   ;;  %v5578_v18 = vpop.f32.mrf.mxu2  ;;  %v2344_v47 = vpop.f32.mrf.mxu3  ;;  %v3559_v51 = vld [vmem:[%s5624_s6 + $0x10] sm:$0xff]  ;;  %v3557_v39 = vld [vmem:[%s5624_s6] sm:$0xff] }
 0x190   : > { %v5583_v22 = vpop.permute.xlu1 %1093  ;;  %v5586_v26 = vadd.f32 %v2344_v47, %v5403_v5  ;;  %v5594_v1 = vpop.permute.xlu2 %1143  ;;  %v1407_v5 = vmul.f32 %v5344_v24, %v357_v34  ;;  %v4361_v24 = vld [vmem:[%s4824_s8 + $0x2ac] sm:$0xf0] }
 0x191   : > { %v5589_v56 = vpop.permute.xlu0 %1088  ;;  %2559 = vmatpush.bf16.msrb.mxu1 %v1518_v54  ;;  %v4153_v62 = vor.u32 %v4361_v24, %v4152_v45  ;;  %v4074_v24 = vld [vmem:[%s4824_s8 + $0x210] sm:$0xf0] }
 0x192   : > { %v1516_v31 = vpack.c.bf16 %v1407_v5, %v1406_v40  ;;  %v3560_v5 = vld [vmem:[%s5624_s6 + $0x18] sm:$0xff]  ;;  %v4336_v40 = vld [vmem:[%s4824_s8 + $0x1ec] sm:$0xf] }
 0x195   : > { %2508 = vmatmul.bf16.gmra.mxu0 %v3921_v2  ;;  %2560 = vmatpush.bf16.msrb.mxu1 %v1517_v55  ;;  %v2312_v2 = vpop.f32.mrf.mxu1  ;;  %v4192_v55 = vld [vmem:[%s4824_s8 + $0x2d8] sm:$0xf] }
 0x196   : > { %1303 = vperm.xlu2 %4413, %v571_v13   ;;  %v4371_v13 = vld [vmem:[%s4824_s8 + $0x2fc] sm:$0xf0] }
 0x197   : > { %1298 = vperm.xlu1 %4412, %v570_v32   ;;  %1313 = vperm.xlu0 %4411, %v573_v8   ;;  %v5616_v52 = vpop.f32.mrf.mxu2  ;;  %v2347_v43 = vpop.f32.mrf.mxu3  ;;  %v4287_v32 = vld [vmem:[%s4824_s8 + $0x64] sm:$0xf]  ;;  %v3882_v8 = vld [vmem:[%s4824_s8 + $0x88] sm:$0xf0] }
 0x198   : > { %v5618_v49 = vpop.permute.xlu1 %1108  ;;  %v5627_v58 = vadd.f32 %v2347_v43, %v5432_v50  ;;  %v5637_v19 = vpop.permute.xlu2 %1158  ;;  %v3960_v50 = vld [vmem:[%s4824_s8 + $0x100] sm:$0xf]  ;;  %v385_v43 = vld [vmem:[%s7004_s0 + $0x368] sm:$0xff] }
 0x199   : > { %v5631_v4 = vpop.permute.xlu0 %1103  ;;  %2561 = vmatpush.bf16.msrb.mxu1 %v1516_v31  ;;  %v3961_v34 = vor.u32 %v4312_v3, %v3960_v50  ;;  %v2313_v50 = vadd.f32 %v2312_v2, %v5575_v15  ;;  %v3563_v15 = vld [vmem:[%s5624_s6 + $0x30] sm:$0xff] }
 0x19a   : > { %v382_v2 = vld [vmem:[%s7004_s0 + $0x350] sm:$0xff] }
 0x19c   : > { %2410 = vmatmul.bf16.gmra.mxu2 %v4153_v62  ;;  %2562 = vmatmul.bf16.vlgmr.msrb.gmra.mxu1 %v3845_v11  ;;  %v4193_v62 = vor.u32 %v4371_v13, %v4192_v55  ;;  %v3885_v11 = vor.u32 %v4287_v32, %v3882_v8  ;;  %v4322_v32 = vld [vmem:[%s4824_s8 + $0x174] sm:$0xf0] }
 0x19d   : > { %2459 = vmatmul.bf16.gmra.mxu3 %v4037_v60 }
 0x19e   : > { %3586 = vperm.xlu2 %4413, %v3558_v61  }
 0x19f   : > { %3591 = vperm.xlu1 %4412, %v3559_v51   ;;  %3581 = vperm.xlu0 %4411, %v3557_v39   ;;  %v2371_v33 = vpop.f32.mrf.mxu2  ;;  %v2349_v10 = vpop.f32.mrf.mxu3  ;;  %v4077_v39 = vor.u32 %v4336_v40, %v4074_v24  ;;  %v1432_v40 = vmul.f32 %v5618_v49, %v382_v2  ;;  %v4114_v2 = vld [vmem:[%s4824_s8 + $0x260] sm:$0xf0] }
 0x1a0   : > { %v5644_v30 = vadd.f32 %v2349_v10, %v5455_v44  ;;  %v5646_v7 = vadd.f32 %v2371_v33, %v2308_v16  ;;  %v386_v44 = vld [vmem:[%s7004_s0 + $0x370] sm:$0xff]  ;;  %v5660_v45 = vpop.permute.xlu2 %1173  ;;  %v384_v16 = vld [vmem:[%s7004_s0 + $0x360] sm:$0xff]  ;;  %v5687_v33 = vmul.f32 %v5594_v1, %v389_v42  ;;  %v5698_v1 = vpop.f32.mrf.mxu0 }
 0x1a1   : > { %v1124_v54 = vpop.permute.xlu1 %1123  ;;  %v1119_v47 = vpop.permute.xlu0 %1118  ;;  %v1436_v3 = vmul.f32 %v5546_v63, %v386_v44  ;;  %v3565_v63 = vld [vmem:[%s5624_s6 + $0x40] sm:$0xff] }
 0x1a5   : > { %2513 = vmatmul.bf16.gmra.mxu0 %v3961_v34  ;;  %v5691_v34 = vpop.f32.mrf.mxu1 }
 0x1a6   : > { %3601 = vperm.xlu2 %4413, %v3561_v17   ;;  %v1435_v17 = vmul.f32 %v1124_v54, %v385_v43  ;;  %v4000_v54 = vld [vmem:[%s4824_s8 + $0x150] sm:$0xf] }
 0x1a7   : > { %3606 = vperm.xlu1 %4412, %v3562_v35   ;;  %3596 = vperm.xlu0 %4411, %v3560_v5   ;;  %v5667_v25 = vpop.f32.mrf.mxu2  ;;  %v2352_v31 = vpop.f32.mrf.mxu3  ;;  %v3564_v35 = vld [vmem:[%s5624_s6 + $0x38] sm:$0xff]  ;;  %v1434_v5 = vmul.f32 %v1119_v47, %v384_v16  ;;  %v4001_v49 = vor.u32 %v4322_v32, %v4000_v54 }
 0x1a8   : > { %v5679_v60 = vadd.f32 %v2352_v31, %v5492_v28  ;;  %v383_v47 = vld [vmem:[%s7004_s0 + $0x358] sm:$0xff]  ;;  %v5709_v42 = vpop.permute.xlu2 %1188  ;;  %v381_v31 = vld [vmem:[%s7004_s0 + $0x348] sm:$0xff]  ;;  %v5744_v54 = vpop.f32.mrf.mxu0 }
 0x1a9   : > { %v1139_v61 = vpop.permute.xlu1 %1138  ;;  %v1134_v51 = vpop.permute.xlu0 %1133  ;;  %v1530_v24 = vpack.c.bf16 %v1435_v17, %v1434_v5  ;;  %v3566_v17 = vld [vmem:[%s5624_s6 + $0x48] sm:$0xff]  ;;  %v4297_v5 = vld [vmem:[%s4824_s8 + $0xb4] sm:$0xf] }
 0x1aa   : > { %v5689_v10 = vmul.f32 %v1139_v61, %v388_v48  ;;  %v1437_v28 = vmul.f32 %v1134_v51, %v387_v59  ;;  %v379_v61 = vld [vmem:[%s7004_s0 + $0x338] sm:$0xff]  ;;  %v378_v51 = vld [vmem:[%s7004_s0 + $0x330] sm:$0xff] }
 0x1ab   : > { %v1429_v32 = vmul.f32 %v5583_v22, %v379_v61  ;;  %v376_v22 = vld [vmem:[%s7004_s0 + $0x320] sm:$0xff] }
 0x1ac   : > { %v1531_v13 = vpack.c.bf16 %v1437_v28, %v1436_v3  ;;  %2415 = vmatmul.bf16.gmra.mxu2 %v4193_v62  ;;  %2567 = vmatmul.bf16.gmra.mxu1 %v3885_v11  ;;  %v1433_v11 = vmul.f32 %v5500_v21, %v383_v47  ;;  %v1431_v3 = vmul.f32 %v5631_v4, %v381_v31  ;;  %v3568_v28 = vld [vmem:[%s5624_s6 + $0x58] sm:$0xff]  ;;  %v4381_v21 = vld [vmem:[%s4824_s8 + $0x34c] sm:$0xf0] }
 0x1ad   : > { %2464 = vmatmul.bf16.gmra.mxu3 %v4077_v39  ;;  %v2317_v16 = vpop.f32.mrf.mxu1  ;;  %v3567_v39 = vld [vmem:[%s5624_s6 + $0x50] sm:$0xff]  ;;  %v1428_v47 = vmul.f32 %v5589_v56, %v378_v51  ;;  %v3570_v51 = vld [vmem:[%s5624_s6 + $0x68] sm:$0xff] }
 0x1ae   : > { %2618 = vmatpush.bf16.msra.mxu2 %v1531_v13  ;;  %3616 = vperm.xlu2 %4413, %v3564_v35   ;;  %v4232_v35 = vld [vmem:[%s4824_s8 + $0x328] sm:$0xf]  ;;  %v3922_v13 = vld [vmem:[%s4824_s8 + $0xd8] sm:$0xf0] }
 0x1af   : > { %3621 = vperm.xlu1 %4412, %v3565_v63   ;;  %3611 = vperm.xlu0 %4411, %v3563_v15   ;;  %v2376_v8 = vpop.f32.mrf.mxu2  ;;  %v2354_v44 = vpop.f32.mrf.mxu3  ;;  %v4346_v15 = vld [vmem:[%s4824_s8 + $0x23c] sm:$0xf] }
 0x1b0   : > { %v5712_v48 = vadd.f32 %v2354_v44, %v5538_v36  ;;  %v5714_v59 = vadd.f32 %v2376_v8, %v2313_v50  ;;  %v380_v36 = vld [vmem:[%s7004_s0 + $0x340] sm:$0xff]  ;;  %v1529_v50 = vpack.c.bf16 %v1433_v11, %v1432_v40  ;;  %v4233_v40 = vor.u32 %v4381_v21, %v4232_v35  ;;  %v5761_v11 = vpop.permute.xlu2 %1203  ;;  %v4332_v35 = vld [vmem:[%s4824_s8 + $0x1c4] sm:$0xf0] }
 0x1b1   : > { %v5719_v43 = vpop.permute.xlu1 %1153  ;;  %v5721_v62 = vpop.permute.xlu0 %1148  ;;  %v1430_v63 = vmul.f32 %v5457_v20, %v380_v36  ;;  %v2318_v36 = vadd.f32 %v2317_v16, %v5648_v29  ;;  %v375_v29 = vld [vmem:[%s7004_s0 + $0x318] sm:$0xff] }
 0x1b2   : > { %2619 = vmatpush.bf16.msra.mxu2 %v1530_v24  ;;  %v3925_v24 = vor.u32 %v4297_v5, %v3922_v13 }
 0x1b3   : > { %v1528_v44 = vpack.c.bf16 %v1431_v3, %v1430_v63  ;;  %v3571_v3 = vld [vmem:[%s5624_s6 + $0x70] sm:$0xff]  ;;  %v1425_v63 = vmul.f32 %v5554_v38, %v375_v29 }
 0x1b5   : > { %2518 = vmatmul.bf16.gmra.mxu0 %v4001_v49  ;;  %v4117_v49 = vor.u32 %v4346_v15, %v4114_v2  ;;  %v5763_v61 = vpop.f32.mrf.mxu1  ;;  %v5785_v15 = vpop.f32.mrf.mxu0 }
 0x1b6   : > { %2620 = vmatpush.bf16.msra.mxu2 %v1529_v50  ;;  %3631 = vperm.xlu2 %4413, %v3567_v39   ;;  %v1426_v39 = vmul.f32 %v5548_v37, %v376_v22  ;;  %v1527_v50 = vpack.c.bf16 %v1429_v32, %v1428_v47  ;;  %v374_v37 = vld [vmem:[%s7004_s0 + $0x310] sm:$0xff]  ;;  %v3574_v22 = vld [vmem:[%s5624_s6 + $0x88] sm:$0xff] }
 0x1b7   : > { %3636 = vperm.xlu1 %4412, %v3568_v28   ;;  %3626 = vperm.xlu0 %4411, %v3566_v17   ;;  %v5748_v4 = vpop.f32.mrf.mxu2  ;;  %v2357_v8 = vpop.f32.mrf.mxu3  ;;  %v3569_v28 = vld [vmem:[%s5624_s6 + $0x60] sm:$0xff] }
 0x1b8   : > { %v5751_v20 = vadd.f32 %v2357_v8, %v5578_v18  ;;  %v377_v18 = vld [vmem:[%s7004_s0 + $0x328] sm:$0xff]  ;;  %v4040_v17 = vld [vmem:[%s4824_s8 + $0x1a0] sm:$0xf] }
 0x1b9   : > { %v5756_v31 = vpop.permute.xlu1 %1168  ;;  %v5758_v56 = vpop.permute.xlu0 %1163  ;;  %v1427_v16 = vmul.f32 %v5434_v0, %v377_v18  ;;  %v4041_v8 = vor.u32 %v4332_v35, %v4040_v17  ;;  %v4307_v18 = vld [vmem:[%s4824_s8 + $0x104] sm:$0xf] }
 0x1ba   : > { %2621 = vmatpush.bf16.msra.mxu2 %v1528_v44  ;;  %v1424_v44 = vmul.f32 %v5407_v41, %v374_v37 }
 0x1bb   : > { %v1526_v13 = vpack.c.bf16 %v1427_v16, %v1426_v39  ;;  %v4154_v39 = vld [vmem:[%s4824_s8 + $0x2b0] sm:$0xf0] }
 0x1bc   : > { %2420 = vmatmul.bf16.gmra.mxu2 %v4233_v40  ;;  %2572 = vmatmul.bf16.gmra.mxu1 %v3925_v24  ;;  %v1525_v40 = vpack.c.bf16 %v1425_v63, %v1424_v44  ;;  %v5795_v24 = vpop.permute.xlu2 %1218  ;;  %v4342_v44 = vld [vmem:[%s4824_s8 + $0x214] sm:$0xf0] }
 0x1bd   : > { %2469 = vmatmul.bf16.gmra.mxu3 %v4117_v49  ;;  %v2322_v38 = vpop.f32.mrf.mxu1  ;;  %v3572_v49 = vld [vmem:[%s5624_s6 + $0x78] sm:$0xff] }
 0x1be   : > { %2622 = vmatpush.bf16.msra.mxu2 %v1527_v50  ;;  %3646 = vperm.xlu2 %4413, %v3570_v51   ;;  %v3962_v51 = vld [vmem:[%s4824_s8 + $0x128] sm:$0xf0]  ;;  %v3848_v50 = vld [vmem:[%s4824_s8 + $0x18] sm:$0xf]  ;;  %v2323_v37 = vadd.f32 %v2322_v38, %v5744_v54  ;;  %v400_v38 = vld [vmem:[%s7004_s0 + $0x3e0] sm:$0xff] }
 0x1bf   : > { %3651 = vperm.xlu1 %4412, %v3571_v3   ;;  %3641 = vperm.xlu0 %4411, %v3569_v28   ;;  %v2381_v21 = vpop.f32.mrf.mxu2  ;;  %v2359_v5 = vpop.f32.mrf.mxu3  ;;  %v4283_v3 = vld [vmem:[%s4824_s8 + $0x3c] sm:$0xf0]  ;;  %v3965_v28 = vor.u32 %v4307_v18, %v3962_v51  ;;  %v403_v54 = vld [vmem:[%s7004_s0 + $0x3f8] sm:$0xff] }
 0x1c0   : > { %v5783_v0 = vadd.f32 %v2359_v5, %v5616_v52  ;;  %v5787_v2 = vadd.f32 %v2381_v21, %v2318_v36  ;;  %v3573_v52 = vld [vmem:[%s5624_s6 + $0x80] sm:$0xff]  ;;  %v4356_v36 = vld [vmem:[%s4824_s8 + $0x28c] sm:$0xf]  ;;  %v3849_v35 = vor.u32 %v4283_v3, %v3848_v50  ;;  %v2263_v21 = vpop.f32.mrf.mxu0  ;;  %v2310_v3 = vadd.f32 %v5634_v6, %v5527_v12  ;;  %v398_v12 = vld [vmem:[%s7004_s0 + $0x3d0] sm:$0xff] }
 0x1c1   : > { %v5789_v32 = vpop.permute.xlu1 %1183  ;;  %v5791_v47 = vpop.permute.xlu0 %1178  ;;  %v4157_v17 = vor.u32 %v4356_v36, %v4154_v39  ;;  %v401_v50 = vld [vmem:[%s7004_s0 + $0x3e8] sm:$0xff] }
 0x1c2   : > { %2623 = vmatpush.bf16.msra.mxu2 %v1526_v13  ;;  %v3575_v13 = vld [vmem:[%s5624_s6 + $0x90] sm:$0xff] }
 0x1c4   : > { %v5814_v63 = vpop.permute.xlu2 %1233 }
 0x1c5   : > { %2523 = vmatmul.bf16.gmra.mxu0 %v4041_v8  ;;  %v5811_v5 = vpop.f32.mrf.mxu1  ;;  %v4080_v8 = vld [vmem:[%s4824_s8 + $0x1f0] sm:$0xf] }
 0x1c6   : > { %2624 = vmatpush.bf16.msra.mxu2 %v1525_v40  ;;  %3661 = vperm.xlu2 %4413, %v3573_v52   ;;  %v4081_v36 = vor.u32 %v4342_v44, %v4080_v8  ;;  %v4002_v8 = vld [vmem:[%s4824_s8 + $0x178] sm:$0xf0]  ;;  %v1451_v44 = vmul.f32 %v5761_v11, %v401_v50  ;;  %v397_v11 = vld [vmem:[%s7004_s0 + $0x3c8] sm:$0xff] }
 0x1c7   : > { %3666 = vperm.xlu1 %4412, %v3574_v22   ;;  %3656 = vperm.xlu0 %4411, %v3572_v49   ;;  %v5805_v41 = vpop.f32.mrf.mxu2 }
 0x1c9   : > { %v1199_v29 = vpop.permute.xlu1 %1198  ;;  %v1194_v16 = vpop.permute.xlu0 %1193 }
 0x1ca   : > { %2625 = vmatpush.bf16.msra.mxu2 %v1524_v57 }
 0x1cc   : > { %2577 = vmatmul.bf16.gmra.mxu1 %v3965_v28  ;;  %v1450_v28 = vmul.f32 %v1199_v29, %v400_v38  ;;  %v2374_v29 = vadd.f32 %v5667_v25, %v2310_v3 }
 0x1cd   : > { %2474 = vmatmul.bf16.gmra.mxu3 %v4157_v17  ;;  %2626 = vmatmul.bf16.vlgmr.msra.gmra.mxu2 %v3849_v35  ;;  %v2327_v39 = vpop.f32.mrf.mxu1  ;;  %v5840_v35 = vpop.f32.mrf.mxu0 }
 0x1ce   : > { %v1538_v38 = vpack.c.bf16 %v1451_v44, %v1450_v28  ;;  %v2328_v3 = vadd.f32 %v2327_v39, %v2263_v21  ;;  %v1448_v28 = vmul.f32 %v5709_v42, %v398_v12  ;;  %v4120_v21 = vld [vmem:[%s4824_s8 + $0x240] sm:$0xf]  ;;  %v4352_v39 = vld [vmem:[%s4824_s8 + $0x264] sm:$0xf0]  ;;  %v395_v42 = vld [vmem:[%s7004_s0 + $0x3b8] sm:$0xff] }
 0x1cf   : > { %3671 = vperm.xlu0 %4411, %v3575_v13   ;;  %v2386_v52 = vpop.f32.mrf.mxu2  ;;  %v4317_v13 = vld [vmem:[%s4824_s8 + $0x154] sm:$0xf]  ;;  %v393_v12 = vld [vmem:[%s7004_s0 + $0x3a8] sm:$0xff] }
 0x1d0   : > { %v2435_v27 = vpop.f32.mrf.mxu3  ;;  %v5824_v57 = vadd.f32 %v2386_v52, %v2323_v37  ;;  %v4366_v37 = vld [vmem:[%s4824_s8 + $0x2dc] sm:$0xf]  ;;  %v4194_v52 = vld [vmem:[%s4824_s8 + $0x300] sm:$0xf0] }
 0x1d1   : > { %v5830_v40 = vadd.f32 %v2435_v27, %v5646_v7  ;;  %v1214_v22 = vpop.permute.xlu1 %1213  ;;  %v1209_v49 = vpop.permute.xlu0 %1208  ;;  %v399_v7 = vld [vmem:[%s7004_s0 + $0x3d8] sm:$0xff]  ;;  %v4197_v25 = vor.u32 %v4366_v37, %v4194_v52 }
 0x1d2   : > { %v1453_v18 = vmul.f32 %v1214_v22, %v403_v54  ;;  %v1452_v51 = vmul.f32 %v1209_v49, %v402_v23  ;;  %v3888_v54 = vld [vmem:[%s4824_s8 + $0x68] sm:$0xf]  ;;  %v4293_v23 = vld [vmem:[%s4824_s8 + $0x8c] sm:$0xf0]  ;;  %v5855_v27 = vpop.permute.xlu2 %1248  ;;  %v1449_v22 = vmul.f32 %v1194_v16, %v399_v7  ;;  %v1447_v7 = vmul.f32 %v5789_v32, %v397_v11 }
 0x1d3   : > { %v3889_v16 = vor.u32 %v4293_v23, %v3888_v54 }
 0x1d4   : > { %v1539_v17 = vpack.c.bf16 %v1453_v18, %v1452_v51  ;;  %v396_v18 = vld [vmem:[%s7004_s0 + $0x3c0] sm:$0xff] }
 0x1d5   : > { %2528 = vmatmul.bf16.gmra.mxu0 %v4081_v36  ;;  %v4005_v36 = vor.u32 %v4317_v13, %v4002_v8  ;;  %v1446_v13 = vmul.f32 %v5791_v47, %v396_v18  ;;  %v1537_v8 = vpack.c.bf16 %v1449_v22, %v1448_v28  ;;  %v5872_v44 = vpop.f32.mrf.mxu1  ;;  %v2268_v37 = vpop.f32.mrf.mxu0  ;;  %v392_v18 = vld [vmem:[%s7004_s0 + $0x3a0] sm:$0xff]  ;;  %v4376_v28 = vld [vmem:[%s4824_s8 + $0x32c] sm:$0xf] }
 0x1d6   : > { %2682 = vmatpush.bf16.msra.mxu3 %v1539_v17 }
 0x1d7   : > { %v5852_v6 = vpop.f32.mrf.mxu2  ;;  %v1536_v52 = vpack.c.bf16 %v1447_v7, %v1446_v13  ;;  %v4327_v7 = vld [vmem:[%s4824_s8 + $0x1a4] sm:$0xf]  ;;  %v4042_v13 = vld [vmem:[%s4824_s8 + $0x1c8] sm:$0xf0] }
 0x1d8   : > { %v2437_v49 = vpop.f32.mrf.mxu3 }
 0x1d9   : > { %v5863_v51 = vadd.f32 %v2437_v49, %v2374_v29  ;;  %v5865_v50 = vpop.permute.xlu1 %1228  ;;  %v5867_v17 = vpop.permute.xlu0 %1223  ;;  %v394_v29 = vld [vmem:[%s7004_s0 + $0x3b0] sm:$0xff] }
 0x1da   : > { %2683 = vmatpush.bf16.msra.mxu3 %v1538_v38  ;;  %v1444_v47 = vmul.f32 %v5756_v31, %v394_v29  ;;  %v1445_v31 = vmul.f32 %v5660_v45, %v395_v42  ;;  %v5896_v11 = vpop.permute.xlu2 %1263  ;;  %v390_v45 = vld [vmem:[%s7004_s0 + $0x390] sm:$0xff] }
 0x1db   : > { %v4234_v29 = vld [vmem:[%s4824_s8 + $0x350] sm:$0xf0] }
 0x1dc   : > { %2582 = vmatmul.bf16.gmra.mxu1 %v4005_v36  ;;  %v4121_v36 = vor.u32 %v4352_v39, %v4120_v21 }
 0x1dd   : > { %2479 = vmatmul.bf16.gmra.mxu3 %v4197_v25  ;;  %2631 = vmatmul.bf16.gmra.mxu2 %v3889_v16  ;;  %v391_v25 = vld [vmem:[%s7004_s0 + $0x398] sm:$0xff]  ;;  %v1535_v16 = vpack.c.bf16 %v1445_v31, %v1444_v47  ;;  %v2332_v21 = vpop.f32.mrf.mxu1  ;;  %v1440_v47 = vmul.f32 %v5721_v62, %v390_v45  ;;  %v4160_v62 = vld [vmem:[%s4824_s8 + $0x290] sm:$0xf] }
 0x1de   : > { %2684 = vmatpush.bf16.msra.mxu3 %v1537_v8  ;;  %v1442_v8 = vmul.f32 %v5637_v19, %v392_v18  ;;  %v4237_v18 = vor.u32 %v4376_v28, %v4234_v29  ;;  %v2333_v55 = vadd.f32 %v2332_v21, %v2268_v37 }
 0x1df   : > { %v2391_v32 = vpop.f32.mrf.mxu2 }
 0x1e0   : > { %v2440_v54 = vpop.f32.mrf.mxu3  ;;  %v5883_v23 = vadd.f32 %v2391_v32, %v2328_v3  ;;  %v1443_v3 = vmul.f32 %v5758_v56, %v393_v12  ;;  %v1441_v32 = vmul.f32 %v5719_v43, %v391_v25  ;;  %v4045_v12 = vor.u32 %v4327_v7, %v4042_v13  ;;  %v419_v25 = vld [vmem:[%s7004_s0 + $0x478] sm:$0xff] }
 0x1e1   : > { %v5889_v38 = vadd.f32 %v2440_v54, %v5714_v59  ;;  %v5891_v22 = vpop.permute.xlu1 %1243  ;;  %v5893_v49 = vpop.permute.xlu0 %1238  ;;  %v2315_v59 = vadd.f32 %v5691_v34, %v5629_v46  ;;  %v3928_v46 = vld [vmem:[%s4824_s8 + $0xb8] sm:$0xf]  ;;  %v4303_v34 = vld [vmem:[%s4824_s8 + $0xdc] sm:$0xf0] }
 0x1e2   : > { %2685 = vmatpush.bf16.msra.mxu3 %v1536_v52  ;;  %v1534_v56 = vpack.c.bf16 %v1443_v3, %v1442_v8  ;;  %v2270_v54 = vpop.f32.mrf.mxu0  ;;  %v1294_v43 = vpop.permute.xlu2 %1293  ;;  %v418_v3 = vld [vmem:[%s7004_s0 + $0x470] sm:$0xff] }
 0x1e3   : > { %v2379_v42 = vadd.f32 %v5748_v4, %v2315_v59  ;;  %v1533_v4 = vpack.c.bf16 %v1441_v32, %v1440_v47  ;;  %v4362_v59 = vld [vmem:[%s4824_s8 + $0x2b4] sm:$0xf0]  ;;  %v7030_v32 = vpack.c.bf16 %v5687_v33, %v5689_v10  ;;  %v417_v10 = vld [vmem:[%s7004_s0 + $0x468] sm:$0xff] }
 0x1e5   : > { %2533 = vmatmul.bf16.gmra.mxu0 %v4121_v36  ;;  %v2334_v37 = vpop.f32.mrf.mxu1 }
 0x1e6   : > { %2686 = vmatpush.bf16.msra.mxu3 %v1535_v16  ;;  %v3929_v16 = vor.u32 %v4303_v34, %v3928_v46  ;;  %v4161_v46 = vor.u32 %v4362_v59, %v4160_v62  ;;  %v1469_v34 = vmul.f32 %v1294_v43, %v419_v25  ;;  %v4278_v43 = vld [vmem:[%s4824_s8 + $0x1c] sm:$0xf]  ;;  %v3850_v62 = vld [vmem:[%s4824_s8 + $0x40] sm:$0xf0]  ;;  %v414_v25 = vld [vmem:[%s7004_s0 + $0x450] sm:$0xff] }
 0x1e7   : > { %v5917_v39 = vpop.f32.mrf.mxu2 }
 0x1e8   : > { %v2442_v52 = vpop.f32.mrf.mxu3 }
 0x1e9   : > { %v5922_v19 = vadd.f32 %v2442_v52, %v2379_v42  ;;  %v5924_v36 = vpop.permute.xlu1 %1258  ;;  %v5926_v31 = vpop.permute.xlu0 %1253  ;;  %v4337_v52 = vld [vmem:[%s4824_s8 + $0x1f4] sm:$0xf] }
 0x1ea   : > { %2687 = vmatpush.bf16.msra.mxu3 %v1534_v56  ;;  %v2335_v56 = vadd.f32 %v2334_v37, %v2270_v54  ;;  %v3853_v37 = vor.u32 %v4278_v43, %v3850_v62 }
 0x1ec   : > { %2587 = vmatmul.bf16.gmra.mxu1 %v4045_v12  ;;  %v4082_v12 = vld [vmem:[%s4824_s8 + $0x218] sm:$0xf0] }
 0x1ed   : > { %2484 = vmatmul.bf16.gmra.mxu3 %v4237_v18  ;;  %2636 = vmatmul.bf16.gmra.mxu2 %v3929_v16  ;;  %v3968_v18 = vld [vmem:[%s4824_s8 + $0x108] sm:$0xf]  ;;  %v1274_v16 = vpop.permute.xlu2 %1273 }
 0x1ee   : > { %2688 = vmatpush.bf16.msra.mxu3 %v1533_v4  ;;  %v4313_v4 = vld [vmem:[%s4824_s8 + $0x12c] sm:$0xf0] }
 0x1ef   : > { %v2396_v45 = vpop.f32.mrf.mxu2 }
 0x1f0   : > { %v2445_v28 = vpop.f32.mrf.mxu3  ;;  %v5936_v7 = vadd.f32 %v2396_v45, %v2333_v55  ;;  %v2320_v55 = vadd.f32 %v5763_v61, %v5698_v1  ;;  %v416_v1 = vld [vmem:[%s7004_s0 + $0x460] sm:$0xff] }
 0x1f1   : > { %v5939_v13 = vadd.f32 %v2445_v28, %v5787_v2  ;;  %v1289_v8 = vpop.permute.xlu1 %1288  ;;  %v1269_v29 = vpop.permute.xlu0 %1268  ;;  %v3969_v28 = vor.u32 %v4313_v4, %v3968_v18  ;;  %v413_v18 = vld [vmem:[%s7004_s0 + $0x448] sm:$0xff] }
 0x1f2   : > { %v1468_v21 = vmul.f32 %v1289_v8, %v418_v3  ;;  %v2499_v42 = vpop.f32.mrf.mxu0  ;;  %2689 = vmatpush.bf16.msra.mxu3 %v7030_v32  ;;  %v2384_v33 = vadd.f32 %v5805_v41, %v2320_v55  ;;  %v1464_v32 = vmul.f32 %v1269_v29, %v414_v25  ;;  %v424_v29 = vld [vmem:[%s7004_s0 + $0x4a0] sm:$0xff] }
 0x1f3   : > { %v5947_v47 = vadd.f32 %v2499_v42, %v5830_v40  ;;  %v4085_v40 = vor.u32 %v4337_v52, %v4082_v12  ;;  %v4200_v52 = vld [vmem:[%s4824_s8 + $0x2e0] sm:$0xf]  ;;  %v4372_v12 = vld [vmem:[%s4824_s8 + $0x304] sm:$0xf0] }
 0x1f4   : > { %v1547_v2 = vpack.c.bf16 %v1469_v34, %v1468_v21  ;;  %v415_v21 = vld [vmem:[%s7004_s0 + $0x458] sm:$0xff]  ;;  %v4201_v25 = vor.u32 %v4372_v12, %v4200_v52  ;;  %v422_v12 = vld [vmem:[%s7004_s0 + $0x490] sm:$0xff] }
 0x1f5   : > { %2538 = vmatmul.bf16.gmra.mxu0 %v4161_v46  ;;  %v1309_v43 = vpop.permute.xlu2 %1308 }
 0x1f6   : > { %2746 = vmatpush.bf16.msra.mxu0 %v1547_v2  ;;  %v412_v2 = vld [vmem:[%s7004_s0 + $0x440] sm:$0xff] }
 0x1f7   : > { %v2398_v59 = vpop.f32.mrf.mxu2  ;;  %v1462_v62 = vmul.f32 %v5924_v36, %v412_v2  ;;  %v4288_v2 = vld [vmem:[%s4824_s8 + $0x6c] sm:$0xf] }
 0x1f8   : > { %v2447_v61 = vpop.f32.mrf.mxu3  ;;  %v5962_v54 = vadd.f32 %v2398_v59, %v2335_v56  ;;  %v1465_v56 = vmul.f32 %v1274_v16, %v415_v21 }
 0x1f9   : > { %v5967_v45 = vadd.f32 %v2447_v61, %v2384_v33  ;;  %v1284_v3 = vpop.permute.xlu1 %1283  ;;  %v1279_v41 = vpop.permute.xlu0 %1278 }
 0x1fa   : > { %v1467_v8 = vmul.f32 %v1284_v3, %v417_v10  ;;  %v1466_v46 = vmul.f32 %v1279_v41, %v416_v1  ;;  %v2501_v34 = vpop.f32.mrf.mxu0  ;;  %v1545_v16 = vpack.c.bf16 %v1465_v56, %v1464_v32  ;;  %v411_v10 = vld [vmem:[%s7004_s0 + $0x438] sm:$0xff]  ;;  %v1463_v3 = vmul.f32 %v5896_v11, %v413_v18  ;;  %v409_v11 = vld [vmem:[%s7004_s0 + $0x428] sm:$0xff]  ;;  %v4347_v32 = vld [vmem:[%s4824_s8 + $0x244] sm:$0xf] }
 0x1fb   : > { %v5973_v42 = vadd.f32 %v2501_v34, %v5863_v51  ;;  %v425_v51 = vld [vmem:[%s7004_s0 + $0x4a8] sm:$0xff]  ;;  %v1461_v34 = vmul.f32 %v5926_v31, %v411_v10  ;;  %v3890_v56 = vld [vmem:[%s4824_s8 + $0x90] sm:$0xf0]  ;;  %v1459_v52 = vmul.f32 %v5891_v22, %v409_v11 }
 0x1fc   : > { %v1546_v55 = vpack.c.bf16 %v1467_v8, %v1466_v46  ;;  %2592 = vmatmul.bf16.gmra.mxu1 %v4085_v40  ;;  %v408_v8 = vld [vmem:[%s7004_s0 + $0x420] sm:$0xff]  ;;  %v1544_v46 = vpack.c.bf16 %v1463_v3, %v1462_v62  ;;  %v406_v22 = vld [vmem:[%s7004_s0 + $0x410] sm:$0xff] }
 0x1fd   : > { %2641 = vmatmul.bf16.gmra.mxu2 %v3969_v28  ;;  %2690 = vmatmul.bf16.vlgmr.msra.gmra.mxu3 %v3853_v37  ;;  %v410_v28 = vld [vmem:[%s7004_s0 + $0x430] sm:$0xff] }
 0x1fe   : > { %2747 = vmatpush.bf16.msra.mxu0 %v1546_v55  ;;  %v4122_v55 = vld [vmem:[%s4824_s8 + $0x268] sm:$0xf0] }
 0x1ff   : > { %v2401_v4 = vpop.f32.mrf.mxu2 }
 0x200   : > { %v5991_v59 = vadd.f32 %v2401_v4, %v5463_v53  ;;  %v2450_v33 = vpop.f32.mrf.mxu3  ;;  %v423_v4 = vld [vmem:[%s7004_s0 + $0x498] sm:$0xff] }
 0x201   : > { %v5997_v1 = vadd.f32 %v2450_v33, %v5824_v57  ;;  %v1324_v61 = vpop.permute.xlu1 %1323  ;;  %v1319_v40 = vpop.permute.xlu0 %1318  ;;  %v2325_v57 = vadd.f32 %v5811_v5, %v5785_v15  ;;  %v4008_v15 = vld [vmem:[%s4824_s8 + $0x158] sm:$0xf]  ;;  %v1460_v5 = vmul.f32 %v5855_v27, %v410_v28  ;;  %v1458_v27 = vmul.f32 %v5893_v49, %v408_v8 }
 0x202   : > { %v1475_v36 = vmul.f32 %v1324_v61, %v425_v51  ;;  %v1474_v41 = vmul.f32 %v1319_v40, %v424_v29  ;;  %v2504_v53 = vpop.f32.mrf.mxu0  ;;  %2748 = vmatpush.bf16.msra.mxu0 %v1545_v16  ;;  %v4125_v16 = vor.u32 %v4347_v32, %v4122_v55  ;;  %v3893_v49 = vor.u32 %v4288_v2, %v3890_v56  ;;  %v4240_v32 = vld [vmem:[%s4824_s8 + $0x330] sm:$0xf] }
 0x203   : > { %v6006_v37 = vadd.f32 %v2504_v53, %v5889_v38  ;;  %v4323_v38 = vld [vmem:[%s4824_s8 + $0x17c] sm:$0xf0]  ;;  %v2389_v31 = vadd.f32 %v5852_v6, %v2325_v57  ;;  %v1543_v51 = vpack.c.bf16 %v1461_v34, %v1460_v5  ;;  %v421_v53 = vld [vmem:[%s7004_s0 + $0x488] sm:$0xff]  ;;  %v1456_v57 = vmul.f32 %v5865_v50, %v406_v22 }
 0x204   : > { %v1550_v21 = vpack.c.bf16 %v1475_v36, %v1474_v41  ;;  %v420_v6 = vld [vmem:[%s7004_s0 + $0x480] sm:$0xff]  ;;  %v4009_v40 = vor.u32 %v4323_v38, %v4008_v15  ;;  %v407_v36 = vld [vmem:[%s7004_s0 + $0x418] sm:$0xff]  ;;  %v1304_v41 = vpop.permute.xlu2 %1303 }
 0x205   : > { %2543 = vmatmul.bf16.gmra.mxu0 %v4201_v25  ;;  %v1472_v25 = vmul.f32 %v1309_v43, %v422_v12  ;;  %v1542_v43 = vpack.c.bf16 %v1459_v52, %v1458_v27  ;;  %v1457_v34 = vmul.f32 %v5814_v63, %v407_v36  ;;  %v404_v50 = vld [vmem:[%s7004_s0 + $0x400] sm:$0xff]  ;;  %v4162_v27 = vld [vmem:[%s4824_s8 + $0x2b8] sm:$0xf0] }
 0x206   : > { %2749 = vmatpush.bf16.msra.mxu0 %v1544_v46  ;;  %2815 = vmatpush.bf16.msra.mxu1 %v1550_v21  ;;  %v405_v46 = vld [vmem:[%s7004_s0 + $0x408] sm:$0xff]  ;;  %v1471_v21 = vmul.f32 %v1304_v41, %v421_v53  ;;  %v1454_v12 = vmul.f32 %v5795_v24, %v404_v50 }
 0x207   : > { %v2403_v18 = vpop.f32.mrf.mxu2  ;;  %v1541_v15 = vpack.c.bf16 %v1457_v34, %v1456_v57  ;;  %v1455_v5 = vmul.f32 %v5867_v17, %v405_v46  ;;  %v2330_v17 = vadd.f32 %v5872_v44, %v5840_v35  ;;  %v4202_v46 = vld [vmem:[%s4824_s8 + $0x308] sm:$0xf0]  ;;  %v4088_v34 = vld [vmem:[%s4824_s8 + $0x1f8] sm:$0xf] }
 0x208   : > { %v6032_v29 = vadd.f32 %v2403_v18, %v5503_v9  ;;  %v2452_v62 = vpop.f32.mrf.mxu3 }
 0x209   : > { %v6037_v33 = vadd.f32 %v2452_v62, %v2389_v31  ;;  %v1299_v10 = vpop.permute.xlu1 %1298  ;;  %v1314_v61 = vpop.permute.xlu0 %1313  ;;  %v4298_v62 = vld [vmem:[%s4824_s8 + $0xbc] sm:$0xf]  ;;  %v2394_v22 = vadd.f32 %v5917_v39, %v2330_v17  ;;  %v4284_v39 = vld [vmem:[%s4824_s8 + $0x44] sm:$0xf0] }
 0x20a   : > { %v1473_v3 = vmul.f32 %v1314_v61, %v423_v4  ;;  %v2506_v9 = vpop.f32.mrf.mxu0  ;;  %2750 = vmatpush.bf16.msra.mxu0 %v1543_v51  ;;  %v1470_v11 = vmul.f32 %v1299_v10, %v420_v6  ;;  %v4357_v4 = vld [vmem:[%s4824_s8 + $0x294] sm:$0xf]  ;;  %v4048_v51 = vld [vmem:[%s4824_s8 + $0x1a8] sm:$0xf] }
 0x20b   : > { %v6049_v28 = vadd.f32 %v2506_v9, %v5922_v19  ;;  %v4382_v19 = vld [vmem:[%s4824_s8 + $0x354] sm:$0xf0]  ;;  %v4165_v44 = vor.u32 %v4357_v4, %v4162_v27 }
 0x20c   : > { %v1549_v8 = vpack.c.bf16 %v1473_v3, %v1472_v25  ;;  %2597 = vmatmul.bf16.gmra.mxu1 %v4125_v16  ;;  %v1548_v38 = vpack.c.bf16 %v1471_v21, %v1470_v11  ;;  %v4241_v52 = vor.u32 %v4382_v19, %v4240_v32  ;;  %v3930_v16 = vld [vmem:[%s4824_s8 + $0xe0] sm:$0xf0]  ;;  %v4343_v21 = vld [vmem:[%s4824_s8 + $0x21c] sm:$0xf0]  ;;  %v3970_v32 = vld [vmem:[%s4824_s8 + $0x130] sm:$0xf0] }
 0x20d   : > { %2646 = vmatmul.bf16.gmra.mxu2 %v4009_v40  ;;  %2695 = vmatmul.bf16.gmra.mxu3 %v3893_v49  ;;  %v3933_v61 = vor.u32 %v4298_v62, %v3930_v16  ;;  %v4242_v62 = vld [vmem:[%s4824_s8 + $0x358] sm:$0xf0]  ;;  %v4128_v16 = vld [vmem:[%s4824_s8 + $0x248] sm:$0xf] }
 0x20e   : > { %2751 = vmatpush.bf16.msra.mxu0 %v1542_v43  ;;  %2816 = vmatpush.bf16.msra.mxu1 %v1549_v8  ;;  %v4367_v8 = vld [vmem:[%s4824_s8 + $0x2e4] sm:$0xf] }
 0x20f   : > { %v2406_v55 = vpop.f32.mrf.mxu2 }
 0x210   : > { %v6063_v2 = vadd.f32 %v2406_v55, %v5551_v14  ;;  %v2455_v63 = vpop.f32.mrf.mxu3  ;;  %v1540_v14 = vpack.c.bf16 %v1455_v5, %v1454_v12  ;;  %v4205_v55 = vor.u32 %v4367_v8, %v4202_v46 }
 0x211   : > { %v6066_v56 = vadd.f32 %v2455_v63, %v5883_v23  ;;  %v4333_v23 = vld [vmem:[%s4824_s8 + $0x1cc] sm:$0xf0] }
 0x212   : > { %v2509_v18 = vpop.f32.mrf.mxu0  ;;  %2752 = vmatpush.bf16.msra.mxu0 %v1541_v15  ;;  %2817 = vmatpush.bf16.msra.mxu1 %v1548_v38  ;;  %v4049_v6 = vor.u32 %v4333_v23, %v4048_v51  ;;  %v4377_v23 = vld [vmem:[%s4824_s8 + $0x334] sm:$0xf] }
 0x213   : > { %v6072_v31 = vadd.f32 %v2509_v18, %v5939_v13 }
 0x215   : > { %2548 = vmatmul.bf16.gmra.mxu0 %v4241_v52 }
 0x216   : > { %2753 = vmatpush.bf16.msra.mxu0 %v1540_v14 }
 0x217   : > { %v2408_v24 = vpop.f32.mrf.mxu2 }
 0x218   : > { %v6082_v10 = vadd.f32 %v2408_v24, %v5586_v26  ;;  %v2457_v35 = vpop.f32.mrf.mxu3  ;;  %v3856_v26 = vld [vmem:[%s4824_s8 + $0x20] sm:$0xf]  ;;  %v4353_v24 = vld [vmem:[%s4824_s8 + $0x26c] sm:$0xf0] }
 0x219   : > { %v6084_v13 = vadd.f32 %v2457_v35, %v2394_v22  ;;  %v2563_v49 = vpop.f32.mrf.mxu1  ;;  %v4010_v22 = vld [vmem:[%s4824_s8 + $0x180] sm:$0xf0] }
 0x21a   : > { %v2511_v40 = vpop.f32.mrf.mxu0  ;;  %v6090_v3 = vadd.f32 %v2563_v49, %v5947_v47  ;;  %v3857_v47 = vor.u32 %v4284_v39, %v3856_v26 }
 0x21b   : > { %v6087_v25 = vadd.f32 %v2511_v40, %v5967_v45 }
 0x21c   : > { %2602 = vmatmul.bf16.gmra.mxu1 %v4165_v44 }
 0x21d   : > { %2651 = vmatmul.bf16.gmra.mxu2 %v4049_v6  ;;  %2700 = vmatmul.bf16.gmra.mxu3 %v3933_v61  ;;  %v4245_v6 = vor.u32 %v4377_v23, %v4242_v62  ;;  %v4208_v23 = vld [vmem:[%s4824_s8 + $0x2e8] sm:$0xf]  ;;  %v4289_v62 = vld [vmem:[%s4824_s8 + $0x74] sm:$0xf] }
 0x21f   : > { %v2411_v9 = vpop.f32.mrf.mxu2 }
 0x220   : > { %v6095_v36 = vadd.f32 %v2411_v9, %v5627_v58  ;;  %v2460_v45 = vpop.f32.mrf.mxu3  ;;  %v4308_v58 = vld [vmem:[%s4824_s8 + $0x10c] sm:$0xf] }
 0x221   : > { %v6098_v41 = vadd.f32 %v2460_v45, %v5936_v7  ;;  %v2565_v57 = vpop.f32.mrf.mxu1  ;;  %v3973_v15 = vor.u32 %v4308_v58, %v3970_v32  ;;  %v3858_v58 = vld [vmem:[%s4824_s8 + $0x48] sm:$0xf0]  ;;  %v4363_v32 = vld [vmem:[%s4824_s8 + $0x2bc] sm:$0xf0] }
 0x222   : > { %v2514_v53 = vpop.f32.mrf.mxu0  ;;  %v6104_v11 = vadd.f32 %v2565_v57, %v5973_v42  ;;  %v4089_v42 = vor.u32 %v4343_v21, %v4088_v34  ;;  %v4168_v34 = vld [vmem:[%s4824_s8 + $0x298] sm:$0xf]  ;;  %v4279_v21 = vld [vmem:[%s4824_s8 + $0x24] sm:$0xf] }
 0x223   : > { %v6101_v43 = vadd.f32 %v2514_v53, %v5997_v1 }
 0x225   : > { %2754 = vmatmul.bf16.vlgmr.msra.gmra.mxu0 %v3857_v47 }
 0x227   : > { %v2413_v7 = vpop.f32.mrf.mxu2 }
 0x228   : > { %v6113_v19 = vadd.f32 %v2413_v7, %v5644_v30  ;;  %v2462_v50 = vpop.f32.mrf.mxu3  ;;  %v3896_v30 = vld [vmem:[%s4824_s8 + $0x70] sm:$0xf]  ;;  %v4050_v7 = vld [vmem:[%s4824_s8 + $0x1d0] sm:$0xf0] }
 0x229   : > { %v6116_v1 = vadd.f32 %v2462_v50, %v5962_v54  ;;  %v2568_v38 = vpop.f32.mrf.mxu1  ;;  %v4294_v54 = vld [vmem:[%s4824_s8 + $0x94] sm:$0xf0] }
 0x22a   : > { %v2516_v5 = vpop.f32.mrf.mxu0  ;;  %v6122_v52 = vadd.f32 %v2568_v38, %v6006_v37  ;;  %v3897_v37 = vor.u32 %v4294_v54, %v3896_v30 }
 0x22b   : > { %v6119_v63 = vadd.f32 %v2516_v5, %v6037_v33 }
 0x22c   : > { %2607 = vmatmul.bf16.gmra.mxu1 %v4205_v55 }
 0x22d   : > { %2656 = vmatmul.bf16.gmra.mxu2 %v4089_v42  ;;  %2705 = vmatmul.bf16.gmra.mxu3 %v3973_v15  ;;  %v3861_v42 = vor.u32 %v4279_v21, %v3858_v58  ;;  %v4169_v15 = vor.u32 %v4363_v32, %v4168_v34  ;;  %v3938_v34 = vld [vmem:[%s4824_s8 + $0xe8] sm:$0xf0]  ;;  %v4383_v21 = vld [vmem:[%s4824_s8 + $0x35c] sm:$0xf0]  ;;  %v4130_v32 = vld [vmem:[%s4824_s8 + $0x270] sm:$0xf0] }
 0x22e   : > { %v4348_v58 = vld [vmem:[%s4824_s8 + $0x24c] sm:$0xf] }
 0x22f   : > { %v2416_v12 = vpop.f32.mrf.mxu2 }
 0x230   : > { %v6127_v18 = vadd.f32 %v2416_v12, %v5679_v60  ;;  %v2465_v33 = vpop.f32.mrf.mxu3  ;;  %v4318_v60 = vld [vmem:[%s4824_s8 + $0x15c] sm:$0xf] }
 0x231   : > { %v6130_v17 = vadd.f32 %v2465_v33, %v5991_v59  ;;  %v2570_v4 = vpop.f32.mrf.mxu1  ;;  %v4013_v61 = vor.u32 %v4318_v60, %v4010_v22  ;;  %v4338_v60 = vld [vmem:[%s4824_s8 + $0x1fc] sm:$0xf]  ;;  %v4090_v22 = vld [vmem:[%s4824_s8 + $0x220] sm:$0xf0] }
 0x232   : > { %v2519_v14 = vpop.f32.mrf.mxu0  ;;  %v6136_v51 = vadd.f32 %v2570_v4, %v6049_v28  ;;  %v4129_v28 = vor.u32 %v4353_v24, %v4128_v16  ;;  %v3898_v16 = vld [vmem:[%s4824_s8 + $0x98] sm:$0xf0]  ;;  %v4373_v24 = vld [vmem:[%s4824_s8 + $0x30c] sm:$0xf0] }
 0x233   : > { %v6133_v27 = vadd.f32 %v2519_v14, %v6066_v56 }
 0x235   : > { %2759 = vmatmul.bf16.gmra.mxu0 %v3897_v37 }
 0x237   : > { %v2418_v59 = vpop.f32.mrf.mxu2 }
 0x238   : > { %v6145_v35 = vadd.f32 %v2418_v59, %v5712_v48  ;;  %v2467_v44 = vpop.f32.mrf.mxu3  ;;  %v3936_v48 = vld [vmem:[%s4824_s8 + $0xc0] sm:$0xf] }
 0x239   : > { %v6148_v56 = vadd.f32 %v2467_v44, %v6032_v29  ;;  %v2573_v49 = vpop.f32.mrf.mxu1  ;;  %v4304_v29 = vld [vmem:[%s4824_s8 + $0xe4] sm:$0xf0] }
 0x23a   : > { %v2521_v40 = vpop.f32.mrf.mxu0  ;;  %v6154_v39 = vadd.f32 %v2573_v49, %v6072_v31  ;;  %v3937_v31 = vor.u32 %v4304_v29, %v3936_v48  ;;  %v4324_v49 = vld [vmem:[%s4824_s8 + $0x184] sm:$0xf0] }
 0x23b   : > { %v6151_v26 = vadd.f32 %v2521_v40, %v6084_v13 }
 0x23c   : > { %2612 = vmatmul.bf16.gmra.mxu1 %v4245_v6  ;;  %v4209_v6 = vor.u32 %v4373_v24, %v4208_v23  ;;  %v4170_v23 = vld [vmem:[%s4824_s8 + $0x2c0] sm:$0xf0] }
 0x23d   : > { %2661 = vmatmul.bf16.gmra.mxu2 %v4129_v28  ;;  %2710 = vmatmul.bf16.gmra.mxu3 %v4013_v61  ;;  %v4093_v28 = vor.u32 %v4338_v60, %v4090_v22 }
 0x23f   : > { %v2421_v9 = vpop.f32.mrf.mxu2 }
 0x240   : > { %v6159_v45 = vadd.f32 %v2421_v9, %v5751_v20  ;;  %v2470_v13 = vpop.f32.mrf.mxu3  ;;  %v4328_v20 = vld [vmem:[%s4824_s8 + $0x1ac] sm:$0xf] }
 0x241   : > { %v6162_v47 = vadd.f32 %v2470_v13, %v6063_v2  ;;  %v2575_v57 = vpop.f32.mrf.mxu1 }
 0x242   : > { %v2524_v53 = vpop.f32.mrf.mxu0  ;;  %v6168_v46 = vadd.f32 %v2575_v57, %v6087_v25  ;;  %v4053_v25 = vor.u32 %v4328_v20, %v4050_v7  ;;  %v4299_v57 = vld [vmem:[%s4824_s8 + $0xc4] sm:$0xf] }
 0x243   : > { %v6165_v8 = vadd.f32 %v2524_v53, %v6098_v41  ;;  %v4248_v53 = vld [vmem:[%s4824_s8 + $0x338] sm:$0xf]  ;;  %v3941_v7 = vor.u32 %v4299_v57, %v3938_v34 }
 0x245   : > { %2764 = vmatmul.bf16.gmra.mxu0 %v3937_v31 }
 0x247   : > { %v2423_v50 = vpop.f32.mrf.mxu2 }
 0x248   : > { %v6177_v2 = vadd.f32 %v2423_v50, %v5783_v0  ;;  %v2472_v55 = vpop.f32.mrf.mxu3  ;;  %v3976_v0 = vld [vmem:[%s4824_s8 + $0x110] sm:$0xf]  ;;  %v4249_v50 = vor.u32 %v4383_v21, %v4248_v53 }
 0x249   : > { %v2473_v41 = vadd.f32 %v2472_v55, %v6082_v10  ;;  %v2578_v38 = vpop.f32.mrf.mxu1  ;;  %v4314_v10 = vld [vmem:[%s4824_s8 + $0x134] sm:$0xf0]  ;;  %v4133_v55 = vor.u32 %v4348_v58, %v4130_v32 }
 0x24a   : > { %v2526_v5 = vpop.f32.mrf.mxu0  ;;  %v6184_v54 = vadd.f32 %v2578_v38, %v6101_v43  ;;  %v3977_v37 = vor.u32 %v4314_v10, %v3976_v0 }
 0x24b   : > { %v6181_v30 = vadd.f32 %v2526_v5, %v6116_v1  ;;  %v4334_v5 = vld [vmem:[%s4824_s8 + $0x1d4] sm:$0xf0] }
 0x24c   : > { %4262 = vmatmul.msk.bf16.vlgmr.msra.gmra.mxu1 %vm2200_vm0, %v3861_v42 }
 0x24d   : > { %2666 = vmatmul.bf16.gmra.mxu2 %v4169_v15  ;;  %2715 = vmatmul.bf16.gmra.mxu3 %v4053_v25  ;;  %v4056_v25 = vld [vmem:[%s4824_s8 + $0x1b0] sm:$0xf] }
 0x24e   : > { %v4057_v0 = vor.u32 %v4334_v5, %v4056_v25 }
 0x250   : > { %v2475_v12 = vpop.f32.mrf.mxu3 }
 0x251   : > { %v2476_v33 = vadd.f32 %v2475_v12, %v6095_v36  ;;  %v2580_v14 = vpop.f32.mrf.mxu1  ;;  %v3901_v36 = vor.u32 %v4289_v62, %v3898_v16 }
 0x252   : > { %v2529_v1 = vpop.f32.mrf.mxu0  ;;  %v6194_v43 = vadd.f32 %v2580_v14, %v6119_v63  ;;  %v4358_v14 = vld [vmem:[%s4824_s8 + $0x29c] sm:$0xf] }
 0x253   : > { %v6191_v4 = vadd.f32 %v2529_v1, %v6130_v17  ;;  %v3978_v1 = vld [vmem:[%s4824_s8 + $0x138] sm:$0xf0] }
 0x255   : > { %2769 = vmatmul.bf16.gmra.mxu0 %v3977_v37 }
 0x258   : > { %v2477_v59 = vpop.f32.mrf.mxu3 }
 0x259   : > { %v2478_v44 = vadd.f32 %v2477_v59, %v6113_v19  ;;  %v2583_v61 = vpop.f32.mrf.mxu1  ;;  %v4016_v19 = vld [vmem:[%s4824_s8 + $0x160] sm:$0xf] }
 0x25a   : > { %v2531_v17 = vpop.f32.mrf.mxu0  ;;  %v6207_v40 = vadd.f32 %v2583_v61, %v6133_v27  ;;  %v4017_v9 = vor.u32 %v4324_v49, %v4016_v19  ;;  %v4096_v59 = vld [vmem:[%s4824_s8 + $0x200] sm:$0xf]  ;;  %v4319_v19 = vld [vmem:[%s4824_s8 + $0x164] sm:$0xf]  ;;  %v4368_v49 = vld [vmem:[%s4824_s8 + $0x2ec] sm:$0xf] }
 0x25b   : > { %v6204_v63 = vadd.f32 %v2531_v17, %v6148_v56 }
 0x25c   : > { %4263 = vmatmul.msk.bf16.gmra.mxu1 %vm2200_vm0, %v3901_v36  ;;  %v4344_v36 = vld [vmem:[%s4824_s8 + $0x224] sm:$0xf0] }
 0x25d   : > { %2671 = vmatmul.bf16.gmra.mxu2 %v4209_v6  ;;  %2720 = vmatmul.bf16.gmra.mxu3 %v4093_v28  ;;  %v4097_v6 = vor.u32 %v4344_v36, %v4096_v59  ;;  %v4216_v59 = vld [vmem:[%s4824_s8 + $0x2f0] sm:$0xf]  ;;  %v4374_v36 = vld [vmem:[%s4824_s8 + $0x314] sm:$0xf0] }
 0x260   : > { %v2480_v48 = vpop.f32.mrf.mxu3 }
 0x261   : > { %v2481_v29 = vadd.f32 %v2480_v48, %v6127_v18  ;;  %v2585_v13 = vpop.f32.mrf.mxu1 }
 0x262   : > { %v2534_v56 = vpop.f32.mrf.mxu0  ;;  %v6215_v27 = vadd.f32 %v2585_v13, %v6151_v26 }
 0x263   : > { %v2535_v31 = vadd.f32 %v2534_v56, %v6162_v47 }
 0x265   : > { %2774 = vmatmul.bf16.gmra.mxu0 %v4017_v9 }
 0x268   : > { %v2482_v20 = vpop.f32.mrf.mxu3 }
 0x269   : > { %v2483_v18 = vadd.f32 %v2482_v20, %v6145_v35  ;;  %v2588_v47 = vpop.f32.mrf.mxu1 }
 0x26a   : > { %v2536_v42 = vpop.f32.mrf.mxu0  ;;  %v6225_v15 = vadd.f32 %v2588_v47, %v6165_v8  ;;  %v4309_v8 = vld [vmem:[%s4824_s8 + $0x114] sm:$0xf] }
 0x26b   : > { %v2537_v26 = vadd.f32 %v2536_v42, %v2473_v41  ;;  %v3981_v16 = vor.u32 %v4309_v8, %v3978_v1 }
 0x26c   : > { %4264 = vmatmul.msk.bf16.gmra.mxu1 %vm2200_vm0, %v3941_v7  ;;  %v4329_v7 = vld [vmem:[%s4824_s8 + $0x1b4] sm:$0xf] }
 0x26d   : > { %2676 = vmatmul.bf16.gmra.mxu2 %v4249_v50  ;;  %2725 = vmatmul.bf16.gmra.mxu3 %v4133_v55  ;;  %v4058_v50 = vld [vmem:[%s4824_s8 + $0x1d8] sm:$0xf0] }
 0x26e   : > { %v4378_v55 = vld [vmem:[%s4824_s8 + $0x33c] sm:$0xf] }
 0x270   : > { %v2485_v38 = vpop.f32.mrf.mxu3 }
 0x271   : > { %v2486_v35 = vadd.f32 %v2485_v38, %v6159_v45  ;;  %v2590_v12 = vpop.f32.mrf.mxu1  ;;  %v4173_v45 = vor.u32 %v4358_v14, %v4170_v23  ;;  %v4339_v23 = vld [vmem:[%s4824_s8 + $0x204] sm:$0xf] }
 0x272   : > { %v2539_v10 = vpop.f32.mrf.mxu0  ;;  %v6232_v41 = vadd.f32 %v2590_v12, %v6181_v30 }
 0x273   : > { %v2540_v37 = vadd.f32 %v2539_v10, %v2476_v33  ;;  %v4364_v10 = vld [vmem:[%s4824_s8 + $0x2c4] sm:$0xf0] }
 0x275   : > { %2779 = vmatmul.bf16.gmra.mxu0 %v4057_v0  ;;  %v2627_v0 = vpop.f32.mrf.mxu2 }
 0x278   : > { %v2487_v62 = vpop.f32.mrf.mxu3 }
 0x279   : > { %v2488_v24 = vadd.f32 %v2487_v62, %v6177_v2  ;;  %v2593_v33 = vpop.f32.mrf.mxu1  ;;  %v4098_v62 = vld [vmem:[%s4824_s8 + $0x228] sm:$0xf0] }
 0x27a   : > { %v2541_v60 = vpop.f32.mrf.mxu0  ;;  %v6240_v22 = vadd.f32 %v2593_v33, %v6191_v4  ;;  %v4210_v4 = vld [vmem:[%s4824_s8 + $0x310] sm:$0xf0] }
 0x27b   : > { %v2542_v30 = vadd.f32 %v2541_v60, %v2478_v44  ;;  %v4018_v44 = vld [vmem:[%s4824_s8 + $0x188] sm:$0xf0]  ;;  %v4213_v9 = vor.u32 %v4368_v49, %v4210_v4  ;;  %v4349_v49 = vld [vmem:[%s4824_s8 + $0x254] sm:$0xf]  ;;  %v4138_v4 = vld [vmem:[%s4824_s8 + $0x278] sm:$0xf0] }
 0x27c   : > { %4265 = vmatmul.msk.bf16.gmra.mxu1 %vm2200_vm0, %v3981_v16  ;;  %v4021_v48 = vor.u32 %v4319_v19, %v4018_v44 }
 0x27d   : > { %2730 = vmatmul.bf16.gmra.mxu3 %v4173_v45  ;;  %v2629_v16 = vpop.f32.mrf.mxu2 }
 0x281   : > { %v2595_v17 = vpop.f32.mrf.mxu1 }
 0x282   : > { %v2544_v28 = vpop.f32.mrf.mxu0  ;;  %v6246_v61 = vadd.f32 %v2595_v17, %v6204_v63  ;;  %v4136_v63 = vld [vmem:[%s4824_s8 + $0x250] sm:$0xf] }
 0x283   : > { %v2545_v2 = vadd.f32 %v2544_v28, %v2481_v29  ;;  %v4354_v29 = vld [vmem:[%s4824_s8 + $0x274] sm:$0xf0] }
 0x284   : > { %v4137_v34 = vor.u32 %v4354_v29, %v4136_v63  ;;  %v4256_v29 = vld [vmem:[%s4824_s8 + $0x340] sm:$0xf] }
 0x285   : > { %2784 = vmatmul.bf16.gmra.mxu0 %v4097_v6  ;;  %v2632_v6 = vpop.f32.mrf.mxu2 }
 0x289   : > { %v2598_v13 = vpop.f32.mrf.mxu1 }
 0x28a   : > { %v2546_v56 = vpop.f32.mrf.mxu0  ;;  %v6252_v57 = vadd.f32 %v2598_v13, %v2535_v31  ;;  %v4061_v31 = vor.u32 %v4329_v7, %v4058_v50  ;;  %v2628_v50 = vadd.f32 %v2627_v0, %v6090_v3 }
 0x28b   : > { %v2547_v53 = vadd.f32 %v2546_v56, %v2483_v18  ;;  %v4250_v18 = vld [vmem:[%s4824_s8 + $0x360] sm:$0xf0] }
 0x28c   : > { %4266 = vmatmul.msk.bf16.gmra.mxu1 %vm2200_vm0, %v4021_v48  ;;  %v4253_v42 = vor.u32 %v4378_v55, %v4250_v18  ;;  %v4141_v48 = vor.u32 %v4349_v49, %v4138_v4  ;;  %v4359_v55 = vld [vmem:[%s4824_s8 + $0x2a4] sm:$0xf]  ;;  %v4178_v18 = vld [vmem:[%s4824_s8 + $0x2c8] sm:$0xf0] }
 0x28d   : > { %2735 = vmatmul.bf16.gmra.mxu3 %v4213_v9 }
 0x291   : > { %v2600_v58 = vpop.f32.mrf.mxu1 }
 0x292   : > { %v2549_v21 = vpop.f32.mrf.mxu0  ;;  %v6257_v20 = vadd.f32 %v2600_v58, %v2537_v26  ;;  %v2691_v26 = vpop.f32.mrf.mxu3 }
 0x293   : > { %v2550_v32 = vadd.f32 %v2549_v21, %v2486_v35  ;;  %v4176_v35 = vld [vmem:[%s4824_s8 + $0x2a0] sm:$0xf] }
 0x294   : > { %v4177_v12 = vor.u32 %v4364_v10, %v4176_v35 }
 0x295   : > { %2789 = vmatmul.bf16.gmra.mxu0 %v4137_v34  ;;  %v4384_v34 = vld [vmem:[%s4824_s8 + $0x364] sm:$0xf0] }
 0x296   : > { %v4257_v21 = vor.u32 %v4384_v34, %v4256_v29 }
 0x299   : > { %v2603_v25 = vpop.f32.mrf.mxu1 }
 0x29a   : > { %v2551_v47 = vpop.f32.mrf.mxu0  ;;  %v6263_v38 = vadd.f32 %v2603_v25, %v2540_v37  ;;  %v2693_v37 = vpop.f32.mrf.mxu3 }
 0x29b   : > { %v2552_v5 = vadd.f32 %v2551_v47, %v2488_v24  ;;  %v4101_v24 = vor.u32 %v4339_v23, %v4098_v62  ;;  %v4181_v47 = vor.u32 %v4359_v55, %v4178_v18 }
 0x29c   : > { %4267 = vmatmul.msk.bf16.gmra.mxu1 %vm2200_vm0, %v4061_v31 }
 0x29d   : > { %2740 = vmatmul.bf16.gmra.mxu3 %v4253_v42  ;;  %v2692_v42 = vadd.f32 %v2691_v26, %v2628_v50 }
 0x2a1   : > { %v2605_v8 = vpop.f32.mrf.mxu1 }
 0x2a2   : > { %v2755_v1 = vpop.f32.mrf.mxu0  ;;  %v6268_v14 = vadd.f32 %v2605_v8, %v2542_v30  ;;  %v4217_v30 = vor.u32 %v4374_v36, %v4216_v59  ;;  %v2696_v28 = vpop.f32.mrf.mxu3  ;;  %v4369_v59 = vld [vmem:[%s4824_s8 + $0x2f4] sm:$0xf]  ;;  %v4218_v36 = vld [vmem:[%s4824_s8 + $0x318] sm:$0xf0] }
 0x2a3   : > { %v2756_v25 = vadd.f32 %v2755_v1, %v2692_v42 }
 0x2a5   : > { %2794 = vmatmul.bf16.gmra.mxu0 %v4177_v12 }
 0x2a9   : > { %v2608_v45 = vpop.f32.mrf.mxu1 }
 0x2aa   : > { %v2757_v60 = vpop.f32.mrf.mxu0  ;;  %v6272_v33 = vadd.f32 %v2608_v45, %v2545_v2  ;;  %v2634_v2 = vpop.f32.mrf.mxu2  ;;  %v2633_v45 = vadd.f32 %v2632_v6, %v6122_v52 }
 0x2ab   : > { %v2698_v13 = vpop.f32.mrf.mxu3  ;;  %v2635_v6 = vadd.f32 %v2634_v2, %v6136_v51 }
 0x2ac   : > { %4268 = vmatmul.msk.bf16.gmra.mxu1 %vm2200_vm0, %v4101_v24 }
 0x2b1   : > { %v2610_v17 = vpop.f32.mrf.mxu1 }
 0x2b2   : > { %v6277_v19 = vadd.f32 %v2610_v17, %v2547_v53  ;;  %v2760_v44 = vpop.f32.mrf.mxu0  ;;  %v2637_v7 = vpop.f32.mrf.mxu2 }
 0x2b3   : > { %v2701_v31 = vpop.f32.mrf.mxu3  ;;  %v2638_v51 = vadd.f32 %v2637_v7, %v6154_v39 }
 0x2b5   : > { %2799 = vmatmul.bf16.gmra.mxu0 %v4217_v30  ;;  %v4221_v30 = vor.u32 %v4369_v59, %v4218_v36 }
 0x2b9   : > { %v2613_v9 = vpop.f32.mrf.mxu1 }
 0x2ba   : > { %v6281_v56 = vadd.f32 %v2613_v9, %v2550_v32  ;;  %v2762_v63 = vpop.f32.mrf.mxu0  ;;  %v2639_v0 = vpop.f32.mrf.mxu2 }
 0x2bb   : > { %v2703_v26 = vpop.f32.mrf.mxu3  ;;  %v2640_v39 = vadd.f32 %v2639_v0, %v6168_v46 }
 0x2bc   : > { %4269 = vmatmul.msk.bf16.gmra.mxu1 %vm2200_vm0, %v4141_v48 }
 0x2c1   : > { %v2615_v53 = vpop.f32.mrf.mxu1 }
 0x2c2   : > { %v6286_v58 = vadd.f32 %v2615_v53, %v2552_v5  ;;  %v2765_v32 = vpop.f32.mrf.mxu0  ;;  %v2630_v5 = vadd.f32 %v2629_v16, %v6104_v11 }
 0x2c3   : > { %v2706_v4 = vpop.f32.mrf.mxu3 }
 0x2c4   : > { %v2694_v12 = vadd.f32 %v2693_v37, %v2630_v5  ;;  %v2697_v37 = vadd.f32 %v2696_v28, %v2633_v45  ;;  %v2704_v45 = vadd.f32 %v2703_v26, %v2640_v39 }
 0x2c5   : > { %2804 = vmatmul.bf16.gmra.mxu0 %v4257_v21 }
 0x2c6   : > { %v2758_v8 = vadd.f32 %v2757_v60, %v2694_v12  ;;  %v2642_v60 = vpop.f32.mrf.mxu2  ;;  %v2761_v17 = vadd.f32 %v2760_v44, %v2697_v37  ;;  %v2699_v44 = vadd.f32 %v2698_v13, %v2635_v6  ;;  %v2702_v13 = vadd.f32 %v2701_v31, %v2638_v51 }
 0x2c7   : > { %v2643_v0 = vadd.f32 %v2642_v60, %v6184_v54 }
 0x2c8   : > { %v2763_v34 = vadd.f32 %v2762_v63, %v2699_v44  ;;  %v6348_v44 = vpop.permute.xlu0 %3581 }
 0x2c9   : > { %v2819_v35 = vpop.f32.mrf.mxu1 }
 0x2ca   : > { %v6291_v10 = vadd.f32 %v2819_v35, %v2756_v25  ;;  %v2767_v23 = vpop.f32.mrf.mxu0  ;;  %v4258_v25 = vld [vmem:[%s4824_s8 + $0x368] sm:$0xf0] }
 0x2cb   : > { %v2708_v18 = vpop.f32.mrf.mxu3  ;;  %v2768_v59 = vadd.f32 %v2767_v23, %v2704_v45 }
 0x2cc   : > { %4270 = vmatmul.msk.bf16.gmra.mxu1 %vm2200_vm0, %v4181_v47  ;;  %v2875_v3 = vsel %vm2874_vm1, %v6291_v10, 0.0  ;;  %v2941_v1 = vmul.f32 %v6291_v10, %v6291_v10  ;;  %v4379_v47 = vld [vmem:[%s4824_s8 + $0x344] sm:$0xf] }
 0x2cd   : > { %2876 = vadd.xlane.f32.xlu0 %v2875_v3  ;;  %v4261_v5 = vor.u32 %v4379_v47, %v4258_v25  ;;  %v2766_v3 = vadd.f32 %v2765_v32, %v2702_v13 }
 0x2ce   : > { %v2963_v16 = vsel %vm2874_vm1, %v2941_v1, 0.0  ;;  %v2644_v53 = vpop.f32.mrf.mxu2 }
 0x2cf   : > { %v2645_v54 = vadd.f32 %v2644_v53, %v6194_v43 }
 0x2d1   : > { %v2821_v62 = vpop.f32.mrf.mxu1 }
 0x2d2   : > { %v6299_v24 = vadd.f32 %v2821_v62, %v2758_v8  ;;  %v2770_v52 = vpop.f32.mrf.mxu0 }
 0x2d3   : > { %v2711_v31 = vpop.f32.mrf.mxu3 }
 0x2d4   : > { %v2878_v11 = vsel %vm2874_vm1, %v6299_v24, 0.0  ;;  %v2942_v49 = vmul.f32 %v6299_v24, %v6299_v24 }
 0x2d5   : > { %2879 = vadd.xlane.f32.xlu1 %v2878_v11  ;;  %2964 = vadd.xlane.f32.xlu0 %v2963_v16 }
 0x2d6   : > { %v2966_v29 = vsel %vm2874_vm1, %v2942_v49, 0.0  ;;  %v2647_v1 = vpop.f32.mrf.mxu2 }
 0x2d7   : > { %v2648_v43 = vadd.f32 %v2647_v1, %v6207_v40 }
 0x2d9   : > { %v2824_v48 = vpop.f32.mrf.mxu1  ;;  %v2712_v25 = vadd.f32 %v2711_v31, %v2648_v43 }
 0x2da   : > { %v6309_v9 = vadd.f32 %v2824_v48, %v2761_v17  ;;  %v2772_v35 = vpop.f32.mrf.mxu0  ;;  %v2707_v17 = vadd.f32 %v2706_v4, %v2643_v0  ;;  %v2709_v4 = vadd.f32 %v2708_v18, %v2645_v54  ;;  %v6361_v18 = vpop.permute.xlu0 %3596 }
 0x2db   : > { %v2713_v48 = vpop.f32.mrf.mxu3  ;;  %v6380_v0 = vpop.permute.xlu2 %3586 }
 0x2dc   : > { %4271 = vmatmul.msk.bf16.gmra.mxu1 %vm2200_vm0, %v4221_v30  ;;  %v2881_v28 = vsel %vm2874_vm1, %v6309_v9, 0.0  ;;  %v2943_v21 = vmul.f32 %v6309_v9, %v6309_v9  ;;  %v2771_v6 = vadd.f32 %v2770_v52, %v2707_v17  ;;  %v2773_v52 = vadd.f32 %v2772_v35, %v2709_v4 }
 0x2dd   : > { %2882 = vadd.xlane.f32.xlu2 %v2881_v28  ;;  %2967 = vadd.xlane.f32.xlu1 %v2966_v29 }
 0x2de   : > { %v2969_v2 = vsel %vm2874_vm1, %v2943_v21, 0.0  ;;  %v2649_v30 = vpop.f32.mrf.mxu2 }
 0x2df   : > { %v2650_v40 = vadd.f32 %v2649_v30, %v6215_v27 }
 0x2e1   : > { %v2826_v50 = vpop.f32.mrf.mxu1  ;;  %v2714_v31 = vadd.f32 %v2713_v48, %v2650_v40 }
 0x2e2   : > { %v6318_v55 = vadd.f32 %v2826_v50, %v2763_v34  ;;  %v2775_v16 = vpop.f32.mrf.mxu0 }
 0x2e3   : > { %v2716_v51 = vpop.f32.mrf.mxu3  ;;  %v2776_v35 = vadd.f32 %v2775_v16, %v2712_v25 }
 0x2e4   : > { %v2944_v42 = vmul.f32 %v6318_v55, %v6318_v55  ;;  %v2884_v7 = vsel %vm2874_vm1, %v6318_v55, 0.0 }
 0x2e5   : > { %2970 = vadd.xlane.f32.xlu2 %v2969_v2 }
 0x2e6   : > { %v2972_v63 = vsel %vm2874_vm1, %v2944_v42, 0.0  ;;  %v2652_v50 = vpop.f32.mrf.mxu2 }
 0x2e7   : > { %2973 = vadd.xlane.f32.xlu0 %v2972_v63 }
 0x2e9   : > { %v2829_v12 = vpop.f32.mrf.mxu1 }
 0x2ea   : > { %v6327_v8 = vadd.f32 %v2829_v12, %v2766_v3  ;;  %v2777_v23 = vpop.f32.mrf.mxu0 }
 0x2eb   : > { %v2718_v39 = vpop.f32.mrf.mxu3  ;;  %v2778_v16 = vadd.f32 %v2777_v23, %v2714_v31 }
 0x2ec   : > { %4272 = vmatmul.msk.bf16.gmra.mxu1 %vm2200_vm0, %v4261_v5  ;;  %v2945_v62 = vmul.f32 %v6327_v8, %v6327_v8  ;;  %v2887_v32 = vsel %vm2874_vm1, %v6327_v8, 0.0 }
 0x2ed   : > { %2885 = vadd.xlane.f32.xlu2 %v2884_v7 }
 0x2ee   : > { %v2975_v11 = vsel %vm2874_vm1, %v2945_v62, 0.0  ;;  %v2654_v5 = vpop.f32.mrf.mxu2  ;;  %v6371_v62 = vpop.permute.xlu1 %3591 }
 0x2ef   : > { %2976 = vadd.xlane.f32.xlu1 %v2975_v11  ;;  %2888 = vadd.xlane.f32.xlu0 %v2887_v32  ;;  %v6376_v32 = vpop.permute.xlu0 %3611  ;;  %v2655_v4 = vadd.f32 %v2654_v5, %v6232_v41 }
 0x2f0   : > { %7033 = vst [vmem:[#allocation4_spill] sm:$0xff] %v6376_v32  ;;  %v3385_v32 = vld [vmem:[%s6512_s7 + $0x20] sm:$0xff] }
 0x2f1   : > { %v2831_v36 = vpop.f32.mrf.mxu1 }
 0x2f2   : > { %v6338_v46 = vadd.f32 %v2831_v36, %v2768_v59  ;;  %v2780_v47 = vpop.f32.mrf.mxu0 }
 0x2f3   : > { %v2721_v17 = vpop.f32.mrf.mxu3 }
 0x2f4   : > { %v2946_v37 = vmul.f32 %v6338_v46, %v6338_v46  ;;  %v2890_v49 = vsel %vm2874_vm1, %v6338_v46, 0.0 }
 0x2f6   : > { %v2978_v26 = vsel %vm2874_vm1, %v2946_v37, 0.0  ;;  %v2657_v27 = vpop.f32.mrf.mxu2  ;;  %v2653_v37 = vadd.f32 %v2652_v50, %v6225_v15  ;;  %v6388_v23 = vpop.permute.xlu1 %3606 }
 0x2f7   : > { %2979 = vadd.xlane.f32.xlu2 %v2978_v26  ;;  %2891 = vadd.xlane.f32.xlu1 %v2890_v49  ;;  %v6397_v50 = vpop.permute.xlu2 %3601 }
 0x2f8   : > { %v2717_v26 = vadd.f32 %v2716_v51, %v2653_v37 }
 0x2f9   : > { %v2834_v28 = vpop.f32.mrf.mxu1 }
 0x2fa   : > { %v6346_v29 = vadd.f32 %v2834_v28, %v2771_v6  ;;  %v2782_v7 = vpop.f32.mrf.mxu0  ;;  %v2781_v28 = vadd.f32 %v2780_v47, %v2717_v26 }
 0x2fb   : > { %v2723_v47 = vpop.f32.mrf.mxu3 }
 0x2fc   : > { %7031 = vst [vmem:[#allocation2_spill] sm:$0xff] %v6346_v29  ;;  %v2947_v60 = vmul.f32 %v6346_v29, %v6346_v29  ;;  %v2893_v34 = vsel %vm2874_vm1, %v6346_v29, 0.0  ;;  %v3384_v29 = vld [vmem:[%s6512_s7 + $0x18] sm:$0xff] }
 0x2fe   : > { %v2981_v21 = vsel %vm2874_vm1, %v2947_v60, 0.0  ;;  %v6390_v60 = vpop.permute.xlu0 %3626 }
 0x2ff   : > { %2894 = vadd.xlane.f32.xlu2 %v2893_v34  ;;  %2982 = vadd.xlane.f32.xlu0 %v2981_v21  ;;  %7035 = vst [vmem:[#allocation6_spill] sm:$0xff] %v6390_v60  ;;  %v2659_v21 = vpop.f32.mrf.mxu2 }
 0x301   : > { %v2836_v2 = vpop.f32.mrf.mxu1 }
 0x302   : > { %v6356_v42 = vadd.f32 %v2836_v2, %v2773_v52  ;;  %v2785_v6 = vpop.f32.mrf.mxu0  ;;  %v2719_v52 = vadd.f32 %v2718_v39, %v2655_v4 }
 0x304   : > { %7032 = vst [vmem:[#allocation3_spill] sm:$0xff] %v6356_v42  ;;  %v2948_v53 = vmul.f32 %v6356_v42, %v6356_v42  ;;  %v2896_v63 = vsel %vm2874_vm1, %v6356_v42, 0.0  ;;  %v2783_v43 = vadd.f32 %v2782_v7, %v2719_v52  ;;  %v6414_v7 = vpop.permute.xlu2 %3616 }
 0x305   : > { %7038 = vst [vmem:[#allocation9_spill] sm:$0xff] %v6414_v7 }
 0x306   : > { %v2984_v13 = vsel %vm2874_vm1, %v2948_v53, 0.0 }
 0x307   : > { %2985 = vadd.xlane.f32.xlu1 %v2984_v13  ;;  %2897 = vadd.xlane.f32.xlu0 %v2896_v63  ;;  %v6402_v13 = vpop.permute.xlu1 %3621  ;;  %v6406_v63 = vpop.permute.xlu0 %3641 }
 0x308   : > { %7037 = vst [vmem:[#allocation8_spill] sm:$0xff] %v6406_v63 }
 0x309   : > { %v2839_v3 = vpop.f32.mrf.mxu1 }
 0x30a   : > { %v6366_v12 = vadd.f32 %v2839_v3, %v2776_v35  ;;  %v2787_v53 = vpop.f32.mrf.mxu0  ;;  %v2658_v35 = vadd.f32 %v2657_v27, %v6240_v22  ;;  %v2660_v27 = vadd.f32 %v2659_v21, %v6246_v61 }
 0x30c   : > { %v2949_v1 = vmul.f32 %v6366_v12, %v6366_v12  ;;  %v2899_v11 = vsel %vm2874_vm1, %v6366_v12, 0.0  ;;  %v2722_v3 = vadd.f32 %v2721_v17, %v2658_v35  ;;  %v2724_v17 = vadd.f32 %v2723_v47, %v2660_v27  ;;  %v6430_v4 = vpop.permute.xlu2 %3631 }
 0x30d   : > { %7043 = vst [vmem:[#allocation14_spill] sm:$0xff] %v6430_v4 }
 0x30e   : > { %v2987_v45 = vsel %vm2874_vm1, %v2949_v1, 0.0  ;;  %v2662_v1 = vpop.f32.mrf.mxu2  ;;  %v2786_v31 = vadd.f32 %v2785_v6, %v2722_v3 }
 0x30f   : > { %2988 = vadd.xlane.f32.xlu2 %v2987_v45  ;;  %2900 = vadd.xlane.f32.xlu1 %v2899_v11  ;;  %v2726_v45 = vpop.f32.mrf.mxu3 }
 0x311   : > { %v2841_v59 = vpop.f32.mrf.mxu1 }
 0x312   : > { %v6378_v36 = vadd.f32 %v2841_v59, %v2778_v16  ;;  %v2790_v22 = vpop.f32.mrf.mxu0  ;;  %v6418_v59 = vpop.permute.xlu1 %3636 }
 0x313   : > { %7040 = vst [vmem:[#allocation11_spill] sm:$0xff] %v6418_v59 }
 0x314   : > { %7034 = vst [vmem:[#allocation5_spill] sm:$0xff] %v6378_v36  ;;  %v2950_v30 = vmul.f32 %v6378_v36, %v6378_v36  ;;  %v2902_v49 = vsel %vm2874_vm1, %v6378_v36, 0.0 }
 0x316   : > { %v2990_v48 = vsel %vm2874_vm1, %v2950_v30, 0.0  ;;  %v6423_v30 = vpop.permute.xlu0 %3656  ;;  %v2664_v6 = vpop.f32.mrf.mxu2 }
 0x317   : > { %2903 = vadd.xlane.f32.xlu2 %v2902_v49  ;;  %2991 = vadd.xlane.f32.xlu0 %v2990_v48  ;;  %7041 = vst [vmem:[#allocation12_spill] sm:$0xff] %v6423_v30  ;;  %v2788_v48 = vadd.f32 %v2787_v53, %v2724_v17  ;;  %v2728_v61 = vpop.f32.mrf.mxu3  ;;  %v2665_v3 = vadd.f32 %v2664_v6, %v6257_v20 }
 0x319   : > { %v2844_v54 = vpop.f32.mrf.mxu1 }
 0x31a   : > { %v6392_v15 = vadd.f32 %v2844_v54, %v2781_v28  ;;  %v2792_v52 = vpop.f32.mrf.mxu0 }
 0x31c   : > { %7036 = vst [vmem:[#allocation7_spill] sm:$0xff] %v6392_v15  ;;  %v2951_v34 = vmul.f32 %v6392_v15, %v6392_v15  ;;  %v2905_v2 = vsel %vm2874_vm1, %v6392_v15, 0.0 }
 0x31e   : > { %v2993_v51 = vsel %vm2874_vm1, %v2951_v34, 0.0  ;;  %v2663_v34 = vadd.f32 %v2662_v1, %v6252_v57  ;;  %v6440_v53 = vpop.permute.xlu0 %3671  ;;  %v2667_v57 = vpop.f32.mrf.mxu2 }
 0x31f   : > { %2994 = vadd.xlane.f32.xlu1 %v2993_v51  ;;  %2906 = vadd.xlane.f32.xlu0 %v2905_v2  ;;  %v6435_v51 = vpop.permute.xlu1 %3651  ;;  %7045 = vst [vmem:[#allocation16_spill] sm:$0xff] %v6440_v53  ;;  %v2731_v1 = vpop.f32.mrf.mxu3 }
 0x320   : > { %7044 = vst [vmem:[#allocation15_spill] sm:$0xff] %v6435_v51  ;;  %v2727_v2 = vadd.f32 %v2726_v45, %v2663_v34 }
 0x321   : > { %v2846_v25 = vpop.f32.mrf.mxu1 }
 0x322   : > { %v6404_v41 = vadd.f32 %v2846_v25, %v2783_v43  ;;  %v2791_v25 = vadd.f32 %v2790_v22, %v2727_v2  ;;  %v2795_v27 = vpop.f32.mrf.mxu0 }
 0x324   : > { %v2952_v5 = vmul.f32 %v6404_v41, %v6404_v41  ;;  %v2908_v40 = vsel %vm2874_vm1, %v6404_v41, 0.0 }
 0x326   : > { %v2996_v39 = vsel %vm2874_vm1, %v2952_v5, 0.0  ;;  %v2669_v6 = vpop.f32.mrf.mxu2 }
 0x327   : > { %2997 = vadd.xlane.f32.xlu2 %v2996_v39  ;;  %2909 = vadd.xlane.f32.xlu1 %v2908_v40  ;;  %v6447_v40 = vpop.permute.xlu2 %3646  ;;  %v6452_v22 = vpop.permute.xlu1 %3666 }
 0x328   : > { %7047 = vst [vmem:[#allocation18_spill] sm:$0xff] %v6447_v40 }
 0x329   : > { %v2849_v11 = vpop.f32.mrf.mxu1  ;;  %7048 = vst [vmem:[#allocation19_spill] sm:$0xff] %v6452_v22 }
 0x32a   : > { %v6416_v16 = vadd.f32 %v2849_v11, %v2786_v31  ;;  %v2729_v31 = vadd.f32 %v2728_v61, %v2665_v3 }
 0x32c   : > { %7039 = vst [vmem:[#allocation10_spill] sm:$0xff] %v6416_v16  ;;  %v2953_v37 = vmul.f32 %v6416_v16, %v6416_v16  ;;  %v2911_v26 = vsel %vm2874_vm1, %v6416_v16, 0.0 }
 0x32e   : > { %v2999_v49 = vsel %vm2874_vm1, %v2953_v37, 0.0  ;;  %v2793_v37 = vadd.f32 %v2792_v52, %v2729_v31  ;;  %v2733_v52 = vpop.f32.mrf.mxu3  ;;  %v2670_v31 = vadd.f32 %v2669_v6, %v6268_v14 }
 0x32f   : > { %2912 = vadd.xlane.f32.xlu2 %v2911_v26  ;;  %3000 = vadd.xlane.f32.xlu0 %v2999_v49  ;;  %v2668_v49 = vadd.f32 %v2667_v57, %v6263_v38  ;;  %v6464_v2 = vpop.permute.xlu2 %3661 }
 0x330   : > { %7050 = vst [vmem:[#allocation21_spill] sm:$0xff] %v6464_v2 }
 0x331   : > { %v2851_v28 = vpop.f32.mrf.mxu1  ;;  %v2732_v61 = vadd.f32 %v2731_v1, %v2668_v49  ;;  %v2672_v49 = vpop.f32.mrf.mxu2 }
 0x332   : > { %v6428_v54 = vadd.f32 %v2851_v28, %v2788_v48 }
 0x334   : > { %7042 = vst [vmem:[#allocation13_spill] sm:$0xff] %v6428_v54  ;;  %v2954_v21 = vmul.f32 %v6428_v54, %v6428_v54  ;;  %v2914_v43 = vsel %vm2874_vm1, %v6428_v54, 0.0 }
 0x336   : > { %v3002_v47 = vsel %vm2874_vm1, %v2954_v21, 0.0 }
 0x337   : > { %3003 = vadd.xlane.f32.xlu1 %v3002_v47  ;;  %2915 = vadd.xlane.f32.xlu0 %v2914_v43  ;;  %v2796_v47 = vadd.f32 %v2795_v27, %v2732_v61  ;;  %v2734_v27 = vadd.f32 %v2733_v52, %v2670_v31  ;;  %v2736_v61 = vpop.f32.mrf.mxu3 }
 0x339   : > { %v2854_v35 = vpop.f32.mrf.mxu1 }
 0x33a   : > { %v6442_v5 = vadd.f32 %v2854_v35, %v2791_v25  ;;  %v2797_v25 = vpop.f32.mrf.mxu0 }
 0x33c   : > { %7046 = vst [vmem:[#allocation17_spill] sm:$0xff] %v6442_v5  ;;  %v2955_v39 = vmul.f32 %v6442_v5, %v6442_v5  ;;  %v2917_v11 = vsel %vm2874_vm1, %v6442_v5, 0.0 }
 0x33e   : > { %v3005_v45 = vsel %vm2874_vm1, %v2955_v39, 0.0 }
 0x33f   : > { %3006 = vadd.xlane.f32.xlu2 %v3005_v45  ;;  %2918 = vadd.xlane.f32.xlu1 %v2917_v11 }
 0x340   : > { %v2877_v17 = vpop.xlane.xlu0 %2876 }
 0x341   : > { %v2856_v20 = vpop.f32.mrf.mxu1  ;;  %v6459_v28 = vmul.f32 0.020408163, %v2877_v17 }
 0x342   : > { %v6454_v26 = vadd.f32 %v2856_v20, %v2793_v37 }
 0x343   : > { %v3073_v35 = vmul.f32 %v6459_v28, %v6459_v28 }
 0x344   : > { %7049 = vst [vmem:[#allocation20_spill] sm:$0xff] %v6454_v26  ;;  %v2956_v48 = vmul.f32 %v6454_v26, %v6454_v26  ;;  %v2920_v34 = vsel %vm2874_vm1, %v6454_v26, 0.0 }
 0x346   : > { %v3008_v21 = vsel %vm2874_vm1, %v2956_v48, 0.0  ;;  %v2798_v48 = vadd.f32 %v2797_v25, %v2734_v27 }
 0x347   : > { %2921 = vadd.xlane.f32.xlu2 %v2920_v34  ;;  %3009 = vadd.xlane.f32.xlu0 %v3008_v21 }
 0x348   : > { %v2880_v43 = vpop.xlane.xlu1 %2879  ;;  %v2965_v38 = vpop.xlane.xlu0 %2964 }
 0x349   : > { %v3051_v57 = vmul.f32 0.020408163, %v2965_v38  ;;  %v2859_v3 = vpop.f32.mrf.mxu1  ;;  %v6473_v11 = vmul.f32 0.020408163, %v2880_v43  ;;  %v2800_v43 = vpop.f32.mrf.mxu0 }
 0x34a   : > { %v6468_v39 = vadd.f32 %v2859_v3, %v2796_v47 }
 0x34b   : > { %v3095_v1 = vsub.f32 %v3051_v57, %v3073_v35  ;;  %v3074_v34 = vmul.f32 %v6473_v11, %v6473_v11  ;;  %v2673_v35 = vadd.f32 %v2672_v49, %v6272_v33  ;;  %v2674_v49 = vpop.f32.mrf.mxu2 }
 0x34c   : > { %7051 = vst [vmem:[#allocation22_spill] sm:$0xff] %v6468_v39  ;;  %v2957_v45 = vmul.f32 %v6468_v39, %v6468_v39  ;;  %v2923_v20 = vsel %vm2874_vm1, %v6468_v39, 0.0 }
 0x34d   : > { %v6475_v37 = vadd.f32 1e-05, %v3095_v1  ;;  %v2737_v31 = vadd.f32 %v2736_v61, %v2673_v35  ;;  %v2738_v61 = vpop.f32.mrf.mxu3 }
 0x34e   : > { %v3011_v17 = vsel %vm2874_vm1, %v2957_v45, 0.0 }
 0x34f   : > { %4414 = vrsqrt.f32 %v6475_v37  ;;  %3012 = vadd.xlane.f32.xlu1 %v3011_v17  ;;  %2924 = vadd.xlane.f32.xlu0 %v2923_v20  ;;  %v2801_v20 = vadd.f32 %v2800_v43, %v2737_v31  ;;  %vm3145_vm3 = vweird.f32 %v6475_v37 }
 0x350   : > { %v2883_v14 = vpop.xlane.xlu2 %2882  ;;  %v2968_v6 = vpop.xlane.xlu1 %2967 }
 0x351   : > { %v3052_v21 = vmul.f32 0.020408163, %v2968_v6  ;;  %v2861_v47 = vpop.f32.mrf.mxu1  ;;  %v6488_v1 = vmul.f32 0.020408163, %v2883_v14 }
 0x352   : > { %v6483_v52 = vadd.f32 %v2861_v47, %v2798_v48 }
 0x353   : > { %v3096_v38 = vsub.f32 %v3052_v21, %v3074_v34  ;;  %v3075_v48 = vmul.f32 %v6488_v1, %v6488_v1 }
 0x354   : > { %7052 = vst [vmem:[#allocation23_spill] sm:$0xff] %v6483_v52  ;;  %v2958_v57 = vmul.f32 %v6483_v52, %v6483_v52  ;;  %v2926_v27 = vsel %vm2874_vm1, %v6483_v52, 0.0 }
 0x355   : > { %v4415_v3 = vpop.eup %4414  ;;  %v3118_v25 = vadd.f32 1e-05, %v3096_v38  ;;  %v2675_v38 = vadd.f32 %v2674_v49, %v6277_v19 }
 0x356   : > { %v3014_v45 = vsel %vm2874_vm1, %v2958_v57, 0.0  ;;  %v3140_v17 = vmul.f32 %v4415_v3, %v6475_v37  ;;  %vm3146_vm2 = vweird.f32 %v4415_v3 }
 0x357   : > { %4416 = vrsqrt.f32 %v3118_v25  ;;  %3015 = vadd.xlane.f32.xlu2 %v3014_v45  ;;  %2927 = vadd.xlane.f32.xlu1 %v2926_v27  ;;  %v2802_v45 = vpop.f32.mrf.mxu0  ;;  %v2739_v31 = vadd.f32 %v2738_v61, %v2675_v38  ;;  %vm3147_vm4 = vmor %vm3145_vm3, %vm3146_vm2  ;;  %vm3155_vm6 = vweird.f32 %v3118_v25 }
 0x358   : > { %v2971_v33 = vpop.xlane.xlu2 %2970  ;;  %v3141_v21 = vmul.f32 %v4415_v3, %v3140_v17 }
 0x359   : > { %v3053_v14 = vmul.f32 0.020408163, %v2971_v33  ;;  %v2864_v6 = vpop.f32.mrf.mxu1  ;;  %v2803_v17 = vadd.f32 %v2802_v45, %v2739_v31  ;;  %v3381_v31 = vld [vmem:[%s6512_s7] sm:$0xff] }
 0x35a   : > { %v6496_v34 = vadd.f32 %v2864_v6, %v2801_v20  ;;  %v3142_v20 = vmul.f32 0.5, %v3141_v21  ;;  %v2974_v38 = vpop.xlane.xlu0 %2973 }
 0x35b   : > { %v3097_v47 = vsub.f32 %v3053_v14, %v3075_v48 }
 0x35c   : > { %7053 = vst [vmem:[#allocation24_spill] sm:$0xff] %v6496_v34  ;;  %v2959_v35 = vmul.f32 %v6496_v34, %v6496_v34  ;;  %v2929_v53 = vsel %vm2874_vm1, %v6496_v34, 0.0  ;;  %v3143_v14 = vsub.f32 1.5, %v3142_v20 }
 0x35d   : > { %v4417_v57 = vpop.eup %4416  ;;  %v3119_v43 = vadd.f32 1e-05, %v3097_v47 }
 0x35e   : > { %v3150_v27 = vmul.f32 %v4417_v57, %v3118_v25  ;;  %v3017_v33 = vsel %vm2874_vm1, %v2959_v35, 0.0  ;;  %v3144_v2 = vmul.f32 %v4415_v3, %v3143_v14  ;;  %vm3156_vm5 = vweird.f32 %v4417_v57  ;;  %v3382_v14 = vld [vmem:[%s6512_s7 + $0x8] sm:$0xff] }
 0x35f   : > { %4418 = vrsqrt.f32 %v3119_v43  ;;  %2930 = vadd.xlane.f32.xlu2 %v2929_v53  ;;  %3018 = vadd.xlane.f32.xlu0 %v3017_v33  ;;  %vm3157_vm7 = vmor %vm3155_vm6, %vm3156_vm5  ;;  %vm3165_vm9 = vweird.f32 %v3119_v43 }
 0x360   : > { %v3151_v49 = vmul.f32 %v4417_v57, %v3150_v27  ;;  %v3148_v45 = vsel %vm3147_vm4, %v4415_v3, %v3144_v2  ;;  %v2886_v20 = vpop.xlane.xlu2 %2885 }
 0x361   : > { %v2866_v19 = vpop.f32.mrf.mxu1 }
 0x362   : > { %v6504_v48 = vadd.f32 %v2866_v19, %v2803_v17  ;;  %v3152_v47 = vmul.f32 0.5, %v3151_v49  ;;  %v3403_v17 = vmul.f32 %v3381_v31, %v3148_v45  ;;  %v2889_v19 = vpop.xlane.xlu0 %2888 }
 0x364   : > { %7054 = vst [vmem:[#allocation25_spill] sm:$0xff] %v6504_v48  ;;  %v2932_v34 = vsel %vm2874_vm1, %v6504_v48, 0.0  ;;  %v3153_v21 = vsub.f32 1.5, %v3152_v47 }
 0x365   : > { %v4419_v6 = vpop.eup %4418 }
 0x366   : > { %v3160_v61 = vmul.f32 %v4419_v6, %v3119_v43  ;;  %v3154_v27 = vmul.f32 %v4417_v57, %v3153_v21  ;;  %vm3166_vm8 = vweird.f32 %v4419_v6 }
 0x367   : > { %2933 = vadd.xlane.f32.xlu0 %v2932_v34  ;;  %v2977_v34 = vpop.xlane.xlu1 %2976  ;;  %vm3167_vm10 = vmor %vm3165_vm9, %vm3166_vm8 }
 0x368   : > { %v3161_v53 = vmul.f32 %v4419_v6, %v3160_v61  ;;  %v3158_v37 = vsel %vm3157_vm7, %v4417_v57, %v3154_v27  ;;  %v3383_v61 = vld [vmem:[%s6512_s7 + $0x10] sm:$0xff]  ;;  %v2677_v27 = vpop.f32.mrf.mxu2 }
 0x369   : > { %v3404_v47 = vmul.f32 %v3382_v14, %v3158_v37  ;;  %v2678_v26 = vadd.f32 %v2677_v27, %v6281_v56 }
 0x36a   : > { %v3162_v35 = vmul.f32 0.5, %v3161_v53  ;;  %v2980_v2 = vpop.xlane.xlu2 %2979 }
 0x36c   : > { %v3163_v33 = vsub.f32 1.5, %v3162_v35 }
 0x36e   : > { %v3164_v49 = vmul.f32 %v4419_v6, %v3163_v33  ;;  %v6520_v33 = vmul.f32 0.020408163, %v2889_v19  ;;  %v2869_v19 = vpop.f32.mrf.mxu1 }
 0x36f   : > { %v2892_v53 = vpop.xlane.xlu1 %2891 }
 0x370   : > { %3427 = vperm.xlu1 %4412, %v3403_v17   ;;  %v3168_v3 = vsel %vm3167_vm10, %v4419_v6, %v3164_v49  ;;  %v6518_v17 = vmul.f32 0.020408163, %v2886_v20  ;;  %v2741_v49 = vpop.f32.mrf.mxu3  ;;  %v3077_v14 = vmul.f32 %v6520_v33, %v6520_v33  ;;  %v2679_v52 = vpop.f32.mrf.mxu2 }
 0x371   : > { %v3405_v35 = vmul.f32 %v3383_v61, %v3168_v3  ;;  %v6526_v3 = vmul.f32 0.020408163, %v2892_v53  ;;  %v2805_v61 = vpop.f32.mrf.mxu0  ;;  %v2742_v22 = vadd.f32 %v2741_v49, %v2678_v26  ;;  %v2960_v26 = vmul.f32 %v6504_v48, %v6504_v48 }
 0x372   : > { %v2983_v21 = vpop.xlane.xlu0 %2982  ;;  %v2895_v45 = vpop.xlane.xlu2 %2894  ;;  %v3076_v43 = vmul.f32 %v6518_v17, %v6518_v17 }
 0x373   : > { %v3078_v63 = vmul.f32 %v6526_v3, %v6526_v3  ;;  %v6533_v40 = vmul.f32 0.020408163, %v2895_v45 }
 0x375   : > { %7055 = vst [vmem:[#allocation26_spill] sm:$0xff] %v6533_v40  ;;  %v3079_v45 = vmul.f32 %v6533_v40, %v6533_v40 }
 0x377   : > { %3432 = vperm.xlu2 %4413, %v3404_v47   ;;  %v3054_v47 = vmul.f32 0.020408163, %v2974_v38  ;;  %v3056_v38 = vmul.f32 0.020408163, %v2980_v2  ;;  %v2680_v2 = vadd.f32 %v2679_v52, %v6286_v58  ;;  %v3020_v58 = vsel %vm2874_vm1, %v2960_v26, 0.0 }
 0x378   : > { %v2743_v27 = vpop.f32.mrf.mxu3 }
 0x379   : > { %v3098_v20 = vsub.f32 %v3054_v47, %v3076_v43  ;;  %v2806_v43 = vadd.f32 %v2805_v61, %v2742_v22 }
 0x37a   : > { %v2986_v25 = vpop.xlane.xlu1 %2985  ;;  %v2898_v31 = vpop.xlane.xlu0 %2897 }
 0x37b   : > { %3437 = vperm.xlu0 %4411, %v3405_v35   ;;  %v3055_v35 = vmul.f32 0.020408163, %v2977_v34  ;;  %v6528_v30 = vmul.f32 0.020408163, %v2898_v31  ;;  %v6535_v16 = vadd.f32 1e-05, %v3098_v20  ;;  %v2744_v20 = vadd.f32 %v2743_v27, %v2680_v2 }
 0x37c   : > { %v3058_v47 = vmul.f32 0.020408163, %v2986_v25 }
 0x37d   : > { %v3099_v39 = vsub.f32 %v3055_v35, %v3077_v14  ;;  %v3080_v31 = vmul.f32 %v6528_v30, %v6528_v30  ;;  %v3100_v14 = vsub.f32 %v3056_v38, %v3078_v63  ;;  %4420 = vrsqrt.f32 %v6535_v16  ;;  %v2807_v35 = vpop.f32.mrf.mxu0  ;;  %v2871_v38 = vpop.f32.mrf.mxu1 }
 0x37e   : > { %v3057_v63 = vmul.f32 0.020408163, %v2983_v21  ;;  %v2808_v52 = vadd.f32 %v2807_v35, %v2744_v20  ;;  %vm3175_vm14 = vweird.f32 %v6535_v16 }
 0x37f   : > { %v6537_v34 = vadd.f32 1e-05, %v3099_v39  ;;  %v6547_v39 = vadd.f32 %v2869_v19, %v2806_v43  ;;  %v3102_v22 = vsub.f32 %v3058_v47, %v3080_v31  ;;  %v6554_v25 = vadd.f32 1e-05, %v3100_v14 }
 0x380   : > { %v3101_v48 = vsub.f32 %v3057_v63, %v3079_v45 }
 0x381   : > { %7056 = vst [vmem:[#allocation27_spill] sm:$0xff] %v6547_v39  ;;  %4422 = vrsqrt.f32 %v6537_v34  ;;  %v6561_v43 = vadd.f32 1e-05, %v3102_v22  ;;  %v2961_v14 = vmul.f32 %v6547_v39, %v6547_v39  ;;  %vm3185_vm13 = vweird.f32 %v6537_v34 }
 0x382   : > { %v2989_v57 = vpop.xlane.xlu2 %2988  ;;  %v2901_v37 = vpop.xlane.xlu1 %2900  ;;  %4424 = vrsqrt.f32 %v6554_v25  ;;  %v6574_v47 = vadd.f32 1e-05, %v3101_v48  ;;  %vm3195_vm3 = vweird.f32 %v6554_v25 }
 0x383   : > { %v6549_v49 = vmul.f32 0.020408163, %v2901_v37  ;;  %v3059_v27 = vmul.f32 0.020408163, %v2989_v57  ;;  %4426 = vrsqrt.f32 %v6561_v43  ;;  %vm3215_vm7 = vweird.f32 %v6561_v43 }
 0x384   : > { %4428 = vrsqrt.f32 %v6574_v47  ;;  %vm3205_vm9 = vweird.f32 %v6574_v47 }
 0x385   : > { %v3081_v37 = vmul.f32 %v6549_v49, %v6549_v49 }
 0x387   : > { %v3103_v35 = vsub.f32 %v3059_v27, %v3081_v37 }
 0x389   : > { %v6593_v37 = vadd.f32 1e-05, %v3103_v35 }
 0x38a   : > { %v2992_v6 = vpop.xlane.xlu0 %2991  ;;  %v2904_v53 = vpop.xlane.xlu2 %2903 }
 0x38b   : > { %v6556_v60 = vmul.f32 0.020408163, %v2904_v53  ;;  %v6570_v53 = vadd.f32 %v2871_v38, %v2808_v52  ;;  %v3060_v22 = vmul.f32 0.020408163, %v2992_v6  ;;  %v2935_v52 = vsel %vm2874_vm1, %v6547_v39, 0.0 }
 0x38c   : > { %4430 = vrsqrt.f32 %v6593_v37 }
 0x38d   : > { %7058 = vst [vmem:[#allocation29_spill] sm:$0xff] %v6556_v60  ;;  %v3082_v26 = vmul.f32 %v6556_v60, %v6556_v60  ;;  %v2962_v38 = vmul.f32 %v6570_v53, %v6570_v53 }
 0x38e   : > { %7059 = vst [vmem:[#allocation30_spill] sm:$0xff] %v6570_v53 }
 0x38f   : > { %v3026_v39 = vsel %vm2874_vm1, %v2962_v38, 0.0 }
 0x392   : > { %v2995_v54 = vpop.xlane.xlu1 %2994  ;;  %v2907_v56 = vpop.xlane.xlu0 %2906 }
 0x393   : > { %v6552_v61 = vmul.f32 0.020408163, %v2907_v56  ;;  %v6567_v56 = vpop.eup %4420  ;;  %v3061_v2 = vmul.f32 0.020408163, %v2995_v54  ;;  %v3104_v54 = vsub.f32 %v3060_v22, %v3082_v26 }
 0x394   : > { %v6572_v45 = vpop.eup %4422  ;;  %v3170_v57 = vmul.f32 %v6567_v56, %v6535_v16  ;;  %vm3176_vm11 = vweird.f32 %v6567_v56 }
 0x395   : > { %7057 = vst [vmem:[#allocation28_spill] sm:$0xff] %v6552_v61  ;;  %v3083_v21 = vmul.f32 %v6552_v61, %v6552_v61  ;;  %v3180_v48 = vmul.f32 %v6572_v45, %v6537_v34  ;;  %v6591_v6 = vpop.eup %4424  ;;  %v6608_v51 = vadd.f32 1e-05, %v3104_v54  ;;  %vm3186_vm12 = vweird.f32 %v6572_v45  ;;  %vm6668_vm0 = vmor %vm3175_vm14, %vm3176_vm11 }
 0x396   : > { %v6604_v4 = vpop.eup %4426  ;;  %v3190_v35 = vmul.f32 %v6591_v6, %v6554_v25  ;;  %vm6656_vm15 = vmor %vm3185_vm13, %vm3186_vm12  ;;  %vm3196_vm2 = vweird.f32 %v6591_v6  ;;  %vm3225_vm13 = vweird.f32 %v6593_v37 }
 0x397   : > { %v3105_v20 = vsub.f32 %v3061_v2, %v3083_v21  ;;  %v3181_v26 = vmul.f32 %v6572_v45, %v3180_v48  ;;  %v2938_v48 = vsel %vm2874_vm1, %v6570_v53, 0.0  ;;  %v3210_v54 = vmul.f32 %v6604_v4, %v6561_v43  ;;  %vm6693_vm4 = vmor %vm3195_vm3, %vm3196_vm2  ;;  %v3386_v43 = vld [vmem:[%s6512_s7 + $0x28] sm:$0xff] }
 0x398   : > { %vm3216_vm5 = vweird.f32 %v6604_v4  ;;  %vm3235_vm3 = vweird.f32 %v6608_v51 }
 0x399   : > { %v6597_v27 = vadd.f32 1e-05, %v3105_v20  ;;  %vm6716_vm8 = vmor %vm3215_vm7, %vm3216_vm5 }
 0x39a   : > { %v2998_v19 = vpop.xlane.xlu2 %2997  ;;  %3021 = vadd.xlane.f32.xlu1 %v3020_v58  ;;  %v2910_v31 = vpop.xlane.xlu1 %2909  ;;  %v3023_v58 = vsel %vm2874_vm1, %v2961_v14, 0.0 }
 0x39b   : > { %v6578_v63 = vmul.f32 0.020408163, %v2910_v31  ;;  %v3062_v22 = vmul.f32 0.020408163, %v2998_v19  ;;  %4432 = vrsqrt.f32 %v6597_v27 }
 0x39c   : > { %4434 = vrsqrt.f32 %v6608_v51 }
 0x39d   : > { %v3084_v21 = vmul.f32 %v6578_v63, %v6578_v63 }
 0x3a0   : > { %3024 = vadd.xlane.f32.xlu2 %v3023_v58  ;;  %v3171_v58 = vmul.f32 %v6567_v56, %v3170_v57  ;;  %v6613_v57 = vpop.eup %4428 }
 0x3a1   : > { %vm3206_vm6 = vweird.f32 %v6613_v57 }
 0x3a2   : > { %v2913_v31 = vpop.xlane.xlu2 %2912  ;;  %2936 = vadd.xlane.f32.xlu1 %v2935_v52  ;;  %v3001_v14 = vpop.xlane.xlu0 %3000  ;;  %v3106_v52 = vsub.f32 %v3062_v22, %v3084_v21  ;;  %v3172_v38 = vmul.f32 0.5, %v3171_v58  ;;  %v3200_v21 = vmul.f32 %v6613_v57, %v6574_v47  ;;  %vm6732_vm10 = vmor %vm3205_vm9, %vm3206_vm6 }
 0x3a3   : > { %v6599_v2 = vmul.f32 0.020408163, %v2913_v31  ;;  %v3063_v19 = vmul.f32 0.020408163, %v3001_v14  ;;  %v3182_v31 = vmul.f32 0.5, %v3181_v26  ;;  %v6628_v58 = vpop.eup %4430 }
 0x3a4   : > { %v6624_v22 = vadd.f32 1e-05, %v3106_v52  ;;  %v3173_v26 = vsub.f32 1.5, %v3172_v38  ;;  %v6631_v15 = vpop.eup %4432  ;;  %v3220_v38 = vmul.f32 %v6628_v58, %v6593_v37  ;;  %vm3226_vm11 = vweird.f32 %v6628_v58 }
 0x3a5   : > { %7060 = vst [vmem:[#allocation31_spill] sm:$0xff] %v6599_v2  ;;  %v3085_v20 = vmul.f32 %v6599_v2, %v6599_v2  ;;  %3027 = vadd.xlane.f32.xlu0 %v3026_v39  ;;  %v3191_v2 = vmul.f32 %v6591_v6, %v3190_v35  ;;  %v3183_v53 = vsub.f32 1.5, %v3182_v31  ;;  %vm3246_vm12 = vweird.f32 %v6631_v15 }
 0x3a6   : > { %4436 = vrsqrt.f32 %v6624_v22  ;;  %vm3255_vm7 = vweird.f32 %v6624_v22 }
 0x3a7   : > { %v3107_v39 = vsub.f32 %v3063_v19, %v3085_v20  ;;  %v3192_v35 = vmul.f32 0.5, %v3191_v2  ;;  %v3201_v19 = vmul.f32 %v6613_v57, %v3200_v21 }
 0x3a8   : > { %2939 = vadd.xlane.f32.xlu2 %v2938_v48  ;;  %v3211_v48 = vmul.f32 %v6604_v4, %v3210_v54  ;;  %v3240_v54 = vmul.f32 %v6631_v15, %v6597_v27 }
 0x3a9   : > { %v6633_v61 = vadd.f32 1e-05, %v3107_v39  ;;  %v3184_v39 = vmul.f32 %v6572_v45, %v3183_v53  ;;  %v3202_v5 = vmul.f32 0.5, %v3201_v19 }
 0x3aa   : > { %v3004_v14 = vpop.xlane.xlu1 %3003  ;;  %v2916_v36 = vpop.xlane.xlu0 %2915  ;;  %v3212_v2 = vmul.f32 0.5, %v3211_v48 }
 0x3ab   : > { %v6626_v60 = vmul.f32 0.020408163, %v2916_v36  ;;  %v3064_v20 = vmul.f32 0.020408163, %v3004_v14  ;;  %v6639_v36 = vpop.eup %4434  ;;  %v3193_v14 = vsub.f32 1.5, %v3192_v35  ;;  %4438 = vrsqrt.f32 %v6633_v61 }
 0x3ac   : > { %v3221_v35 = vmul.f32 %v6628_v58, %v3220_v38  ;;  %v6664_v34 = vpop.eup %4436  ;;  %v3213_v16 = vsub.f32 1.5, %v3212_v2  ;;  %v3188_v38 = vsel %vm6656_vm15, %v6572_v45, %v3184_v39  ;;  %v3203_v2 = vsub.f32 1.5, %v3202_v5  ;;  %vm6755_vm15 = vmor %vm3225_vm13, %vm3226_vm11 }
 0x3ad   : > { %7061 = vst [vmem:[#allocation32_spill] sm:$0xff] %v6626_v60  ;;  %v3086_v52 = vmul.f32 %v6626_v60, %v6626_v60  ;;  %v3174_v60 = vmul.f32 %v6567_v56, %v3173_v26  ;;  %v3194_v40 = vmul.f32 %v6591_v6, %v3193_v14  ;;  %v3250_v39 = vmul.f32 %v6664_v34, %v6624_v22 }
 0x3ae   : > { %v3222_v45 = vmul.f32 0.5, %v3221_v35  ;;  %v3407_v53 = vmul.f32 %v3385_v32, %v3188_v38  ;;  %vm3236_vm14 = vweird.f32 %v6639_v36  ;;  %vm3256_vm5 = vweird.f32 %v6664_v34 }
 0x3af   : > { %v3108_v31 = vsub.f32 %v3064_v20, %v3086_v52  ;;  %v3230_v20 = vmul.f32 %v6639_v36, %v6608_v51  ;;  %v3178_v59 = vsel %vm6668_vm0, %v6567_v56, %v3174_v60  ;;  %v3214_v56 = vmul.f32 %v6604_v4, %v3213_v16 }
 0x3b0   : > { %v3406_v25 = vmul.f32 %v3384_v29, %v3178_v59  ;;  %vm3245_vm0 = vweird.f32 %v6597_v27 }
 0x3b1   : > { %v6649_v21 = vadd.f32 1e-05, %v3108_v31  ;;  %v3241_v31 = vmul.f32 %v6631_v15, %v3240_v54  ;;  %v3231_v54 = vmul.f32 %v6639_v36, %v3230_v20  ;;  %v6687_v42 = vpop.eup %4438  ;;  %v3204_v20 = vmul.f32 %v6613_v57, %v3203_v2  ;;  %vm6765_vm2 = vmor %vm3245_vm0, %vm3246_vm12 }
 0x3b2   : > { %v3007_v48 = vpop.xlane.xlu2 %3006  ;;  %v2919_v52 = vpop.xlane.xlu1 %2918  ;;  %v3260_v29 = vmul.f32 %v6687_v42, %v6633_v61  ;;  %vm3266_vm9 = vweird.f32 %v6687_v42  ;;  %vm3265_vm12 = vweird.f32 %v6633_v61 }
 0x3b3   : > { %4440 = vrsqrt.f32 %v6649_v21  ;;  %v6662_v26 = vmul.f32 0.020408163, %v2919_v52  ;;  %v3065_v52 = vmul.f32 0.020408163, %v3007_v48  ;;  %v3242_v5 = vmul.f32 0.5, %v3241_v31  ;;  %vm6835_vm13 = vmor %vm3265_vm12, %vm3266_vm9 }
 0x3b4   : > { %v3232_v35 = vmul.f32 0.5, %v3231_v54  ;;  %v3218_v54 = vsel %vm6716_vm8, %v6604_v4, %v3214_v56  ;;  %v3208_v4 = vsel %vm6732_vm10, %v6613_v57, %v3204_v20  ;;  %vm6805_vm8 = vmor %vm3255_vm7, %vm3256_vm5  ;;  %vm3275_vm10 = vweird.f32 %v6649_v21  ;;  %v3395_v20 = vld [vmem:[%s6512_s7 + $0x70] sm:$0xff] }
 0x3b5   : > { %v3087_v7 = vmul.f32 %v6662_v26, %v6662_v26 }
 0x3b6   : > { %v3233_v47 = vsub.f32 1.5, %v3232_v35 }
 0x3b7   : > { %v3109_v48 = vsub.f32 %v3065_v52, %v3087_v7  ;;  %v3198_v7 = vsel %vm6693_vm4, %v6591_v6, %v3194_v40  ;;  %v3223_v40 = vsub.f32 1.5, %v3222_v45  ;;  %v3251_v6 = vmul.f32 %v6664_v34, %v3250_v39  ;;  %vm6784_vm4 = vmor %vm3235_vm3, %vm3236_vm14 }
 0x3b8   : > { %v3243_v52 = vsub.f32 1.5, %v3242_v5  ;;  %v3408_v60 = vmul.f32 %v3386_v43, %v3198_v7  ;;  %v3261_v5 = vmul.f32 %v6687_v42, %v3260_v29  ;;  %v3234_v29 = vmul.f32 %v6639_v36, %v3233_v47 }
 0x3b9   : > { %v6699_v14 = vpop.eup %4440  ;;  %v6703_v32 = vadd.f32 1e-05, %v3109_v48  ;;  %3447 = vperm.xlu0 %4411, %v3407_v53   ;;  %v3388_v48 = vld [vmem:[%s6512_s7 + $0x38] sm:$0xff]  ;;  %v3252_v56 = vmul.f32 0.5, %v3251_v6  ;;  %v3224_v31 = vmul.f32 %v6628_v58, %v3223_v40 }
 0x3ba   : > { %v3270_v59 = vmul.f32 %v6699_v14, %v6649_v21  ;;  %v2922_v19 = vpop.xlane.xlu2 %2921  ;;  %v3010_v16 = vpop.xlane.xlu0 %3009  ;;  %v3244_v7 = vmul.f32 %v6631_v15, %v3243_v52  ;;  %v3262_v43 = vmul.f32 0.5, %v3261_v5  ;;  %vm3276_vm6 = vweird.f32 %v6699_v14 }
 0x3bb   : > { %4442 = vrsqrt.f32 %v6703_v32  ;;  %v6722_v38 = vmul.f32 0.020408163, %v2922_v19  ;;  %3442 = vperm.xlu1 %4412, %v3406_v25   ;;  %v3066_v53 = vmul.f32 0.020408163, %v3010_v16  ;;  %v3387_v25 = vld [vmem:[%s6512_s7 + $0x30] sm:$0xff]  ;;  %v3410_v19 = vmul.f32 %v3388_v48, %v3218_v54  ;;  %v3389_v48 = vld [vmem:[%s6512_s7 + $0x40] sm:$0xff]  ;;  %vm6816_vm11 = vmor %vm3275_vm10, %vm3276_vm6 }
 0x3bc   : > { %v3271_v2 = vmul.f32 %v6699_v14, %v3270_v59  ;;  %v3409_v57 = vmul.f32 %v3387_v25, %v3208_v4  ;;  %v3228_v27 = vsel %vm6755_vm15, %v6628_v58, %v3224_v31  ;;  %v3263_v51 = vsub.f32 1.5, %v3262_v43 }
 0x3bd   : > { %7070 = vst [vmem:[#allocation33_spill] sm:$0xff] %v6722_v38  ;;  %v3088_v39 = vmul.f32 %v6722_v38, %v6722_v38  ;;  %v3238_v4 = vsel %vm6784_vm4, %v6639_v36, %v3234_v29  ;;  %vm3285_vm15 = vweird.f32 %v6703_v32 }
 0x3be   : > { %v3272_v38 = vmul.f32 0.5, %v3271_v2  ;;  %v3253_v2 = vsub.f32 1.5, %v3252_v56  ;;  %v3264_v29 = vmul.f32 %v6687_v42, %v3263_v51 }
 0x3bf   : > { %v3110_v59 = vsub.f32 %v3066_v53, %v3088_v39  ;;  %v3248_v53 = vsel %vm6765_vm2, %v6631_v15, %v3244_v7  ;;  %v3390_v15 = vld [vmem:[%s6512_s7 + $0x48] sm:$0xff] }
 0x3c0   : > { %3452 = vperm.xlu2 %4413, %v3408_v60   ;;  %v3273_v45 = vsub.f32 1.5, %v3272_v38  ;;  %v3391_v60 = vld [vmem:[%s6512_s7 + $0x50] sm:$0xff]  ;;  %v3411_v38 = vmul.f32 %v3389_v48, %v3228_v27  ;;  %v3412_v36 = vmul.f32 %v3390_v15, %v3238_v4  ;;  %v3268_v61 = vsel %vm6835_vm13, %v6687_v42, %v3264_v29 }
 0x3c1   : > { %v6747_v16 = vpop.eup %4442  ;;  %v6751_v35 = vadd.f32 1e-05, %v3110_v59  ;;  %3462 = vperm.xlu0 %4411, %v3410_v19   ;;  %v3413_v59 = vmul.f32 %v3391_v60, %v3248_v53  ;;  %v3254_v19 = vmul.f32 %v6664_v34, %v3253_v2  ;;  %v3392_v2 = vld [vmem:[%s6512_s7 + $0x58] sm:$0xff] }
 0x3c2   : > { %v3280_v37 = vmul.f32 %v6747_v16, %v6703_v32  ;;  %v3013_v40 = vpop.xlane.xlu1 %3012  ;;  %v2925_v6 = vpop.xlane.xlu0 %2924  ;;  %v3274_v31 = vmul.f32 %v6699_v14, %v3273_v45  ;;  %v3394_v45 = vld [vmem:[%s6512_s7 + $0x68] sm:$0xff]  ;;  %vm3286_vm14 = vweird.f32 %v6747_v16 }
 0x3c3   : > { %4444 = vrsqrt.f32 %v6751_v35  ;;  %v6770_v54 = vmul.f32 0.020408163, %v2925_v6  ;;  %3457 = vperm.xlu1 %4412, %v3409_v57   ;;  %v3067_v5 = vmul.f32 0.020408163, %v3013_v40  ;;  %v3258_v21 = vsel %vm6805_vm8, %v6664_v34, %v3254_v19  ;;  %vm6848_vm0 = vmor %vm3285_vm15, %vm3286_vm14 }
 0x3c4   : > { %v3281_v39 = vmul.f32 %v6747_v16, %v3280_v37  ;;  %v3278_v48 = vsel %vm6816_vm11, %v6699_v14, %v3274_v31  ;;  %v3414_v47 = vmul.f32 %v3392_v2, %v3258_v21  ;;  %vm3295_vm3 = vweird.f32 %v6751_v35  ;;  %v3396_v21 = vld [vmem:[%s6512_s7 + $0x78] sm:$0xff] }
 0x3c5   : > { %v3089_v58 = vmul.f32 %v6770_v54, %v6770_v54 }
 0x3c6   : > { %v3282_v25 = vmul.f32 0.5, %v3281_v39 }
 0x3c7   : > { %v3111_v56 = vsub.f32 %v3067_v5, %v3089_v58  ;;  %v3393_v5 = vld [vmem:[%s6512_s7 + $0x60] sm:$0xff]  ;;  %v3416_v58 = vmul.f32 %v3394_v45, %v3278_v48 }
 0x3c8   : > { %3467 = vperm.xlu2 %4413, %v3411_v38   ;;  %v3283_v6 = vsub.f32 1.5, %v3282_v25  ;;  %v3415_v25 = vmul.f32 %v3393_v5, %v3268_v61 }
 0x3c9   : > { %v6798_v7 = vpop.eup %4444  ;;  %v6801_v57 = vadd.f32 1e-05, %v3111_v56  ;;  %3477 = vperm.xlu0 %4411, %v3413_v59  }
 0x3ca   : > { %v3290_v22 = vmul.f32 %v6798_v7, %v6751_v35  ;;  %v3016_v43 = vpop.xlane.xlu2 %3015  ;;  %v2928_v37 = vpop.xlane.xlu1 %2927  ;;  %v3284_v51 = vmul.f32 %v6747_v16, %v3283_v6  ;;  %vm3296_vm2 = vweird.f32 %v6798_v7  ;;  %v3360_v35 = vsub.f32 %v6299_v24, %v6473_v11 }
 0x3cb   : > { %4446 = vrsqrt.f32 %v6801_v57  ;;  %v6821_v52 = vmul.f32 0.020408163, %v2928_v37  ;;  %3472 = vperm.xlu1 %4412, %v3412_v36   ;;  %v3068_v53 = vmul.f32 0.020408163, %v3016_v43  ;;  %vm3297_vm4 = vmor %vm3295_vm3, %vm3296_vm2  ;;  %vm3305_vm6 = vweird.f32 %v6801_v57 }
 0x3cc   : > { %v3291_v27 = vmul.f32 %v6798_v7, %v3290_v22  ;;  %v3288_v32 = vsel %vm6848_vm0, %v6747_v16, %v3284_v51 }
 0x3cd   : > { %v3090_v34 = vmul.f32 %v6821_v52, %v6821_v52  ;;  %v3417_v40 = vmul.f32 %v3395_v20, %v3288_v32  ;;  %v3361_v20 = vsub.f32 %v6309_v9, %v6488_v1 }
 0x3ce   : > { %v3292_v60 = vmul.f32 0.5, %v3291_v27 }
 0x3cf   : > { %v3112_v14 = vsub.f32 %v3068_v53, %v3090_v34 }
 0x3d0   : > { %v3293_v38 = vsub.f32 1.5, %v3292_v60  ;;  %3482 = vperm.xlu2 %4413, %v3414_v47   ;;  %v3397_v60 = vld [vmem:[%s6512_s7 + $0x80] sm:$0xff] }
 0x3d1   : > { %v4447_v4 = vpop.eup %4446  ;;  %v3134_v15 = vadd.f32 1e-05, %v3112_v14  ;;  %3492 = vperm.xlu0 %4411, %v3416_v58   ;;  %v3359_v58 = vsub.f32 %v6291_v10, %v6459_v28 }
 0x3d2   : > { %v3294_v42 = vmul.f32 %v6798_v7, %v3293_v38  ;;  %v3300_v59 = vmul.f32 %v4447_v4, %v6801_v57  ;;  %v2931_v19 = vpop.xlane.xlu2 %2930  ;;  %v3019_v31 = vpop.xlane.xlu0 %3018  ;;  %vm3306_vm5 = vweird.f32 %v4447_v4 }
 0x3d3   : > { %4448 = vrsqrt.f32 %v3134_v15  ;;  %v6855_v36 = vmul.f32 0.020408163, %v2931_v19  ;;  %3487 = vperm.xlu1 %4412, %v3415_v25   ;;  %v3069_v43 = vmul.f32 0.020408163, %v3019_v31  ;;  %vm3307_vm7 = vmor %vm3305_vm6, %vm3306_vm5  ;;  %vm3315_vm9 = vweird.f32 %v3134_v15 }
 0x3d4   : > { %v3301_v29 = vmul.f32 %v4447_v4, %v3300_v59  ;;  %v3298_v6 = vsel %vm3297_vm4, %v6798_v7, %v3294_v42 }
 0x3d5   : > { %v3091_v22 = vmul.f32 %v6855_v36, %v6855_v36  ;;  %v3418_v45 = vmul.f32 %v3396_v21, %v3298_v6 }
 0x3d6   : > { %v3302_v37 = vmul.f32 0.5, %v3301_v29 }
 0x3d7   : > { %v3113_v2 = vsub.f32 %v3069_v43, %v3091_v22 }
 0x3d8   : > { %v3303_v27 = vsub.f32 1.5, %v3302_v37  ;;  %3497 = vperm.xlu2 %4413, %v3417_v40  }
 0x3d9   : > { %v4449_v16 = vpop.eup %4448  ;;  %v3135_v48 = vadd.f32 1e-05, %v3113_v2 }
 0x3da   : > { %v3310_v39 = vmul.f32 %v4449_v16, %v3134_v15  ;;  %v3433_v53 = vpop.permute.xlu2 %3432  ;;  %v3304_v34 = vmul.f32 %v4447_v4, %v3303_v27  ;;  %vm3316_vm8 = vweird.f32 %v4449_v16  ;;  %v2934_v59 = vpop.xlane.xlu0 %2933  ;;  %v3399_v15 = vld [vmem:[%s6512_s7 + $0x90] sm:$0xff] }
 0x3db   : > { %4450 = vrsqrt.f32 %v3135_v48  ;;  %v3536_v7 = vmul.f32 %v3433_v53, %v3360_v35  ;;  %3502 = vperm.xlu1 %4412, %v3418_v45   ;;  %vm3317_vm10 = vmor %vm3315_vm9, %vm3316_vm8  ;;  %vm3325_vm12 = vweird.f32 %v3135_v48  ;;  %v6891_v40 = vmul.f32 0.020408163, %v2934_v59 }
 0x3dc   : > { %v3311_v47 = vmul.f32 %v4449_v16, %v3310_v39  ;;  %v3308_v24 = vsel %vm3307_vm7, %v4447_v4, %v3304_v34  ;;  %v3398_v4 = vld [vmem:[%s6512_s7 + $0x88] sm:$0xff] }
 0x3dd   : > { %v3690_v11 = vadd.f32 %v6380_v0, %v3536_v7  ;;  %v3419_v57 = vmul.f32 %v3397_v60, %v3308_v24  ;;  %v3092_v21 = vmul.f32 %v6891_v40, %v6891_v40 }
 0x3de   : > { %v3312_v61 = vmul.f32 0.5, %v3311_v47 }
 0x3df   : > { %3712 = vst.msk [vmem:[%s6874_s10 + $0x8] sm:$0xff] %vm2874_vm1, %v3690_v11  ;;  %3507 = vperm.xlu0 %4411, %v3419_v57  }
 0x3e0   : > { %v3313_v5 = vsub.f32 1.5, %v3312_v61 }
 0x3e1   : > { %v4451_v14 = vpop.eup %4450 }
 0x3e2   : > { %v3320_v51 = vmul.f32 %v4451_v14, %v3135_v48  ;;  %v3428_v38 = vpop.permute.xlu1 %3427  ;;  %v3314_v25 = vmul.f32 %v4449_v16, %v3313_v5  ;;  %vm3326_vm11 = vweird.f32 %v4451_v14 }
 0x3e3   : > { %v3535_v0 = vmul.f32 %v3428_v38, %v3359_v58  ;;  %vm3327_vm13 = vmor %vm3325_vm12, %vm3326_vm11 }
 0x3e4   : > { %v3321_v56 = vmul.f32 %v4451_v14, %v3320_v51  ;;  %v3318_v42 = vsel %vm3317_vm10, %v4449_v16, %v3314_v25  ;;  %v3364_v51 = vsub.f32 %v6338_v46, %v6526_v3  ;;  %v3367_v3 = vsub.f32 %v6366_v12, %v6549_v49  ;;  %v3401_v49 = vld [vmem:[%s6512_s7 + $0xa0] sm:$0xff] }
 0x3e5   : > { %v3689_v19 = vadd.f32 %v6348_v44, %v3535_v0  ;;  %v3420_v31 = vmul.f32 %v3398_v4, %v3318_v42  ;;  %v3400_v4 = vld [vmem:[%s6512_s7 + $0x98] sm:$0xff] }
 0x3e6   : > { %v3322_v32 = vmul.f32 0.5, %v3321_v56 }
 0x3e7   : > { %3711 = vst.msk [vmem:[%s6874_s10] sm:$0xff] %vm2874_vm1, %v3689_v19  ;;  %3512 = vperm.xlu2 %4413, %v3420_v31  }
 0x3e8   : > { %v3323_v10 = vsub.f32 1.5, %v3322_v32 }
 0x3ea   : > { %v3324_v28 = vmul.f32 %v4451_v14, %v3323_v10 }
 0x3ec   : > { %v3328_v29 = vsel %vm3327_vm13, %v4451_v14, %v3324_v28  ;;  %v3363_v28 = vsub.f32 %v6327_v8, %v6520_v33 }
 0x3ed   : > { %v3438_v22 = vpop.permute.xlu0 %3437  ;;  %v3421_v43 = vmul.f32 %v3399_v15, %v3328_v29 }
 0x3ee   : > { %v3537_v37 = vmul.f32 %v3438_v22, %v3361_v20 }
 0x3ef   : > { %3517 = vperm.xlu1 %4412, %v3421_v43  }
 0x3f0   : > { %v3691_v44 = vadd.f32 %v6371_v62, %v3537_v37  ;;  %v3362_v37 = vsub.f32 %v6318_v55, %v6518_v17 }
 0x3f2   : > { %3713 = vst.msk [vmem:[%s6874_s10 + $0x10] sm:$0xff] %vm2874_vm1, %v3691_v44 }
 0x40d   : > { %v3022_v6 = vpop.xlane.xlu1 %3021 }
 0x40e   : > { %v3070_v2 = vmul.f32 0.020408163, %v3022_v6 }
 0x410   : > { %v3114_v27 = vsub.f32 %v3070_v2, %v3092_v21  ;;  %v3578_v21 = vld [vmem:[%s5624_s6 + $0xa8] sm:$0xff] }
 0x412   : > { %v3136_v16 = vadd.f32 1e-05, %v3114_v27 }
 0x413   : > { %v3025_v48 = vpop.xlane.xlu2 %3024 }
 0x414   : > { %4452 = vrsqrt.f32 %v3136_v16  ;;  %v3071_v35 = vmul.f32 0.020408163, %v3025_v48  ;;  %vm3335_vm15 = vweird.f32 %v3136_v16 }
 0x415   : > { %v2937_v9 = vpop.xlane.xlu1 %2936 }
 0x416   : > { %v6895_v1 = vmul.f32 0.020408163, %v2937_v9 }
 0x418   : > { %v3093_v62 = vmul.f32 %v6895_v1, %v6895_v1  ;;  %v3028_v34 = vpop.xlane.xlu0 %3027 }
 0x419   : > { %v3072_v11 = vmul.f32 0.020408163, %v3028_v34  ;;  %v7088_v34 = vld [vmem:[#allocation26_spill] sm:$0xff] }
 0x41a   : > { %v4453_v45 = vpop.eup %4452  ;;  %v3115_v39 = vsub.f32 %v3071_v35, %v3093_v62 }
 0x41b   : > { %v3330_v53 = vmul.f32 %v4453_v45, %v3136_v16  ;;  %v2940_v60 = vpop.xlane.xlu2 %2939  ;;  %vm3336_vm14 = vweird.f32 %v4453_v45 }
 0x41c   : > { %v3137_v7 = vadd.f32 1e-05, %v3115_v39  ;;  %v6899_v47 = vmul.f32 0.020408163, %v2940_v60  ;;  %vm3337_vm0 = vmor %vm3335_vm15, %vm3336_vm14  ;;  %v7089_v60 = vld [vmem:[#allocation2_spill] sm:$0xff] }
 0x41d   : > { %v3331_v24 = vmul.f32 %v4453_v45, %v3330_v53 }
 0x41e   : > { %4454 = vrsqrt.f32 %v3137_v7  ;;  %v3094_v57 = vmul.f32 %v6899_v47, %v6899_v47  ;;  %vm3345_vm3 = vweird.f32 %v3137_v7 }
 0x41f   : > { %v3332_v61 = vmul.f32 0.5, %v3331_v24 }
 0x420   : > { %v3116_v5 = vsub.f32 %v3072_v11, %v3094_v57 }
 0x421   : > { %v3333_v14 = vsub.f32 1.5, %v3332_v61 }
 0x422   : > { %v3138_v58 = vadd.f32 1e-05, %v3116_v5 }
 0x423   : > { %v3334_v38 = vmul.f32 %v4453_v45, %v3333_v14  ;;  %v3453_v25 = vpop.permute.xlu2 %3452  ;;  %v3576_v14 = vld [vmem:[%s5624_s6 + $0x98] sm:$0xff] }
 0x424   : > { %v4455_v0 = vpop.eup %4454  ;;  %4456 = vrsqrt.f32 %v3138_v58  ;;  %v3540_v56 = vmul.f32 %v3453_v25, %v3364_v51  ;;  %vm3355_vm6 = vweird.f32 %v3138_v58 }
 0x425   : > { %v3340_v42 = vmul.f32 %v4455_v0, %v3137_v7  ;;  %v3338_v59 = vsel %vm3337_vm0, %v4453_v45, %v3334_v38  ;;  %vm3346_vm2 = vweird.f32 %v4455_v0  ;;  %v3402_v45 = vld [vmem:[%s6512_s7 + $0xa8] sm:$0xff]  ;;  %v3365_v7 = vsub.f32 %v7089_v60, %v7088_v34  ;;  %v7093_v38 = vld [vmem:[#allocation17_spill] sm:$0xff]  ;;  %v7111_v60 = vld [vmem:[#allocation12_spill] sm:$0xff] }
 0x426   : > { %v3694_v19 = vadd.f32 %v6388_v23, %v3540_v56  ;;  %v3422_v31 = vmul.f32 %v3400_v4, %v3338_v59  ;;  %vm3347_vm4 = vmor %vm3345_vm3, %vm3346_vm2  ;;  %v3373_v25 = vsub.f32 %v7093_v38, %v6662_v26  ;;  %v7094_v4 = vld [vmem:[#allocation28_spill] sm:$0xff]  ;;  %v7100_v26 = vld [vmem:[#allocation6_spill] sm:$0xff] }
 0x427   : > { %v3341_v32 = vmul.f32 %v4455_v0, %v3340_v42 }
 0x428   : > { %3716 = vst.msk [vmem:[%s6874_s10 + $0x28] sm:$0xff] %vm2874_vm1, %v3694_v19  ;;  %3522 = vperm.xlu0 %4411, %v3422_v31  }
 0x429   : > { %v3342_v10 = vmul.f32 0.5, %v3341_v32  ;;  %v7096_v32 = vld [vmem:[#allocation29_spill] sm:$0xff] }
 0x42a   : > { %v4457_v46 = vpop.eup %4456 }
 0x42b   : > { %v3343_v15 = vsub.f32 1.5, %v3342_v10  ;;  %v3350_v20 = vmul.f32 %v4457_v46, %v3138_v58  ;;  %v3468_v29 = vpop.permute.xlu2 %3467  ;;  %v3448_v23 = vpop.permute.xlu0 %3447  ;;  %vm3356_vm5 = vweird.f32 %v4457_v46  ;;  %v7092_v58 = vld [vmem:[#allocation4_spill] sm:$0xff]  ;;  %v7097_v10 = vld [vmem:[#allocation5_spill] sm:$0xff] }
 0x42c   : > { %v3543_v22 = vmul.f32 %v3468_v29, %v3367_v3  ;;  %v3539_v43 = vmul.f32 %v3448_v23, %v3363_v28  ;;  %vm3357_vm7 = vmor %vm3355_vm6, %vm3356_vm5  ;;  %v3577_v28 = vld [vmem:[%s5624_s6 + $0xa0] sm:$0xff] }
 0x42d   : > { %v3351_v44 = vmul.f32 %v4457_v46, %v3350_v20  ;;  %v3443_v6 = vpop.permute.xlu1 %3442  ;;  %v3344_v12 = vmul.f32 %v4455_v0, %v3343_v15  ;;  %v7098_v15 = vld [vmem:[#allocation15_spill] sm:$0xff]  ;;  %v7099_v29 = vld [vmem:[#allocation14_spill] sm:$0xff] }
 0x42e   : > { %v3697_v8 = vadd.f32 %v6402_v13, %v3543_v22  ;;  %v3693_v33 = vadd.f32 %v6397_v50, %v3539_v43  ;;  %v3538_v2 = vmul.f32 %v3443_v6, %v3362_v37  ;;  %v3370_v50 = vsub.f32 %v6404_v41, %v6578_v63  ;;  %v7087_v13 = vld [vmem:[#allocation3_spill] sm:$0xff]  ;;  %v7102_v6 = vld [vmem:[#allocation32_spill] sm:$0xff] }
 0x42f   : > { %v3352_v27 = vmul.f32 0.5, %v3351_v44  ;;  %v3348_v16 = vsel %vm3347_vm4, %v4455_v0, %v3344_v12  ;;  %v3366_v9 = vsub.f32 %v7087_v13, %v6528_v30  ;;  %v7090_v63 = vld [vmem:[#allocation11_spill] sm:$0xff]  ;;  %v7091_v30 = vld [vmem:[#allocation9_spill] sm:$0xff]  ;;  %v7107_v13 = vld [vmem:[#allocation18_spill] sm:$0xff] }
 0x430   : > { %3719 = vst.msk [vmem:[%s6874_s10 + $0x40] sm:$0xff] %vm2874_vm1, %v3697_v8  ;;  %v3692_v55 = vadd.f32 %v6361_v18, %v3538_v2  ;;  %3686 = vperm.xlu0 %4411, %v3578_v21   ;;  %v3423_v17 = vmul.f32 %v3401_v49, %v3348_v16  ;;  %v7095_v0 = vld [vmem:[#allocation7_spill] sm:$0xff]  ;;  %v7103_v21 = vld [vmem:[#allocation13_spill] sm:$0xff]  ;;  %v7105_v16 = vld [vmem:[#allocation10_spill] sm:$0xff] }
 0x431   : > { %v3353_v48 = vsub.f32 1.5, %v3352_v27  ;;  %3715 = vst.msk [vmem:[%s6874_s10 + $0x20] sm:$0xff] %vm2874_vm1, %v3693_v33  ;;  %v3369_v56 = vsub.f32 %v7095_v0, %v7094_v4  ;;  %v7101_v37 = vld [vmem:[#allocation23_spill] sm:$0xff]  ;;  %v3372_v12 = vsub.f32 %v7103_v21, %v7102_v6 }
 0x432   : > { %3714 = vst.msk [vmem:[%s6874_s10 + $0x18] sm:$0xff] %vm2874_vm1, %v3692_v55  ;;  %3527 = vperm.xlu2 %4413, %v3423_v17   ;;  %v3376_v44 = vsub.f32 %v7101_v37, %v6821_v52  ;;  %v7104_v27 = vld [vmem:[#allocation31_spill] sm:$0xff]  ;;  %v7108_v52 = vld [vmem:[#allocation8_spill] sm:$0xff] }
 0x433   : > { %v3483_v35 = vpop.permute.xlu2 %3482  ;;  %v3463_v18 = vpop.permute.xlu0 %3462  ;;  %v3354_v62 = vmul.f32 %v4457_v46, %v3353_v48  ;;  %v3371_v55 = vsub.f32 %v7105_v16, %v7104_v27  ;;  %v7106_v48 = vld [vmem:[#allocation19_spill] sm:$0xff] }
 0x434   : > { %v3546_v39 = vmul.f32 %v3483_v35, %v3370_v50  ;;  %v3542_v53 = vmul.f32 %v3463_v18, %v3366_v9 }
 0x435   : > { %v3458_v24 = vpop.permute.xlu1 %3457  ;;  %v3358_v41 = vsel %vm3357_vm7, %v4457_v46, %v3354_v62  ;;  %v3368_v46 = vsub.f32 %v7097_v10, %v7096_v32  ;;  %v7109_v62 = vld [vmem:[#allocation33_spill] sm:$0xff] }
 0x436   : > { %v3700_v11 = vadd.f32 %v7090_v63, %v3546_v39  ;;  %v3696_v57 = vadd.f32 %v7091_v30, %v3542_v53  ;;  %v3541_v61 = vmul.f32 %v3458_v24, %v3365_v7  ;;  %v3424_v5 = vmul.f32 %v3402_v45, %v3358_v41  ;;  %v7110_v45 = vld [vmem:[#allocation20_spill] sm:$0xff]  ;;  %v7112_v24 = vld [vmem:[#allocation22_spill] sm:$0xff]  ;;  %v7113_v30 = vld [vmem:[#allocation21_spill] sm:$0xff] }
 0x437   : > { %v3374_v39 = vsub.f32 %v7110_v45, %v7109_v62  ;;  %v3375_v41 = vsub.f32 %v7112_v24, %v6770_v54 }
 0x438   : > { %3722 = vst.msk [vmem:[%s6874_s10 + $0x58] sm:$0xff] %vm2874_vm1, %v3700_v11  ;;  %v3695_v51 = vadd.f32 %v7092_v58, %v3541_v61  ;;  %3532 = vperm.xlu1 %4412, %v3424_v5   ;;  %v7114_v61 = vld [vmem:[#allocation24_spill] sm:$0xff] }
 0x439   : > { %3718 = vst.msk [vmem:[%s6874_s10 + $0x38] sm:$0xff] %vm2874_vm1, %v3696_v57  ;;  %v3377_v5 = vsub.f32 %v7114_v61, %v6855_v36  ;;  %v7117_v36 = vld [vmem:[#allocation30_spill] sm:$0xff] }
 0x43a   : > { %3717 = vst.msk [vmem:[%s6874_s10 + $0x30] sm:$0xff] %vm2874_vm1, %v3695_v51  ;;  %3676 = vperm.xlu2 %4413, %v3576_v14   ;;  %v7115_v51 = vld [vmem:[#allocation16_spill] sm:$0xff] }
 0x43b   : > { %v3498_v42 = vpop.permute.xlu2 %3497  ;;  %v3478_v59 = vpop.permute.xlu0 %3477 }
 0x43c   : > { %v3549_v19 = vmul.f32 %v3498_v42, %v3373_v25  ;;  %v3545_v31 = vmul.f32 %v3478_v59, %v3369_v56  ;;  %v7116_v25 = vld [vmem:[#allocation25_spill] sm:$0xff] }
 0x43d   : > { %v3473_v3 = vpop.permute.xlu1 %3472  ;;  %v3378_v4 = vsub.f32 %v7116_v25, %v6891_v40 }
 0x43e   : > { %v3703_v20 = vadd.f32 %v7098_v15, %v3549_v19  ;;  %v3699_v23 = vadd.f32 %v7099_v29, %v3545_v31  ;;  %v3544_v22 = vmul.f32 %v3473_v3, %v3368_v46  ;;  %v3380_v19 = vsub.f32 %v7117_v36, %v6899_v47  ;;  %v7118_v3 = vld [vmem:[#allocation27_spill] sm:$0xff] }
 0x440   : > { %3725 = vst.msk [vmem:[%s6874_s10 + $0x70] sm:$0xff] %vm2874_vm1, %v3703_v20  ;;  %v3698_v43 = vadd.f32 %v7100_v26, %v3544_v22  ;;  %3681 = vperm.xlu1 %4412, %v3577_v28   ;;  %v3379_v28 = vsub.f32 %v7118_v3, %v6895_v1 }
 0x441   : > { %3721 = vst.msk [vmem:[%s6874_s10 + $0x50] sm:$0xff] %vm2874_vm1, %v3699_v23 }
 0x442   : > { %3720 = vst.msk [vmem:[%s6874_s10 + $0x48] sm:$0xff] %vm2874_vm1, %v3698_v43 }
 0x443   : > { %v3513_v49 = vpop.permute.xlu2 %3512  ;;  %v3493_v8 = vpop.permute.xlu0 %3492 }
 0x444   : > { %v3552_v33 = vmul.f32 %v3513_v49, %v3376_v44  ;;  %v3548_v2 = vmul.f32 %v3493_v8, %v3372_v12 }
 0x445   : > { %v3488_v17 = vpop.permute.xlu1 %3487 }
 0x446   : > { %v3706_v50 = vadd.f32 %v7106_v48, %v3552_v33  ;;  %v3702_v9 = vadd.f32 %v7107_v13, %v3548_v2  ;;  %v3547_v35 = vmul.f32 %v3488_v17, %v3371_v55 }
 0x448   : > { %3728 = vst.msk [vmem:[%s6874_s10 + $0x88] sm:$0xff] %vm2874_vm1, %v3706_v50  ;;  %v3701_v18 = vadd.f32 %v7108_v52, %v3547_v35 }
 0x449   : > { %3724 = vst.msk [vmem:[%s6874_s10 + $0x68] sm:$0xff] %vm2874_vm1, %v3702_v9 }
 0x44a   : > { %3723 = vst.msk [vmem:[%s6874_s10 + $0x60] sm:$0xff] %vm2874_vm1, %v3701_v18 }
 0x44d   : > { %v3503_v53 = vpop.permute.xlu1 %3502 }
 0x44e   : > { %v3550_v34 = vmul.f32 %v3503_v53, %v3374_v39 }
 0x450   : > { %v3704_v7 = vadd.f32 %v7111_v60, %v3550_v34 }
 0x451   : > { %v3508_v63 = vpop.permute.xlu0 %3507 }
 0x452   : > { %3726 = vst.msk [vmem:[%s6874_s10 + $0x78] sm:$0xff] %vm2874_vm1, %v3704_v7  ;;  %v3551_v11 = vmul.f32 %v3508_v63, %v3375_v41 }
 0x454   : > { %v3705_v57 = vadd.f32 %v7113_v30, %v3551_v11 }
 0x456   : > { %3727 = vst.msk [vmem:[%s6874_s10 + $0x80] sm:$0xff] %vm2874_vm1, %v3705_v57 }
 0x461   : > { %v3518_v14 = vpop.permute.xlu1 %3517 }
 0x462   : > { %v3553_v58 = vmul.f32 %v3518_v14, %v3377_v5 }
 0x464   : > { %v3707_v38 = vadd.f32 %v7115_v51, %v3553_v58 }
 0x466   : > { %3729 = vst.msk [vmem:[%s6874_s10 + $0x90] sm:$0xff] %vm2874_vm1, %v3707_v38 }
 0x48c   : > { %v3528_v54 = vpop.permute.xlu2 %3527 }
 0x48d   : > { %v3555_v40 = vmul.f32 %v3528_v54, %v3379_v28 }
 0x494   : > { %v3677_v42 = vpop.permute.xlu2 %3676 }
 0x49a   : > { %v3523_v0 = vpop.permute.xlu0 %3522 }
 0x49b   : > { %v3554_v56 = vmul.f32 %v3523_v0, %v3378_v4 }
 0x49d   : > { %v3708_v59 = vadd.f32 %v3677_v42, %v3554_v56 }
 0x49f   : > { %3730 = vst.msk [vmem:[%s6874_s10 + $0x98] sm:$0xff] %vm2874_vm1, %v3708_v59 }
 0x4a2   : > { %v3687_v10 = vpop.permute.xlu0 %3686 }
 0x4aa   : > { %v3533_v31 = vpop.permute.xlu1 %3532 }
 0x4ab   : > { %v3556_v32 = vmul.f32 %v3533_v31, %v3380_v19 }
 0x4ad   : > { %v3710_v46 = vadd.f32 %v3687_v10, %v3556_v32 }
 0x4af   : > { %3732 = vst.msk [vmem:[%s6874_s10 + $0xa8] sm:$0xff] %vm2874_vm1, %v3710_v46 }
 0x4b2   : > { %v3682_v15 = vpop.permute.xlu1 %3681 }
 0x4b3   : > { %v3709_v20 = vadd.f32 %v3682_v15, %v3555_v40 }
 0x4b5   : > { %3731 = vst.msk [vmem:[%s6874_s10 + $0xa0] sm:$0xff] %vm2874_vm1, %v3709_v20 }
 0x4b6 PF: > { %s15_s18 = sadd.s32 1, %s4464_s18  }
 0x4b7   : > { %p12_p4 = scmp.ge.s32.totalorder %s15_s18, 4  }
 0x4b9   :  { %14 = sbr.rel (!%p12_p4) target bundleno = 1 (0x1), region = 76 }

</bundles_post_ra>
